<compile_context>
chip_gen: v7x
topology: tpu7x:2x2x1
jax: 0.10.0
libtpu: 0.0.40
codegen_flags: <defaults>
</compile_context>

<pallas_src>
import functools
import math

import jax
import jax.numpy as jnp
from jax.experimental import pallas as pl
from jax.experimental.pallas import tpu as pltpu

NEG_INF = -1e30  # stand-in for -inf in additive attention masks


# ----------------------------- Pallas kernels -----------------------------

def _linear_kernel(x_ref, w_ref, b_ref, o_ref, *, activation):
    x = x_ref[...].astype(jnp.bfloat16)
    w = w_ref[...].astype(jnp.bfloat16)
    y = jnp.dot(x, w, preferred_element_type=jnp.float32) + b_ref[...]
    if activation == "sigmoid":
        y = jax.nn.sigmoid(y)
    elif activation == "relu":
        y = jnp.maximum(y, 0.0)
    o_ref[...] = y.astype(o_ref.dtype)


def linear_pallas(x, w, b, activation="none", *, block_rows=256, vmem_limit=None):
    """y = act(x @ w + b).  x: (M, K), w: (K, N), b: (N,).  Tiled over rows."""
    M, K = x.shape
    N = w.shape[1]
    tm = min(block_rows, M)
    cp = dict(dimension_semantics=("parallel",))
    if vmem_limit is not None:
        cp["vmem_limit_bytes"] = vmem_limit
    return pl.pallas_call(
        functools.partial(_linear_kernel, activation=activation),
        out_shape=jax.ShapeDtypeStruct((M, N), jnp.float32),
        grid=(pl.cdiv(M, tm),),
        in_specs=[
            pl.BlockSpec((tm, K), lambda i: (i, 0)),
            pl.BlockSpec((K, N), lambda i: (0, 0)),
            pl.BlockSpec((1, N), lambda i: (0, 0)),
        ],
        out_specs=pl.BlockSpec((tm, N), lambda i: (i, 0)),
        compiler_params=pltpu.CompilerParams(**cp),
    )(x, w, b.reshape(1, N))


def _layernorm_kernel(x_ref, g_ref, b_ref, o_ref, *, eps):
    x = x_ref[...]
    mean = jnp.mean(x, axis=-1, keepdims=True)
    var = jnp.mean(jnp.square(x - mean), axis=-1, keepdims=True)
    o_ref[...] = ((x - mean) * jax.lax.rsqrt(var + eps) * g_ref[...] + b_ref[...]).astype(o_ref.dtype)


def layernorm_pallas(x, g, b, eps=1e-5, *, block_rows=512):
    M, E = x.shape
    tm = min(block_rows, M)
    return pl.pallas_call(
        functools.partial(_layernorm_kernel, eps=eps),
        out_shape=jax.ShapeDtypeStruct((M, E), jnp.float32),
        grid=(pl.cdiv(M, tm),),
        in_specs=[
            pl.BlockSpec((tm, E), lambda i: (i, 0)),
            pl.BlockSpec((1, E), lambda i: (0, 0)),
            pl.BlockSpec((1, E), lambda i: (0, 0)),
        ],
        out_specs=pl.BlockSpec((tm, E), lambda i: (i, 0)),
        compiler_params=pltpu.CompilerParams(dimension_semantics=("parallel",)),
    )(x, g.reshape(1, E), b.reshape(1, E))


def _linear_add_ln_kernel(x_ref, w_ref, b_ref, r_ref, g_ref, bb_ref, o_ref, *, eps):
    """LayerNorm(residual + (x @ w + b)) — fused attention out-proj / residual / norm."""
    y = jnp.dot(x_ref[...].astype(jnp.bfloat16), w_ref[...].astype(jnp.bfloat16),
                preferred_element_type=jnp.float32) + b_ref[...]
    z = r_ref[...] + y
    mean = jnp.mean(z, axis=-1, keepdims=True)
    var = jnp.mean(jnp.square(z - mean), axis=-1, keepdims=True)
    o_ref[...] = ((z - mean) * jax.lax.rsqrt(var + eps) * g_ref[...] + bb_ref[...]).astype(o_ref.dtype)


def linear_add_ln_pallas(x, w, b, residual, g, bb, eps=1e-5, *, block_rows=256):
    M, K = x.shape
    N = w.shape[1]
    tm = min(block_rows, M)
    return pl.pallas_call(
        functools.partial(_linear_add_ln_kernel, eps=eps),
        out_shape=jax.ShapeDtypeStruct((M, N), jnp.float32),
        grid=(pl.cdiv(M, tm),),
        in_specs=[
            pl.BlockSpec((tm, K), lambda i: (i, 0)),
            pl.BlockSpec((K, N), lambda i: (0, 0)),
            pl.BlockSpec((1, N), lambda i: (0, 0)),
            pl.BlockSpec((tm, N), lambda i: (i, 0)),
            pl.BlockSpec((1, N), lambda i: (0, 0)),
            pl.BlockSpec((1, N), lambda i: (0, 0)),
        ],
        out_specs=pl.BlockSpec((tm, N), lambda i: (i, 0)),
        compiler_params=pltpu.CompilerParams(dimension_semantics=("parallel",)),
    )(x, w, b.reshape(1, N), residual, g.reshape(1, N), bb.reshape(1, N))


def _ffn_add_ln_kernel(x_ref, w1_ref, b1_ref, w2_ref, b2_ref, g_ref, bb_ref, o_ref, *, eps):
    """LayerNorm(x + lin2(relu(lin1(x)))) — the (M, F) hidden never leaves VMEM."""
    x = x_ref[...]
    h = jnp.dot(x.astype(jnp.bfloat16), w1_ref[...].astype(jnp.bfloat16),
                preferred_element_type=jnp.float32) + b1_ref[...]
    h = jnp.maximum(h, 0.0)
    y = jnp.dot(h.astype(jnp.bfloat16), w2_ref[...].astype(jnp.bfloat16),
                preferred_element_type=jnp.float32) + b2_ref[...]
    z = x + y
    mean = jnp.mean(z, axis=-1, keepdims=True)
    var = jnp.mean(jnp.square(z - mean), axis=-1, keepdims=True)
    o_ref[...] = ((z - mean) * jax.lax.rsqrt(var + eps) * g_ref[...] + bb_ref[...]).astype(o_ref.dtype)


def ffn_add_ln_pallas(x, w1, b1, w2, b2, g, bb, eps=1e-5, *, block_rows=256):
    M, E = x.shape
    F = w1.shape[1]
    tm = min(block_rows, M)
    return pl.pallas_call(
        functools.partial(_ffn_add_ln_kernel, eps=eps),
        out_shape=jax.ShapeDtypeStruct((M, E), jnp.float32),
        grid=(pl.cdiv(M, tm),),
        in_specs=[
            pl.BlockSpec((tm, E), lambda i: (i, 0)),
            pl.BlockSpec((E, F), lambda i: (0, 0)),
            pl.BlockSpec((1, F), lambda i: (0, 0)),
            pl.BlockSpec((F, E), lambda i: (0, 0)),
            pl.BlockSpec((1, E), lambda i: (0, 0)),
            pl.BlockSpec((1, E), lambda i: (0, 0)),
            pl.BlockSpec((1, E), lambda i: (0, 0)),
        ],
        out_specs=pl.BlockSpec((tm, E), lambda i: (i, 0)),
        compiler_params=pltpu.CompilerParams(dimension_semantics=("parallel",)),
    )(x, w1, b1.reshape(1, F), w2, b2.reshape(1, E), g.reshape(1, E), bb.reshape(1, E))


def _mha_kernel(*refs, num_heads, scale, mask_mode):
    """One batch element per grid step; all heads handled in-kernel via lane slices."""
    if mask_mode == "keypad":
        q_ref, k_ref, v_ref, bias_ref, o_ref = refs
    else:
        q_ref, k_ref, v_ref, o_ref = refs
    q = q_ref[0]                      # (Tq, E)
    k = k_ref[0]                      # (Tk, E)
    v = v_ref[0]                      # (Tk, E)
    Tq, E = q.shape
    Tk = k.shape[0]
    dh = E // num_heads

    if mask_mode == "keypad":
        bias = bias_ref[0]            # (1, Tk) additive row, broadcasts over queries
    elif mask_mode == "causal":
        row = jax.lax.broadcasted_iota(jnp.int32, (Tq, Tk), 0)
        col = jax.lax.broadcasted_iota(jnp.int32, (Tq, Tk), 1)
        bias = jnp.where(row >= col, 0.0, NEG_INF)
    else:
        bias = None

    outs = []
    for h in range(num_heads):
        qh = q[:, h * dh:(h + 1) * dh].astype(jnp.bfloat16)
        kh = k[:, h * dh:(h + 1) * dh].astype(jnp.bfloat16)
        vh = v[:, h * dh:(h + 1) * dh].astype(jnp.bfloat16)
        s = jnp.einsum("qd,kd->qk", qh, kh, preferred_element_type=jnp.float32) * scale
        if bias is not None:
            s = s + bias
        m = jnp.max(s, axis=-1, keepdims=True)
        p = jnp.exp(s - m)
        denom = jnp.sum(p, axis=-1, keepdims=True)
        p = p * pl.reciprocal(denom, approx=True)
        outs.append(jnp.dot(p.astype(jnp.bfloat16), vh, preferred_element_type=jnp.float32))
    o_ref[0] = jnp.concatenate(outs, axis=-1).astype(o_ref.dtype)


def attention_pallas(q, k, v, bias, *, num_heads, mask_mode):
    """softmax(q k^T / sqrt(dh) + mask) @ v per head; grid over batch, heads in-kernel."""
    N, Tq, E = q.shape
    Tk = k.shape[1]
    scale = 1.0 / math.sqrt(E // num_heads)
    in_specs = [
        pl.BlockSpec((1, Tq, E), lambda i: (i, 0, 0)),
        pl.BlockSpec((1, Tk, E), lambda i: (i, 0, 0)),
        pl.BlockSpec((1, Tk, E), lambda i: (i, 0, 0)),
    ]
    args = [q, k, v]
    if mask_mode == "keypad":
        in_specs.append(pl.BlockSpec((1, 1, Tk), lambda i: (i, 0, 0)))
        args.append(bias)
    return pl.pallas_call(
        functools.partial(_mha_kernel, num_heads=num_heads, scale=scale, mask_mode=mask_mode),
        out_shape=jax.ShapeDtypeStruct((N, Tq, E), jnp.float32),
        grid=(N,),
        in_specs=in_specs,
        out_specs=pl.BlockSpec((1, Tq, E), lambda i: (i, 0, 0)),
        compiler_params=pltpu.CompilerParams(dimension_semantics=("parallel",)),
    )(*args)


# ----------------------------- model glue (JAX) -----------------------------

def encoder_layer(x, p, keypad_bias, num_heads):
    """Post-norm TransformerEncoderLayer (activation=relu), fused kernels."""
    N, S, E = x.shape
    x2 = x.reshape(N * S, E)
    a = p["self_attn"]
    qkv = linear_pallas(x2, a["in_w"].T, a["in_b"])                # fused Q/K/V, (M, 3E)
    q = qkv[:, :E].reshape(N, S, E)
    k = qkv[:, E:2 * E].reshape(N, S, E)
    v = qkv[:, 2 * E:].reshape(N, S, E)
    attn = attention_pallas(q, k, v, keypad_bias, num_heads=num_heads, mask_mode="keypad")
    x2 = linear_add_ln_pallas(attn.reshape(N * S, E), a["out_w"].T, a["out_b"],
                              x2, p["norm1_g"], p["norm1_b"])
    x2 = ffn_add_ln_pallas(x2, p["lin1_w"].T, p["lin1_b"], p["lin2_w"].T, p["lin2_b"],
                           p["norm2_g"], p["norm2_b"])
    return x2.reshape(N, S, E)


def decoder_layer(y, mem, p, num_heads):
    """Post-norm TransformerDecoderLayer (activation=relu), fused kernels."""
    N, T, E = y.shape
    S = mem.shape[1]
    y2 = y.reshape(N * T, E)

    # self-attention (causal mask built in-kernel)
    a = p["self_attn"]
    qkv = linear_pallas(y2, a["in_w"].T, a["in_b"])
    q = qkv[:, :E].reshape(N, T, E)
    k = qkv[:, E:2 * E].reshape(N, T, E)
    v = qkv[:, 2 * E:].reshape(N, T, E)
    sa = attention_pallas(q, k, v, None, num_heads=num_heads, mask_mode="causal")
    y2 = linear_add_ln_pallas(sa.reshape(N * T, E), a["out_w"].T, a["out_b"],
                              y2, p["norm1_g"], p["norm1_b"])

    # cross-attention (no memory key-padding mask, per nn.Transformer defaults)
    c = p["cross_attn"]
    q = linear_pallas(y2, c["in_w"][:E].T, c["in_b"][:E]).reshape(N, T, E)
    kv = linear_pallas(mem.reshape(N * S, E), c["in_w"][E:].T, c["in_b"][E:])   # fused K/V
    k = kv[:, :E].reshape(N, S, E)
    v = kv[:, E:].reshape(N, S, E)
    ca = attention_pallas(q, k, v, None, num_heads=num_heads, mask_mode="none")
    y2 = linear_add_ln_pallas(ca.reshape(N * T, E), c["out_w"].T, c["out_b"],
                              y2, p["norm2_g"], p["norm2_b"])

    # feed-forward
    y2 = ffn_add_ln_pallas(y2, p["lin1_w"].T, p["lin1_b"], p["lin2_w"].T, p["lin2_b"],
                           p["norm3_g"], p["norm3_b"])
    return y2.reshape(N, T, E)


def onset_transformer_forward(params, src, trg, *, max_len, num_heads):
    N = src.shape[0]
    S = src.shape[-1]          # src_seq_length (== max_len, as the reference assumes)
    T = trg.shape[1]
    V, E = params["fc_out_w"].shape
    H = num_heads

    # make_src_mask: True == ignored (PyTorch key_padding_mask semantics, reproducing the
    # reference's "positions < num_trg are masked" behavior, num_trg possibly fractional).
    num_trg = (jnp.sum(trg != 2, axis=1).astype(jnp.float32) - 2.0) / 2.0
    keypad_bias = jnp.where(jnp.arange(max_len)[None, :] < num_trg[:, None],
                            NEG_INF, 0.0).astype(jnp.float32).reshape(N, 1, max_len)

    # make_embed_src: Linear(512*7 -> E) + Sigmoid applied to every spectrogram frame
    src_frames = jnp.transpose(src.reshape(N, 512 * 7, max_len), (0, 2, 1)).reshape(N * max_len, 512 * 7)
    src_embed = linear_pallas(src_frames, params["spec_w"].T, params["spec_b"],
                              activation="sigmoid", block_rows=256,
                              vmem_limit=48 * 1024 * 1024)   # explicit budget for v7x's 64 MiB VMEM
    src_embed = src_embed.reshape(N, max_len, E)

    # positional embeddings (dropout == identity at inference)
    embed_src = src_embed + params["src_pos_emb"][jnp.arange(S)][None, :, :]                     # (N, S, E)
    embed_trg = params["trg_word_emb"][trg] + params["trg_pos_emb"][jnp.arange(T)][None, :, :]   # (N, T, E)

    # encoder (+ final norm, as in nn.Transformer)
    x = embed_src
    for p in params["enc_layers"]:
        x = encoder_layer(x, p, keypad_bias, H)
    mem = layernorm_pallas(x.reshape(N * S, E), params["enc_norm_g"], params["enc_norm_b"]).reshape(N, S, E)

    # decoder (+ final norm)
    y = embed_trg
    for p in params["dec_layers"]:
        y = decoder_layer(y, mem, p, H)
    y = layernorm_pallas(y.reshape(N * T, E), params["dec_norm_g"], params["dec_norm_b"])

    out = linear_pallas(y, params["fc_out_w"].T, params["fc_out_b"])
    return out.reshape(N, T, V)


# ----------------------------- parameter init -----------------------------

def init_params(key, *, embedding_size, trg_vocab_size, num_heads, num_encoder_layers,
                num_decoder_layers, forward_expansion, max_len):
    E, V, F = embedding_size, trg_vocab_size, forward_expansion
    keys = iter(jax.random.split(key, 256))

    def w(shape, scale=0.05):
        return jax.random.normal(next(keys), shape, jnp.float32) * scale

    def attn_params():
        return {"in_w": w((3 * E, E)), "in_b": jnp.zeros((3 * E,), jnp.float32),
                "out_w": w((E, E)), "out_b": jnp.zeros((E,), jnp.float32)}

    def enc_layer():
        return {"self_attn": attn_params(),
                "lin1_w": w((F, E)), "lin1_b": jnp.zeros((F,), jnp.float32),
                "lin2_w": w((E, F)), "lin2_b": jnp.zeros((E,), jnp.float32),
                "norm1_g": jnp.ones((E,), jnp.float32), "norm1_b": jnp.zeros((E,), jnp.float32),
                "norm2_g": jnp.ones((E,), jnp.float32), "norm2_b": jnp.zeros((E,), jnp.float32)}

    def dec_layer():
        d = enc_layer()
        d["cross_attn"] = attn_params()
        d["norm3_g"] = jnp.ones((E,), jnp.float32)
        d["norm3_b"] = jnp.zeros((E,), jnp.float32)
        return d

    return {
        "src_pos_emb": w((max_len, E)),
        "trg_pos_emb": w((max_len, E)),
        "trg_word_emb": w((V, E)),
        "spec_w": w((E, 512 * 7), 0.01), "spec_b": jnp.zeros((E,), jnp.float32),
        "enc_layers": [enc_layer() for _ in range(num_encoder_layers)],
        "enc_norm_g": jnp.ones((E,), jnp.float32), "enc_norm_b": jnp.zeros((E,), jnp.float32),
        "dec_layers": [dec_layer() for _ in range(num_decoder_layers)],
        "dec_norm_g": jnp.ones((E,), jnp.float32), "dec_norm_b": jnp.zeros((E,), jnp.float32),
        "fc_out_w": w((V, E)), "fc_out_b": jnp.zeros((V,), jnp.float32),
    }


# ----------------------------- main -----------------------------

if __name__ == "__main__":
    embedding_size = 32
    trg_vocab_size = 16
    num_heads = 2
    num_encoder_layers = 1
    num_decoder_layers = 1
    forward_expansion = 64     # nn.Transformer dim_feedforward
    max_len = 8
    N, T = 2, 6

    key = jax.random.PRNGKey(0)
    pkey, skey = jax.random.split(key)
    params = init_params(
        pkey, embedding_size=embedding_size, trg_vocab_size=trg_vocab_size,
        num_heads=num_heads, num_encoder_layers=num_encoder_layers,
        num_decoder_layers=num_decoder_layers, forward_expansion=forward_expansion,
        max_len=max_len)

    src = jax.random.normal(skey, (N, 512 * 7, max_len), jnp.float32)
    trg = jnp.array([[1, 3, 5, 2, 2, 2],
                     [1, 4, 2, 2, 2, 2]], dtype=jnp.int32)

    fwd = jax.jit(functools.partial(onset_transformer_forward,
                                    max_len=max_len, num_heads=num_heads))
    out = fwd(params, src, trg)
    jax.block_until_ready(out)

    assert out.shape == (N, T, trg_vocab_size), out.shape
    assert bool(jnp.all(jnp.isfinite(out)))
    print("KERNEL_OK")
</pallas_src>

<mosaic_0001>
module attributes {stable_mosaic.version = 11 : i64} {
  func.func @_linear_add_ln_kernel(%arg0: i32, %arg1: memref<12x32xf32, #tpu.memory_space<vmem>>, %arg2: memref<32x32xf32, #tpu.memory_space<vmem>>, %arg3: memref<1x32xf32, #tpu.memory_space<vmem>>, %arg4: memref<12x32xf32, #tpu.memory_space<vmem>>, %arg5: memref<1x32xf32, #tpu.memory_space<vmem>>, %arg6: memref<1x32xf32, #tpu.memory_space<vmem>>, %arg7: memref<12x32xf32, #tpu.memory_space<vmem>>) attributes {dimension_semantics = [#tpu.dimension_semantics<parallel>], iteration_bounds = array<i64: 1>, scalar_prefetch = 0 : i64, scratch_operands = 0 : i64, tpu.core_type = #tpu.core_type<tc>, window_params = [{transform_indices = @transform_0, window_bounds = array<i64: 12, 32>}, {pipeline_mode = #tpu.pipeline_mode<synchronous>, transform_indices = @transform_1, window_bounds = array<i64: 32, 32>}, {pipeline_mode = #tpu.pipeline_mode<synchronous>, transform_indices = @transform_2, window_bounds = array<i64: 1, 32>}, {transform_indices = @transform_3, window_bounds = array<i64: 12, 32>}, {pipeline_mode = #tpu.pipeline_mode<synchronous>, transform_indices = @transform_4, window_bounds = array<i64: 1, 32>}, {pipeline_mode = #tpu.pipeline_mode<synchronous>, transform_indices = @transform_5, window_bounds = array<i64: 1, 32>}, {transform_indices = @transform_6, window_bounds = array<i64: 12, 32>}]} {
    %c0 = arith.constant 0 : index
    %c0_0 = arith.constant 0 : index
    %0 = vector.load %arg1[%c0, %c0_0] : memref<12x32xf32, #tpu.memory_space<vmem>>, vector<12x32xf32>
    %1 = arith.truncf %0 : vector<12x32xf32> to vector<12x32xbf16>
    %c0_1 = arith.constant 0 : index
    %c0_2 = arith.constant 0 : index
    %2 = vector.load %arg2[%c0_1, %c0_2] : memref<32x32xf32, #tpu.memory_space<vmem>>, vector<32x32xf32>
    %3 = arith.truncf %2 : vector<32x32xf32> to vector<32x32xbf16>
    %cst = arith.constant dense<0.000000e+00> : vector<12x32xf32>
    %4 = tpu.matmul %1, %3, %cst {dimension_numbers = #tpu.dot_dimension_numbers<[1], [0], [0], [1], [0, 0, 1, 1], [], []>} : vector<12x32xbf16>, vector<32x32xbf16>, vector<12x32xf32> -> vector<12x32xf32>
    %c0_3 = arith.constant 0 : index
    %c0_4 = arith.constant 0 : index
    %5 = vector.load %arg3[%c0_3, %c0_4] : memref<1x32xf32, #tpu.memory_space<vmem>>, vector<1x32xf32>
    %6 = vector.broadcast %5 : vector<1x32xf32> to vector<12x32xf32>
    %7 = arith.addf %4, %6 : vector<12x32xf32>
    %c0_5 = arith.constant 0 : index
    %c0_6 = arith.constant 0 : index
    %8 = vector.load %arg4[%c0_5, %c0_6] : memref<12x32xf32, #tpu.memory_space<vmem>>, vector<12x32xf32>
    %9 = arith.addf %8, %7 : vector<12x32xf32>
    %cst_7 = arith.constant dense<0.000000e+00> : vector<12xf32>
    %10 = vector.multi_reduction <add>, %9, %cst_7 [1] : vector<12x32xf32> to vector<12xf32>
    %11 = vector.shape_cast %10 : vector<12xf32> to vector<12x1xf32>
    %cst_8 = arith.constant 3.200000e+01 : f32
    %12 = vector.broadcast %cst_8 : f32 to vector<12x1xf32>
    %13 = arith.divf %11, %12 : vector<12x1xf32>
    %14 = vector.broadcast %13 : vector<12x1xf32> to vector<12x32xf32>
    %15 = arith.subf %9, %14 : vector<12x32xf32>
    %16 = arith.mulf %15, %15 : vector<12x32xf32>
    %cst_9 = arith.constant dense<0.000000e+00> : vector<12xf32>
    %17 = vector.multi_reduction <add>, %16, %cst_9 [1] : vector<12x32xf32> to vector<12xf32>
    %18 = vector.shape_cast %17 : vector<12xf32> to vector<12x1xf32>
    %cst_10 = arith.constant 3.200000e+01 : f32
    %19 = vector.broadcast %cst_10 : f32 to vector<12x1xf32>
    %20 = arith.divf %18, %19 : vector<12x1xf32>
    %21 = vector.broadcast %13 : vector<12x1xf32> to vector<12x32xf32>
    %22 = arith.subf %9, %21 : vector<12x32xf32>
    %cst_11 = arith.constant 9.99999974E-6 : f32
    %23 = vector.broadcast %cst_11 : f32 to vector<12x1xf32>
    %24 = arith.addf %20, %23 : vector<12x1xf32>
    %25 = math.rsqrt %24 : vector<12x1xf32>
    %26 = vector.broadcast %25 : vector<12x1xf32> to vector<12x32xf32>
    %27 = arith.mulf %22, %26 : vector<12x32xf32>
    %c0_12 = arith.constant 0 : index
    %c0_13 = arith.constant 0 : index
    %28 = vector.load %arg5[%c0_12, %c0_13] : memref<1x32xf32, #tpu.memory_space<vmem>>, vector<1x32xf32>
    %29 = vector.broadcast %28 : vector<1x32xf32> to vector<12x32xf32>
    %30 = arith.mulf %27, %29 : vector<12x32xf32>
    %c0_14 = arith.constant 0 : index
    %c0_15 = arith.constant 0 : index
    %31 = vector.load %arg6[%c0_14, %c0_15] : memref<1x32xf32, #tpu.memory_space<vmem>>, vector<1x32xf32>
    %32 = vector.broadcast %31 : vector<1x32xf32> to vector<12x32xf32>
    %33 = arith.addf %30, %32 : vector<12x32xf32>
    %c0_16 = arith.constant 0 : index
    %c0_17 = arith.constant 0 : index
    %34 = vector.load %arg7[%c0_16, %c0_17] : memref<12x32xf32, #tpu.memory_space<vmem>>, vector<12x32xf32>
    tpu.vector_store %arg7[%c0_16, %c0_17], %33 {strides = array<i32>} : memref<12x32xf32, #tpu.memory_space<vmem>>, vector<12x32xf32>,
    return
  }
  func.func @transform_0(%arg0: i32) -> (i32, i32) {
    %c0_i32 = arith.constant 0 : i32
    %c0_i32_0 = arith.constant 0 : i32
    return %arg0, %c0_i32 : i32, i32
  }
  func.func @transform_1(%arg0: i32) -> (i32, i32) {
    %c0_i32 = arith.constant 0 : i32
    %c0_i32_0 = arith.constant 0 : i32
    %c0_i32_1 = arith.constant 0 : i32
    return %c0_i32, %c0_i32_0 : i32, i32
  }
  func.func @transform_2(%arg0: i32) -> (i32, i32) {
    %c0_i32 = arith.constant 0 : i32
    %c0_i32_0 = arith.constant 0 : i32
    %c0_i32_1 = arith.constant 0 : i32
    return %c0_i32, %c0_i32_0 : i32, i32
  }
  func.func @transform_3(%arg0: i32) -> (i32, i32) {
    %c0_i32 = arith.constant 0 : i32
    %c0_i32_0 = arith.constant 0 : i32
    return %arg0, %c0_i32 : i32, i32
  }
  func.func @transform_4(%arg0: i32) -> (i32, i32) {
    %c0_i32 = arith.constant 0 : i32
    %c0_i32_0 = arith.constant 0 : i32
    %c0_i32_1 = arith.constant 0 : i32
    return %c0_i32, %c0_i32_0 : i32, i32
  }
  func.func @transform_5(%arg0: i32) -> (i32, i32) {
    %c0_i32 = arith.constant 0 : i32
    %c0_i32_0 = arith.constant 0 : i32
    %c0_i32_1 = arith.constant 0 : i32
    return %c0_i32, %c0_i32_0 : i32, i32
  }
  func.func @transform_6(%arg0: i32) -> (i32, i32) {
    %c0_i32 = arith.constant 0 : i32
    %c0_i32_0 = arith.constant 0 : i32
    return %arg0, %c0_i32 : i32, i32
  }
}

module attributes {stable_mosaic.version = 11 : i64} {
  func.func @_mha_kernel(%arg0: i32, %arg1: memref<1x6x32xf32, #tpu.memory_space<vmem>>, %arg2: memref<1x6x32xf32, #tpu.memory_space<vmem>>, %arg3: memref<1x6x32xf32, #tpu.memory_space<vmem>>, %arg4: memref<1x6x32xf32, #tpu.memory_space<vmem>>) attributes {dimension_semantics = [#tpu.dimension_semantics<parallel>], iteration_bounds = array<i64: 2>, scalar_prefetch = 0 : i64, scratch_operands = 0 : i64, tpu.core_type = #tpu.core_type<tc>, window_params = [{transform_indices = @transform_0, window_bounds = array<i64: 1, 6, 32>}, {transform_indices = @transform_1, window_bounds = array<i64: 1, 6, 32>}, {transform_indices = @transform_2, window_bounds = array<i64: 1, 6, 32>}, {transform_indices = @transform_3, window_bounds = array<i64: 1, 6, 32>}]} {
    %c0 = arith.constant 0 : index
    %c0_0 = arith.constant 0 : index
    %c0_1 = arith.constant 0 : index
    %0 = vector.load %arg1[%c0, %c0_0, %c0_1] : memref<1x6x32xf32, #tpu.memory_space<vmem>>, vector<1x6x32xf32>
    %1 = vector.shape_cast %0 : vector<1x6x32xf32> to vector<6x32xf32>
    %c0_2 = arith.constant 0 : index
    %c0_3 = arith.constant 0 : index
    %c0_4 = arith.constant 0 : index
    %2 = vector.load %arg2[%c0_2, %c0_3, %c0_4] : memref<1x6x32xf32, #tpu.memory_space<vmem>>, vector<1x6x32xf32>
    %3 = vector.shape_cast %2 : vector<1x6x32xf32> to vector<6x32xf32>
    %c0_5 = arith.constant 0 : index
    %c0_6 = arith.constant 0 : index
    %c0_7 = arith.constant 0 : index
    %4 = vector.load %arg3[%c0_5, %c0_6, %c0_7] : memref<1x6x32xf32, #tpu.memory_space<vmem>>, vector<1x6x32xf32>
    %5 = vector.shape_cast %4 : vector<1x6x32xf32> to vector<6x32xf32>
    %6 = tpu.iota {dimensions = array<i32: 0>} : vector<6x6xi32>
    %7 = tpu.iota {dimensions = array<i32: 1>} : vector<6x6xi32>
    %8 = arith.cmpi sge, %6, %7 : vector<6x6xi32>
    %cst = arith.constant 0.000000e+00 : f32
    %cst_8 = arith.constant -1.000000e+30 : f32
    %9 = vector.broadcast %cst : f32 to vector<6x6xf32>
    %10 = vector.broadcast %cst_8 : f32 to vector<6x6xf32>
    %11 = arith.select %8, %9, %10 : vector<6x6xi1>, vector<6x6xf32>
    %12 = vector.extract_strided_slice %1 {offsets = [0, 0], sizes = [6, 16], strides = [1, 1]} : vector<6x32xf32> to vector<6x16xf32>
    %13 = arith.truncf %12 : vector<6x16xf32> to vector<6x16xbf16>
    %14 = vector.extract_strided_slice %3 {offsets = [0, 0], sizes = [6, 16], strides = [1, 1]} : vector<6x32xf32> to vector<6x16xf32>
    %15 = arith.truncf %14 : vector<6x16xf32> to vector<6x16xbf16>
    %16 = vector.extract_strided_slice %5 {offsets = [0, 0], sizes = [6, 16], strides = [1, 1]} : vector<6x32xf32> to vector<6x16xf32>
    %17 = arith.truncf %16 : vector<6x16xf32> to vector<6x16xbf16>
    "tpu.trace_start"() <{level = 10 : i32, message = "qd,kd->qk"}> : () -> ()
    %cst_9 = arith.constant dense<0.000000e+00> : vector<6x6xf32>
    %18 = tpu.matmul %13, %15, %cst_9 {dimension_numbers = #tpu.dot_dimension_numbers<[1], [1], [0], [0], [0, 0, 1, 0], [], []>} : vector<6x16xbf16>, vector<6x16xbf16>, vector<6x6xf32> -> vector<6x6xf32>
    "tpu.trace_stop"() : () -> ()
    %cst_10 = arith.constant 2.500000e-01 : f32
    %19 = vector.broadcast %cst_10 : f32 to vector<6x6xf32>
    %20 = arith.mulf %18, %19 : vector<6x6xf32>
    %21 = arith.addf %20, %11 : vector<6x6xf32>
    %cst_11 = arith.constant dense<0xFF800000> : vector<6xf32>
    %22 = vector.multi_reduction <maximumf>, %21, %cst_11 [1] : vector<6x6xf32> to vector<6xf32>
    %23 = vector.shape_cast %22 : vector<6xf32> to vector<6x1xf32>
    %24 = vector.broadcast %23 : vector<6x1xf32> to vector<6x6xf32>
    %25 = arith.subf %21, %24 : vector<6x6xf32>
    %26 = math.exp %25 : vector<6x6xf32>
    %cst_12 = arith.constant dense<0.000000e+00> : vector<6xf32>
    %27 = vector.multi_reduction <add>, %26, %cst_12 [1] : vector<6x6xf32> to vector<6xf32>
    %28 = vector.shape_cast %27 : vector<6xf32> to vector<6x1xf32>
    %29 = tpu.reciprocal %28 {approx = true} : vector<6x1xf32> -> vector<6x1xf32>
    %30 = vector.broadcast %29 : vector<6x1xf32> to vector<6x6xf32>
    %31 = arith.mulf %26, %30 : vector<6x6xf32>
    %32 = arith.truncf %31 : vector<6x6xf32> to vector<6x6xbf16>
    %cst_13 = arith.constant dense<0.000000e+00> : vector<6x16xf32>
    %33 = tpu.matmul %32, %17, %cst_13 {dimension_numbers = #tpu.dot_dimension_numbers<[1], [0], [0], [1], [0, 0, 1, 1], [], []>} : vector<6x6xbf16>, vector<6x16xbf16>, vector<6x16xf32> -> vector<6x16xf32>
    %34 = vector.extract_strided_slice %1 {offsets = [0, 16], sizes = [6, 16], strides = [1, 1]} : vector<6x32xf32> to vector<6x16xf32>
    %35 = arith.truncf %34 : vector<6x16xf32> to vector<6x16xbf16>
    %36 = vector.extract_strided_slice %3 {offsets = [0, 16], sizes = [6, 16], strides = [1, 1]} : vector<6x32xf32> to vector<6x16xf32>
    %37 = arith.truncf %36 : vector<6x16xf32> to vector<6x16xbf16>
    %38 = vector.extract_strided_slice %5 {offsets = [0, 16], sizes = [6, 16], strides = [1, 1]} : vector<6x32xf32> to vector<6x16xf32>
    %39 = arith.truncf %38 : vector<6x16xf32> to vector<6x16xbf16>
    "tpu.trace_start"() <{level = 10 : i32, message = "qd,kd->qk"}> : () -> ()
    %cst_14 = arith.constant dense<0.000000e+00> : vector<6x6xf32>
    %40 = tpu.matmul %35, %37, %cst_14 {dimension_numbers = #tpu.dot_dimension_numbers<[1], [1], [0], [0], [0, 0, 1, 0], [], []>} : vector<6x16xbf16>, vector<6x16xbf16>, vector<6x6xf32> -> vector<6x6xf32>
    "tpu.trace_stop"() : () -> ()
    %cst_15 = arith.constant 2.500000e-01 : f32
    %41 = vector.broadcast %cst_15 : f32 to vector<6x6xf32>
    %42 = arith.mulf %40, %41 : vector<6x6xf32>
    %43 = arith.addf %42, %11 : vector<6x6xf32>
    %cst_16 = arith.constant dense<0xFF800000> : vector<6xf32>
    %44 = vector.multi_reduction <maximumf>, %43, %cst_16 [1] : vector<6x6xf32> to vector<6xf32>
    %45 = vector.shape_cast %44 : vector<6xf32> to vector<6x1xf32>
    %46 = vector.broadcast %45 : vector<6x1xf32> to vector<6x6xf32>
    %47 = arith.subf %43, %46 : vector<6x6xf32>
    %48 = math.exp %47 : vector<6x6xf32>
    %cst_17 = arith.constant dense<0.000000e+00> : vector<6xf32>
    %49 = vector.multi_reduction <add>, %48, %cst_17 [1] : vector<6x6xf32> to vector<6xf32>
    %50 = vector.shape_cast %49 : vector<6xf32> to vector<6x1xf32>
    %51 = tpu.reciprocal %50 {approx = true} : vector<6x1xf32> -> vector<6x1xf32>
    %52 = vector.broadcast %51 : vector<6x1xf32> to vector<6x6xf32>
    %53 = arith.mulf %48, %52 : vector<6x6xf32>
    %54 = arith.truncf %53 : vector<6x6xf32> to vector<6x6xbf16>
    %cst_18 = arith.constant dense<0.000000e+00> : vector<6x16xf32>
    %55 = tpu.matmul %54, %39, %cst_18 {dimension_numbers = #tpu.dot_dimension_numbers<[1], [0], [0], [1], [0, 0, 1, 1], [], []>} : vector<6x6xbf16>, vector<6x16xbf16>, vector<6x16xf32> -> vector<6x16xf32>
    %56 = tpu.concatenate %33, %55 in 1 : vector<6x16xf32>, vector<6x16xf32> -> vector<6x32xf32>
    %c0_19 = arith.constant 0 : index
    %c0_20 = arith.constant 0 : index
    %c0_21 = arith.constant 0 : index
    %57 = vector.load %arg4[%c0_19, %c0_20, %c0_21] : memref<1x6x32xf32, #tpu.memory_space<vmem>>, vector<1x6x32xf32>
    %58 = vector.shape_cast %57 : vector<1x6x32xf32> to vector<6x32xf32>
    %59 = vector.shape_cast %56 : vector<6x32xf32> to vector<1x6x32xf32>
    tpu.vector_store %arg4[%c0_19, %c0_20, %c0_21], %59 {strides = array<i32>} : memref<1x6x32xf32, #tpu.memory_space<vmem>>, vector<1x6x32xf32>,
    return
  }
  func.func @transform_0(%arg0: i32) -> (i32, i32, i32) {
    %c0_i32 = arith.constant 0 : i32
    %c0_i32_0 = arith.constant 0 : i32
    %c0_i32_1 = arith.constant 0 : i32
    return %arg0, %c0_i32, %c0_i32_0 : i32, i32, i32
  }
  func.func @transform_1(%arg0: i32) -> (i32, i32, i32) {
    %c0_i32 = arith.constant 0 : i32
    %c0_i32_0 = arith.constant 0 : i32
    %c0_i32_1 = arith.constant 0 : i32
    return %arg0, %c0_i32, %c0_i32_0 : i32, i32, i32
  }
  func.func @transform_2(%arg0: i32) -> (i32, i32, i32) {
    %c0_i32 = arith.constant 0 : i32
    %c0_i32_0 = arith.constant 0 : i32
    %c0_i32_1 = arith.constant 0 : i32
    return %arg0, %c0_i32, %c0_i32_0 : i32, i32, i32
  }
  func.func @transform_3(%arg0: i32) -> (i32, i32, i32) {
    %c0_i32 = arith.constant 0 : i32
    %c0_i32_0 = arith.constant 0 : i32
    %c0_i32_1 = arith.constant 0 : i32
    return %arg0, %c0_i32, %c0_i32_0 : i32, i32, i32
  }
}

module attributes {stable_mosaic.version = 11 : i64} {
  func.func @_linear_kernel(%arg0: i32, %arg1: memref<12x32xf32, #tpu.memory_space<vmem>>, %arg2: memref<32x96xf32, #tpu.memory_space<vmem>>, %arg3: memref<1x96xf32, #tpu.memory_space<vmem>>, %arg4: memref<12x96xf32, #tpu.memory_space<vmem>>) attributes {dimension_semantics = [#tpu.dimension_semantics<parallel>], iteration_bounds = array<i64: 1>, scalar_prefetch = 0 : i64, scratch_operands = 0 : i64, tpu.core_type = #tpu.core_type<tc>, window_params = [{transform_indices = @transform_0, window_bounds = array<i64: 12, 32>}, {pipeline_mode = #tpu.pipeline_mode<synchronous>, transform_indices = @transform_1, window_bounds = array<i64: 32, 96>}, {pipeline_mode = #tpu.pipeline_mode<synchronous>, transform_indices = @transform_2, window_bounds = array<i64: 1, 96>}, {transform_indices = @transform_3, window_bounds = array<i64: 12, 96>}]} {
    %c0 = arith.constant 0 : index
    %c0_0 = arith.constant 0 : index
    %0 = vector.load %arg1[%c0, %c0_0] : memref<12x32xf32, #tpu.memory_space<vmem>>, vector<12x32xf32>
    %1 = arith.truncf %0 : vector<12x32xf32> to vector<12x32xbf16>
    %c0_1 = arith.constant 0 : index
    %c0_2 = arith.constant 0 : index
    %2 = vector.load %arg2[%c0_1, %c0_2] : memref<32x96xf32, #tpu.memory_space<vmem>>, vector<32x96xf32>
    %3 = arith.truncf %2 : vector<32x96xf32> to vector<32x96xbf16>
    %cst = arith.constant dense<0.000000e+00> : vector<12x96xf32>
    %4 = tpu.matmul %1, %3, %cst {dimension_numbers = #tpu.dot_dimension_numbers<[1], [0], [0], [1], [0, 0, 1, 1], [], []>} : vector<12x32xbf16>, vector<32x96xbf16>, vector<12x96xf32> -> vector<12x96xf32>
    %c0_3 = arith.constant 0 : index
    %c0_4 = arith.constant 0 : index
    %5 = vector.load %arg3[%c0_3, %c0_4] : memref<1x96xf32, #tpu.memory_space<vmem>>, vector<1x96xf32>
    %6 = vector.broadcast %5 : vector<1x96xf32> to vector<12x96xf32>
    %7 = arith.addf %4, %6 : vector<12x96xf32>
    %c0_5 = arith.constant 0 : index
    %c0_6 = arith.constant 0 : index
    %8 = vector.load %arg4[%c0_5, %c0_6] : memref<12x96xf32, #tpu.memory_space<vmem>>, vector<12x96xf32>
    tpu.vector_store %arg4[%c0_5, %c0_6], %7 {strides = array<i32>} : memref<12x96xf32, #tpu.memory_space<vmem>>, vector<12x96xf32>,
    return
  }
  func.func @transform_0(%arg0: i32) -> (i32, i32) {
    %c0_i32 = arith.constant 0 : i32
    %c0_i32_0 = arith.constant 0 : i32
    return %arg0, %c0_i32 : i32, i32
  }
  func.func @transform_1(%arg0: i32) -> (i32, i32) {
    %c0_i32 = arith.constant 0 : i32
    %c0_i32_0 = arith.constant 0 : i32
    %c0_i32_1 = arith.constant 0 : i32
    return %c0_i32, %c0_i32_0 : i32, i32
  }
  func.func @transform_2(%arg0: i32) -> (i32, i32) {
    %c0_i32 = arith.constant 0 : i32
    %c0_i32_0 = arith.constant 0 : i32
    %c0_i32_1 = arith.constant 0 : i32
    return %c0_i32, %c0_i32_0 : i32, i32
  }
  func.func @transform_3(%arg0: i32) -> (i32, i32) {
    %c0_i32 = arith.constant 0 : i32
    %c0_i32_0 = arith.constant 0 : i32
    return %arg0, %c0_i32 : i32, i32
  }
}

module attributes {stable_mosaic.version = 11 : i64} {
  func.func @_linear_kernel(%arg0: i32, %arg1: memref<12x32xf32, #tpu.memory_space<vmem>>, %arg2: memref<32x32xf32, #tpu.memory_space<vmem>>, %arg3: memref<1x32xf32, #tpu.memory_space<vmem>>, %arg4: memref<12x32xf32, #tpu.memory_space<vmem>>) attributes {dimension_semantics = [#tpu.dimension_semantics<parallel>], iteration_bounds = array<i64: 1>, scalar_prefetch = 0 : i64, scratch_operands = 0 : i64, tpu.core_type = #tpu.core_type<tc>, window_params = [{transform_indices = @transform_0, window_bounds = array<i64: 12, 32>}, {pipeline_mode = #tpu.pipeline_mode<synchronous>, transform_indices = @transform_1, window_bounds = array<i64: 32, 32>}, {pipeline_mode = #tpu.pipeline_mode<synchronous>, transform_indices = @transform_2, window_bounds = array<i64: 1, 32>}, {transform_indices = @transform_3, window_bounds = array<i64: 12, 32>}]} {
    %c0 = arith.constant 0 : index
    %c0_0 = arith.constant 0 : index
    %0 = vector.load %arg1[%c0, %c0_0] : memref<12x32xf32, #tpu.memory_space<vmem>>, vector<12x32xf32>
    %1 = arith.truncf %0 : vector<12x32xf32> to vector<12x32xbf16>
    %c0_1 = arith.constant 0 : index
    %c0_2 = arith.constant 0 : index
    %2 = vector.load %arg2[%c0_1, %c0_2] : memref<32x32xf32, #tpu.memory_space<vmem>>, vector<32x32xf32>
    %3 = arith.truncf %2 : vector<32x32xf32> to vector<32x32xbf16>
    %cst = arith.constant dense<0.000000e+00> : vector<12x32xf32>
    %4 = tpu.matmul %1, %3, %cst {dimension_numbers = #tpu.dot_dimension_numbers<[1], [0], [0], [1], [0, 0, 1, 1], [], []>} : vector<12x32xbf16>, vector<32x32xbf16>, vector<12x32xf32> -> vector<12x32xf32>
    %c0_3 = arith.constant 0 : index
    %c0_4 = arith.constant 0 : index
    %5 = vector.load %arg3[%c0_3, %c0_4] : memref<1x32xf32, #tpu.memory_space<vmem>>, vector<1x32xf32>
    %6 = vector.broadcast %5 : vector<1x32xf32> to vector<12x32xf32>
    %7 = arith.addf %4, %6 : vector<12x32xf32>
    %c0_5 = arith.constant 0 : index
    %c0_6 = arith.constant 0 : index
    %8 = vector.load %arg4[%c0_5, %c0_6] : memref<12x32xf32, #tpu.memory_space<vmem>>, vector<12x32xf32>
    tpu.vector_store %arg4[%c0_5, %c0_6], %7 {strides = array<i32>} : memref<12x32xf32, #tpu.memory_space<vmem>>, vector<12x32xf32>,
    return
  }
  func.func @transform_0(%arg0: i32) -> (i32, i32) {
    %c0_i32 = arith.constant 0 : i32
    %c0_i32_0 = arith.constant 0 : i32
    return %arg0, %c0_i32 : i32, i32
  }
  func.func @transform_1(%arg0: i32) -> (i32, i32) {
    %c0_i32 = arith.constant 0 : i32
    %c0_i32_0 = arith.constant 0 : i32
    %c0_i32_1 = arith.constant 0 : i32
    return %c0_i32, %c0_i32_0 : i32, i32
  }
  func.func @transform_2(%arg0: i32) -> (i32, i32) {
    %c0_i32 = arith.constant 0 : i32
    %c0_i32_0 = arith.constant 0 : i32
    %c0_i32_1 = arith.constant 0 : i32
    return %c0_i32, %c0_i32_0 : i32, i32
  }
  func.func @transform_3(%arg0: i32) -> (i32, i32) {
    %c0_i32 = arith.constant 0 : i32
    %c0_i32_0 = arith.constant 0 : i32
    return %arg0, %c0_i32 : i32, i32
  }
}

module attributes {stable_mosaic.version = 11 : i64} {
  func.func @_linear_kernel(%arg0: i32, %arg1: memref<16x3584xf32, #tpu.memory_space<vmem>>, %arg2: memref<3584x32xf32, #tpu.memory_space<vmem>>, %arg3: memref<1x32xf32, #tpu.memory_space<vmem>>, %arg4: memref<16x32xf32, #tpu.memory_space<vmem>>) attributes {dimension_semantics = [#tpu.dimension_semantics<parallel>], iteration_bounds = array<i64: 1>, scalar_prefetch = 0 : i64, scratch_operands = 0 : i64, tpu.core_type = #tpu.core_type<tc>, window_params = [{transform_indices = @transform_0, window_bounds = array<i64: 16, 3584>}, {pipeline_mode = #tpu.pipeline_mode<synchronous>, transform_indices = @transform_1, window_bounds = array<i64: 3584, 32>}, {pipeline_mode = #tpu.pipeline_mode<synchronous>, transform_indices = @transform_2, window_bounds = array<i64: 1, 32>}, {transform_indices = @transform_3, window_bounds = array<i64: 16, 32>}]} {
    %c0 = arith.constant 0 : index
    %c0_0 = arith.constant 0 : index
    %0 = vector.load %arg1[%c0, %c0_0] : memref<16x3584xf32, #tpu.memory_space<vmem>>, vector<16x3584xf32>
    %1 = arith.truncf %0 : vector<16x3584xf32> to vector<16x3584xbf16>
    %c0_1 = arith.constant 0 : index
    %c0_2 = arith.constant 0 : index
    %2 = vector.load %arg2[%c0_1, %c0_2] : memref<3584x32xf32, #tpu.memory_space<vmem>>, vector<3584x32xf32>
    %3 = arith.truncf %2 : vector<3584x32xf32> to vector<3584x32xbf16>
    %cst = arith.constant dense<0.000000e+00> : vector<16x32xf32>
    %4 = tpu.matmul %1, %3, %cst {dimension_numbers = #tpu.dot_dimension_numbers<[1], [0], [0], [1], [0, 0, 1, 1], [], []>} : vector<16x3584xbf16>, vector<3584x32xbf16>, vector<16x32xf32> -> vector<16x32xf32>
    %c0_3 = arith.constant 0 : index
    %c0_4 = arith.constant 0 : index
    %5 = vector.load %arg3[%c0_3, %c0_4] : memref<1x32xf32, #tpu.memory_space<vmem>>, vector<1x32xf32>
    %6 = vector.broadcast %5 : vector<1x32xf32> to vector<16x32xf32>
    %7 = arith.addf %4, %6 : vector<16x32xf32>
    %8 = arith.negf %7 : vector<16x32xf32>
    %9 = math.exp %8 : vector<16x32xf32>
    %cst_5 = arith.constant 1.000000e+00 : f32
    %10 = vector.broadcast %cst_5 : f32 to vector<16x32xf32>
    %11 = arith.addf %10, %9 : vector<16x32xf32>
    %12 = arith.divf %10, %11 : vector<16x32xf32>
    %c0_6 = arith.constant 0 : index
    %c0_7 = arith.constant 0 : index
    %13 = vector.load %arg4[%c0_6, %c0_7] : memref<16x32xf32, #tpu.memory_space<vmem>>, vector<16x32xf32>
    tpu.vector_store %arg4[%c0_6, %c0_7], %12 {strides = array<i32>} : memref<16x32xf32, #tpu.memory_space<vmem>>, vector<16x32xf32>,
    return
  }
  func.func @transform_0(%arg0: i32) -> (i32, i32) {
    %c0_i32 = arith.constant 0 : i32
    %c0_i32_0 = arith.constant 0 : i32
    return %arg0, %c0_i32 : i32, i32
  }
  func.func @transform_1(%arg0: i32) -> (i32, i32) {
    %c0_i32 = arith.constant 0 : i32
    %c0_i32_0 = arith.constant 0 : i32
    %c0_i32_1 = arith.constant 0 : i32
    return %c0_i32, %c0_i32_0 : i32, i32
  }
  func.func @transform_2(%arg0: i32) -> (i32, i32) {
    %c0_i32 = arith.constant 0 : i32
    %c0_i32_0 = arith.constant 0 : i32
    %c0_i32_1 = arith.constant 0 : i32
    return %c0_i32, %c0_i32_0 : i32, i32
  }
  func.func @transform_3(%arg0: i32) -> (i32, i32) {
    %c0_i32 = arith.constant 0 : i32
    %c0_i32_0 = arith.constant 0 : i32
    return %arg0, %c0_i32 : i32, i32
  }
}

module attributes {stable_mosaic.version = 11 : i64} {
  func.func @_linear_kernel(%arg0: i32, %arg1: memref<16x32xf32, #tpu.memory_space<vmem>>, %arg2: memref<32x96xf32, #tpu.memory_space<vmem>>, %arg3: memref<1x96xf32, #tpu.memory_space<vmem>>, %arg4: memref<16x96xf32, #tpu.memory_space<vmem>>) attributes {dimension_semantics = [#tpu.dimension_semantics<parallel>], iteration_bounds = array<i64: 1>, scalar_prefetch = 0 : i64, scratch_operands = 0 : i64, tpu.core_type = #tpu.core_type<tc>, window_params = [{transform_indices = @transform_0, window_bounds = array<i64: 16, 32>}, {pipeline_mode = #tpu.pipeline_mode<synchronous>, transform_indices = @transform_1, window_bounds = array<i64: 32, 96>}, {pipeline_mode = #tpu.pipeline_mode<synchronous>, transform_indices = @transform_2, window_bounds = array<i64: 1, 96>}, {transform_indices = @transform_3, window_bounds = array<i64: 16, 96>}]} {
    %c0 = arith.constant 0 : index
    %c0_0 = arith.constant 0 : index
    %0 = vector.load %arg1[%c0, %c0_0] : memref<16x32xf32, #tpu.memory_space<vmem>>, vector<16x32xf32>
    %1 = arith.truncf %0 : vector<16x32xf32> to vector<16x32xbf16>
    %c0_1 = arith.constant 0 : index
    %c0_2 = arith.constant 0 : index
    %2 = vector.load %arg2[%c0_1, %c0_2] : memref<32x96xf32, #tpu.memory_space<vmem>>, vector<32x96xf32>
    %3 = arith.truncf %2 : vector<32x96xf32> to vector<32x96xbf16>
    %cst = arith.constant dense<0.000000e+00> : vector<16x96xf32>
    %4 = tpu.matmul %1, %3, %cst {dimension_numbers = #tpu.dot_dimension_numbers<[1], [0], [0], [1], [0, 0, 1, 1], [], []>} : vector<16x32xbf16>, vector<32x96xbf16>, vector<16x96xf32> -> vector<16x96xf32>
    %c0_3 = arith.constant 0 : index
    %c0_4 = arith.constant 0 : index
    %5 = vector.load %arg3[%c0_3, %c0_4] : memref<1x96xf32, #tpu.memory_space<vmem>>, vector<1x96xf32>
    %6 = vector.broadcast %5 : vector<1x96xf32> to vector<16x96xf32>
    %7 = arith.addf %4, %6 : vector<16x96xf32>
    %c0_5 = arith.constant 0 : index
    %c0_6 = arith.constant 0 : index
    %8 = vector.load %arg4[%c0_5, %c0_6] : memref<16x96xf32, #tpu.memory_space<vmem>>, vector<16x96xf32>
    tpu.vector_store %arg4[%c0_5, %c0_6], %7 {strides = array<i32>} : memref<16x96xf32, #tpu.memory_space<vmem>>, vector<16x96xf32>,
    return
  }
  func.func @transform_0(%arg0: i32) -> (i32, i32) {
    %c0_i32 = arith.constant 0 : i32
    %c0_i32_0 = arith.constant 0 : i32
    return %arg0, %c0_i32 : i32, i32
  }
  func.func @transform_1(%arg0: i32) -> (i32, i32) {
    %c0_i32 = arith.constant 0 : i32
    %c0_i32_0 = arith.constant 0 : i32
    %c0_i32_1 = arith.constant 0 : i32
    return %c0_i32, %c0_i32_0 : i32, i32
  }
  func.func @transform_2(%arg0: i32) -> (i32, i32) {
    %c0_i32 = arith.constant 0 : i32
    %c0_i32_0 = arith.constant 0 : i32
    %c0_i32_1 = arith.constant 0 : i32
    return %c0_i32, %c0_i32_0 : i32, i32
  }
  func.func @transform_3(%arg0: i32) -> (i32, i32) {
    %c0_i32 = arith.constant 0 : i32
    %c0_i32_0 = arith.constant 0 : i32
    return %arg0, %c0_i32 : i32, i32
  }
}

module attributes {stable_mosaic.version = 11 : i64} {
  func.func @_mha_kernel(%arg0: i32, %arg1: memref<1x8x32xf32, #tpu.memory_space<vmem>>, %arg2: memref<1x8x32xf32, #tpu.memory_space<vmem>>, %arg3: memref<1x8x32xf32, #tpu.memory_space<vmem>>, %arg4: memref<1x1x8xf32, #tpu.memory_space<vmem>>, %arg5: memref<1x8x32xf32, #tpu.memory_space<vmem>>) attributes {dimension_semantics = [#tpu.dimension_semantics<parallel>], iteration_bounds = array<i64: 2>, scalar_prefetch = 0 : i64, scratch_operands = 0 : i64, tpu.core_type = #tpu.core_type<tc>, window_params = [{transform_indices = @transform_0, window_bounds = array<i64: 1, 8, 32>}, {transform_indices = @transform_1, window_bounds = array<i64: 1, 8, 32>}, {transform_indices = @transform_2, window_bounds = array<i64: 1, 8, 32>}, {transform_indices = @transform_3, window_bounds = array<i64: 1, 1, 8>}, {transform_indices = @transform_4, window_bounds = array<i64: 1, 8, 32>}]} {
    %c0 = arith.constant 0 : index
    %c0_0 = arith.constant 0 : index
    %c0_1 = arith.constant 0 : index
    %0 = vector.load %arg1[%c0, %c0_0, %c0_1] : memref<1x8x32xf32, #tpu.memory_space<vmem>>, vector<1x8x32xf32>
    %1 = vector.shape_cast %0 : vector<1x8x32xf32> to vector<8x32xf32>
    %c0_2 = arith.constant 0 : index
    %c0_3 = arith.constant 0 : index
    %c0_4 = arith.constant 0 : index
    %2 = vector.load %arg2[%c0_2, %c0_3, %c0_4] : memref<1x8x32xf32, #tpu.memory_space<vmem>>, vector<1x8x32xf32>
    %3 = vector.shape_cast %2 : vector<1x8x32xf32> to vector<8x32xf32>
    %c0_5 = arith.constant 0 : index
    %c0_6 = arith.constant 0 : index
    %c0_7 = arith.constant 0 : index
    %4 = vector.load %arg3[%c0_5, %c0_6, %c0_7] : memref<1x8x32xf32, #tpu.memory_space<vmem>>, vector<1x8x32xf32>
    %5 = vector.shape_cast %4 : vector<1x8x32xf32> to vector<8x32xf32>
    %c0_8 = arith.constant 0 : index
    %c0_9 = arith.constant 0 : index
    %c0_10 = arith.constant 0 : index
    %6 = vector.load %arg4[%c0_8, %c0_9, %c0_10] : memref<1x1x8xf32, #tpu.memory_space<vmem>>, vector<1x1x8xf32>
    %7 = vector.shape_cast %6 : vector<1x1x8xf32> to vector<1x8xf32>
    %8 = vector.extract_strided_slice %1 {offsets = [0, 0], sizes = [8, 16], strides = [1, 1]} : vector<8x32xf32> to vector<8x16xf32>
    %9 = arith.truncf %8 : vector<8x16xf32> to vector<8x16xbf16>
    %10 = vector.extract_strided_slice %3 {offsets = [0, 0], sizes = [8, 16], strides = [1, 1]} : vector<8x32xf32> to vector<8x16xf32>
    %11 = arith.truncf %10 : vector<8x16xf32> to vector<8x16xbf16>
    %12 = vector.extract_strided_slice %5 {offsets = [0, 0], sizes = [8, 16], strides = [1, 1]} : vector<8x32xf32> to vector<8x16xf32>
    %13 = arith.truncf %12 : vector<8x16xf32> to vector<8x16xbf16>
    "tpu.trace_start"() <{level = 10 : i32, message = "qd,kd->qk"}> : () -> ()
    %cst = arith.constant dense<0.000000e+00> : vector<8x8xf32>
    %14 = tpu.matmul %9, %11, %cst {dimension_numbers = #tpu.dot_dimension_numbers<[1], [1], [0], [0], [0, 0, 1, 0], [], []>} : vector<8x16xbf16>, vector<8x16xbf16>, vector<8x8xf32> -> vector<8x8xf32>
    "tpu.trace_stop"() : () -> ()
    %cst_11 = arith.constant 2.500000e-01 : f32
    %15 = vector.broadcast %cst_11 : f32 to vector<8x8xf32>
    %16 = arith.mulf %14, %15 : vector<8x8xf32>
    %17 = vector.broadcast %7 : vector<1x8xf32> to vector<8x8xf32>
    %18 = arith.addf %16, %17 : vector<8x8xf32>
    %cst_12 = arith.constant dense<0xFF800000> : vector<8xf32>
    %19 = vector.multi_reduction <maximumf>, %18, %cst_12 [1] : vector<8x8xf32> to vector<8xf32>
    %20 = vector.shape_cast %19 : vector<8xf32> to vector<8x1xf32>
    %21 = vector.broadcast %20 : vector<8x1xf32> to vector<8x8xf32>
    %22 = arith.subf %18, %21 : vector<8x8xf32>
    %23 = math.exp %22 : vector<8x8xf32>
    %cst_13 = arith.constant dense<0.000000e+00> : vector<8xf32>
    %24 = vector.multi_reduction <add>, %23, %cst_13 [1] : vector<8x8xf32> to vector<8xf32>
    %25 = vector.shape_cast %24 : vector<8xf32> to vector<8x1xf32>
    %26 = tpu.reciprocal %25 {approx = true} : vector<8x1xf32> -> vector<8x1xf32>
    %27 = vector.broadcast %26 : vector<8x1xf32> to vector<8x8xf32>
    %28 = arith.mulf %23, %27 : vector<8x8xf32>
    %29 = arith.truncf %28 : vector<8x8xf32> to vector<8x8xbf16>
    %cst_14 = arith.constant dense<0.000000e+00> : vector<8x16xf32>
    %30 = tpu.matmul %29, %13, %cst_14 {dimension_numbers = #tpu.dot_dimension_numbers<[1], [0], [0], [1], [0, 0, 1, 1], [], []>} : vector<8x8xbf16>, vector<8x16xbf16>, vector<8x16xf32> -> vector<8x16xf32>
    %31 = vector.extract_strided_slice %1 {offsets = [0, 16], sizes = [8, 16], strides = [1, 1]} : vector<8x32xf32> to vector<8x16xf32>
    %32 = arith.truncf %31 : vector<8x16xf32> to vector<8x16xbf16>
    %33 = vector.extract_strided_slice %3 {offsets = [0, 16], sizes = [8, 16], strides = [1, 1]} : vector<8x32xf32> to vector<8x16xf32>
    %34 = arith.truncf %33 : vector<8x16xf32> to vector<8x16xbf16>
    %35 = vector.extract_strided_slice %5 {offsets = [0, 16], sizes = [8, 16], strides = [1, 1]} : vector<8x32xf32> to vector<8x16xf32>
    %36 = arith.truncf %35 : vector<8x16xf32> to vector<8x16xbf16>
    "tpu.trace_start"() <{level = 10 : i32, message = "qd,kd->qk"}> : () -> ()
    %cst_15 = arith.constant dense<0.000000e+00> : vector<8x8xf32>
    %37 = tpu.matmul %32, %34, %cst_15 {dimension_numbers = #tpu.dot_dimension_numbers<[1], [1], [0], [0], [0, 0, 1, 0], [], []>} : vector<8x16xbf16>, vector<8x16xbf16>, vector<8x8xf32> -> vector<8x8xf32>
    "tpu.trace_stop"() : () -> ()
    %cst_16 = arith.constant 2.500000e-01 : f32
    %38 = vector.broadcast %cst_16 : f32 to vector<8x8xf32>
    %39 = arith.mulf %37, %38 : vector<8x8xf32>
    %40 = vector.broadcast %7 : vector<1x8xf32> to vector<8x8xf32>
    %41 = arith.addf %39, %40 : vector<8x8xf32>
    %cst_17 = arith.constant dense<0xFF800000> : vector<8xf32>
    %42 = vector.multi_reduction <maximumf>, %41, %cst_17 [1] : vector<8x8xf32> to vector<8xf32>
    %43 = vector.shape_cast %42 : vector<8xf32> to vector<8x1xf32>
    %44 = vector.broadcast %43 : vector<8x1xf32> to vector<8x8xf32>
    %45 = arith.subf %41, %44 : vector<8x8xf32>
    %46 = math.exp %45 : vector<8x8xf32>
    %cst_18 = arith.constant dense<0.000000e+00> : vector<8xf32>
    %47 = vector.multi_reduction <add>, %46, %cst_18 [1] : vector<8x8xf32> to vector<8xf32>
    %48 = vector.shape_cast %47 : vector<8xf32> to vector<8x1xf32>
    %49 = tpu.reciprocal %48 {approx = true} : vector<8x1xf32> -> vector<8x1xf32>
    %50 = vector.broadcast %49 : vector<8x1xf32> to vector<8x8xf32>
    %51 = arith.mulf %46, %50 : vector<8x8xf32>
    %52 = arith.truncf %51 : vector<8x8xf32> to vector<8x8xbf16>
    %cst_19 = arith.constant dense<0.000000e+00> : vector<8x16xf32>
    %53 = tpu.matmul %52, %36, %cst_19 {dimension_numbers = #tpu.dot_dimension_numbers<[1], [0], [0], [1], [0, 0, 1, 1], [], []>} : vector<8x8xbf16>, vector<8x16xbf16>, vector<8x16xf32> -> vector<8x16xf32>
    %54 = tpu.concatenate %30, %53 in 1 : vector<8x16xf32>, vector<8x16xf32> -> vector<8x32xf32>
    %c0_20 = arith.constant 0 : index
    %c0_21 = arith.constant 0 : index
    %c0_22 = arith.constant 0 : index
    %55 = vector.load %arg5[%c0_20, %c0_21, %c0_22] : memref<1x8x32xf32, #tpu.memory_space<vmem>>, vector<1x8x32xf32>
    %56 = vector.shape_cast %55 : vector<1x8x32xf32> to vector<8x32xf32>
    %57 = vector.shape_cast %54 : vector<8x32xf32> to vector<1x8x32xf32>
    tpu.vector_store %arg5[%c0_20, %c0_21, %c0_22], %57 {strides = array<i32>} : memref<1x8x32xf32, #tpu.memory_space<vmem>>, vector<1x8x32xf32>,
    return
  }
  func.func @transform_0(%arg0: i32) -> (i32, i32, i32) {
    %c0_i32 = arith.constant 0 : i32
    %c0_i32_0 = arith.constant 0 : i32
    %c0_i32_1 = arith.constant 0 : i32
    return %arg0, %c0_i32, %c0_i32_0 : i32, i32, i32
  }
  func.func @transform_1(%arg0: i32) -> (i32, i32, i32) {
    %c0_i32 = arith.constant 0 : i32
    %c0_i32_0 = arith.constant 0 : i32
    %c0_i32_1 = arith.constant 0 : i32
    return %arg0, %c0_i32, %c0_i32_0 : i32, i32, i32
  }
  func.func @transform_2(%arg0: i32) -> (i32, i32, i32) {
    %c0_i32 = arith.constant 0 : i32
    %c0_i32_0 = arith.constant 0 : i32
    %c0_i32_1 = arith.constant 0 : i32
    return %arg0, %c0_i32, %c0_i32_0 : i32, i32, i32
  }
  func.func @transform_3(%arg0: i32) -> (i32, i32, i32) {
    %c0_i32 = arith.constant 0 : i32
    %c0_i32_0 = arith.constant 0 : i32
    %c0_i32_1 = arith.constant 0 : i32
    return %arg0, %c0_i32, %c0_i32_0 : i32, i32, i32
  }
  func.func @transform_4(%arg0: i32) -> (i32, i32, i32) {
    %c0_i32 = arith.constant 0 : i32
    %c0_i32_0 = arith.constant 0 : i32
    %c0_i32_1 = arith.constant 0 : i32
    return %arg0, %c0_i32, %c0_i32_0 : i32, i32, i32
  }
}

module attributes {stable_mosaic.version = 11 : i64} {
  func.func @_linear_add_ln_kernel(%arg0: i32, %arg1: memref<16x32xf32, #tpu.memory_space<vmem>>, %arg2: memref<32x32xf32, #tpu.memory_space<vmem>>, %arg3: memref<1x32xf32, #tpu.memory_space<vmem>>, %arg4: memref<16x32xf32, #tpu.memory_space<vmem>>, %arg5: memref<1x32xf32, #tpu.memory_space<vmem>>, %arg6: memref<1x32xf32, #tpu.memory_space<vmem>>, %arg7: memref<16x32xf32, #tpu.memory_space<vmem>>) attributes {dimension_semantics = [#tpu.dimension_semantics<parallel>], iteration_bounds = array<i64: 1>, scalar_prefetch = 0 : i64, scratch_operands = 0 : i64, tpu.core_type = #tpu.core_type<tc>, window_params = [{transform_indices = @transform_0, window_bounds = array<i64: 16, 32>}, {pipeline_mode = #tpu.pipeline_mode<synchronous>, transform_indices = @transform_1, window_bounds = array<i64: 32, 32>}, {pipeline_mode = #tpu.pipeline_mode<synchronous>, transform_indices = @transform_2, window_bounds = array<i64: 1, 32>}, {transform_indices = @transform_3, window_bounds = array<i64: 16, 32>}, {pipeline_mode = #tpu.pipeline_mode<synchronous>, transform_indices = @transform_4, window_bounds = array<i64: 1, 32>}, {pipeline_mode = #tpu.pipeline_mode<synchronous>, transform_indices = @transform_5, window_bounds = array<i64: 1, 32>}, {transform_indices = @transform_6, window_bounds = array<i64: 16, 32>}]} {
    %c0 = arith.constant 0 : index
    %c0_0 = arith.constant 0 : index
    %0 = vector.load %arg1[%c0, %c0_0] : memref<16x32xf32, #tpu.memory_space<vmem>>, vector<16x32xf32>
    %1 = arith.truncf %0 : vector<16x32xf32> to vector<16x32xbf16>
    %c0_1 = arith.constant 0 : index
    %c0_2 = arith.constant 0 : index
    %2 = vector.load %arg2[%c0_1, %c0_2] : memref<32x32xf32, #tpu.memory_space<vmem>>, vector<32x32xf32>
    %3 = arith.truncf %2 : vector<32x32xf32> to vector<32x32xbf16>
    %cst = arith.constant dense<0.000000e+00> : vector<16x32xf32>
    %4 = tpu.matmul %1, %3, %cst {dimension_numbers = #tpu.dot_dimension_numbers<[1], [0], [0], [1], [0, 0, 1, 1], [], []>} : vector<16x32xbf16>, vector<32x32xbf16>, vector<16x32xf32> -> vector<16x32xf32>
    %c0_3 = arith.constant 0 : index
    %c0_4 = arith.constant 0 : index
    %5 = vector.load %arg3[%c0_3, %c0_4] : memref<1x32xf32, #tpu.memory_space<vmem>>, vector<1x32xf32>
    %6 = vector.broadcast %5 : vector<1x32xf32> to vector<16x32xf32>
    %7 = arith.addf %4, %6 : vector<16x32xf32>
    %c0_5 = arith.constant 0 : index
    %c0_6 = arith.constant 0 : index
    %8 = vector.load %arg4[%c0_5, %c0_6] : memref<16x32xf32, #tpu.memory_space<vmem>>, vector<16x32xf32>
    %9 = arith.addf %8, %7 : vector<16x32xf32>
    %cst_7 = arith.constant dense<0.000000e+00> : vector<16xf32>
    %10 = vector.multi_reduction <add>, %9, %cst_7 [1] : vector<16x32xf32> to vector<16xf32>
    %11 = vector.shape_cast %10 : vector<16xf32> to vector<16x1xf32>
    %cst_8 = arith.constant 3.200000e+01 : f32
    %12 = vector.broadcast %cst_8 : f32 to vector<16x1xf32>
    %13 = arith.divf %11, %12 : vector<16x1xf32>
    %14 = vector.broadcast %13 : vector<16x1xf32> to vector<16x32xf32>
    %15 = arith.subf %9, %14 : vector<16x32xf32>
    %16 = arith.mulf %15, %15 : vector<16x32xf32>
    %cst_9 = arith.constant dense<0.000000e+00> : vector<16xf32>
    %17 = vector.multi_reduction <add>, %16, %cst_9 [1] : vector<16x32xf32> to vector<16xf32>
    %18 = vector.shape_cast %17 : vector<16xf32> to vector<16x1xf32>
    %cst_10 = arith.constant 3.200000e+01 : f32
    %19 = vector.broadcast %cst_10 : f32 to vector<16x1xf32>
    %20 = arith.divf %18, %19 : vector<16x1xf32>
    %21 = vector.broadcast %13 : vector<16x1xf32> to vector<16x32xf32>
    %22 = arith.subf %9, %21 : vector<16x32xf32>
    %cst_11 = arith.constant 9.99999974E-6 : f32
    %23 = vector.broadcast %cst_11 : f32 to vector<16x1xf32>
    %24 = arith.addf %20, %23 : vector<16x1xf32>
    %25 = math.rsqrt %24 : vector<16x1xf32>
    %26 = vector.broadcast %25 : vector<16x1xf32> to vector<16x32xf32>
    %27 = arith.mulf %22, %26 : vector<16x32xf32>
    %c0_12 = arith.constant 0 : index
    %c0_13 = arith.constant 0 : index
    %28 = vector.load %arg5[%c0_12, %c0_13] : memref<1x32xf32, #tpu.memory_space<vmem>>, vector<1x32xf32>
    %29 = vector.broadcast %28 : vector<1x32xf32> to vector<16x32xf32>
    %30 = arith.mulf %27, %29 : vector<16x32xf32>
    %c0_14 = arith.constant 0 : index
    %c0_15 = arith.constant 0 : index
    %31 = vector.load %arg6[%c0_14, %c0_15] : memref<1x32xf32, #tpu.memory_space<vmem>>, vector<1x32xf32>
    %32 = vector.broadcast %31 : vector<1x32xf32> to vector<16x32xf32>
    %33 = arith.addf %30, %32 : vector<16x32xf32>
    %c0_16 = arith.constant 0 : index
    %c0_17 = arith.constant 0 : index
    %34 = vector.load %arg7[%c0_16, %c0_17] : memref<16x32xf32, #tpu.memory_space<vmem>>, vector<16x32xf32>
    tpu.vector_store %arg7[%c0_16, %c0_17], %33 {strides = array<i32>} : memref<16x32xf32, #tpu.memory_space<vmem>>, vector<16x32xf32>,
    return
  }
  func.func @transform_0(%arg0: i32) -> (i32, i32) {
    %c0_i32 = arith.constant 0 : i32
    %c0_i32_0 = arith.constant 0 : i32
    return %arg0, %c0_i32 : i32, i32
  }
  func.func @transform_1(%arg0: i32) -> (i32, i32) {
    %c0_i32 = arith.constant 0 : i32
    %c0_i32_0 = arith.constant 0 : i32
    %c0_i32_1 = arith.constant 0 : i32
    return %c0_i32, %c0_i32_0 : i32, i32
  }
  func.func @transform_2(%arg0: i32) -> (i32, i32) {
    %c0_i32 = arith.constant 0 : i32
    %c0_i32_0 = arith.constant 0 : i32
    %c0_i32_1 = arith.constant 0 : i32
    return %c0_i32, %c0_i32_0 : i32, i32
  }
  func.func @transform_3(%arg0: i32) -> (i32, i32) {
    %c0_i32 = arith.constant 0 : i32
    %c0_i32_0 = arith.constant 0 : i32
    return %arg0, %c0_i32 : i32, i32
  }
  func.func @transform_4(%arg0: i32) -> (i32, i32) {
    %c0_i32 = arith.constant 0 : i32
    %c0_i32_0 = arith.constant 0 : i32
    %c0_i32_1 = arith.constant 0 : i32
    return %c0_i32, %c0_i32_0 : i32, i32
  }
  func.func @transform_5(%arg0: i32) -> (i32, i32) {
    %c0_i32 = arith.constant 0 : i32
    %c0_i32_0 = arith.constant 0 : i32
    %c0_i32_1 = arith.constant 0 : i32
    return %c0_i32, %c0_i32_0 : i32, i32
  }
  func.func @transform_6(%arg0: i32) -> (i32, i32) {
    %c0_i32 = arith.constant 0 : i32
    %c0_i32_0 = arith.constant 0 : i32
    return %arg0, %c0_i32 : i32, i32
  }
}

module attributes {stable_mosaic.version = 11 : i64} {
  func.func @_ffn_add_ln_kernel(%arg0: i32, %arg1: memref<16x32xf32, #tpu.memory_space<vmem>>, %arg2: memref<32x64xf32, #tpu.memory_space<vmem>>, %arg3: memref<1x64xf32, #tpu.memory_space<vmem>>, %arg4: memref<64x32xf32, #tpu.memory_space<vmem>>, %arg5: memref<1x32xf32, #tpu.memory_space<vmem>>, %arg6: memref<1x32xf32, #tpu.memory_space<vmem>>, %arg7: memref<1x32xf32, #tpu.memory_space<vmem>>, %arg8: memref<16x32xf32, #tpu.memory_space<vmem>>) attributes {dimension_semantics = [#tpu.dimension_semantics<parallel>], iteration_bounds = array<i64: 1>, scalar_prefetch = 0 : i64, scratch_operands = 0 : i64, tpu.core_type = #tpu.core_type<tc>, window_params = [{transform_indices = @transform_0, window_bounds = array<i64: 16, 32>}, {pipeline_mode = #tpu.pipeline_mode<synchronous>, transform_indices = @transform_1, window_bounds = array<i64: 32, 64>}, {pipeline_mode = #tpu.pipeline_mode<synchronous>, transform_indices = @transform_2, window_bounds = array<i64: 1, 64>}, {pipeline_mode = #tpu.pipeline_mode<synchronous>, transform_indices = @transform_3, window_bounds = array<i64: 64, 32>}, {pipeline_mode = #tpu.pipeline_mode<synchronous>, transform_indices = @transform_4, window_bounds = array<i64: 1, 32>}, {pipeline_mode = #tpu.pipeline_mode<synchronous>, transform_indices = @transform_5, window_bounds = array<i64: 1, 32>}, {pipeline_mode = #tpu.pipeline_mode<synchronous>, transform_indices = @transform_6, window_bounds = array<i64: 1, 32>}, {transform_indices = @transform_7, window_bounds = array<i64: 16, 32>}]} {
    %c0 = arith.constant 0 : index
    %c0_0 = arith.constant 0 : index
    %0 = vector.load %arg1[%c0, %c0_0] : memref<16x32xf32, #tpu.memory_space<vmem>>, vector<16x32xf32>
    %1 = arith.truncf %0 : vector<16x32xf32> to vector<16x32xbf16>
    %c0_1 = arith.constant 0 : index
    %c0_2 = arith.constant 0 : index
    %2 = vector.load %arg2[%c0_1, %c0_2] : memref<32x64xf32, #tpu.memory_space<vmem>>, vector<32x64xf32>
    %3 = arith.truncf %2 : vector<32x64xf32> to vector<32x64xbf16>
    %cst = arith.constant dense<0.000000e+00> : vector<16x64xf32>
    %4 = tpu.matmul %1, %3, %cst {dimension_numbers = #tpu.dot_dimension_numbers<[1], [0], [0], [1], [0, 0, 1, 1], [], []>} : vector<16x32xbf16>, vector<32x64xbf16>, vector<16x64xf32> -> vector<16x64xf32>
    %c0_3 = arith.constant 0 : index
    %c0_4 = arith.constant 0 : index
    %5 = vector.load %arg3[%c0_3, %c0_4] : memref<1x64xf32, #tpu.memory_space<vmem>>, vector<1x64xf32>
    %6 = vector.broadcast %5 : vector<1x64xf32> to vector<16x64xf32>
    %7 = arith.addf %4, %6 : vector<16x64xf32>
    %cst_5 = arith.constant 0.000000e+00 : f32
    %8 = vector.broadcast %cst_5 : f32 to vector<16x64xf32>
    %9 = arith.maximumf %7, %8 : vector<16x64xf32>
    %10 = arith.truncf %9 : vector<16x64xf32> to vector<16x64xbf16>
    %c0_6 = arith.constant 0 : index
    %c0_7 = arith.constant 0 : index
    %11 = vector.load %arg4[%c0_6, %c0_7] : memref<64x32xf32, #tpu.memory_space<vmem>>, vector<64x32xf32>
    %12 = arith.truncf %11 : vector<64x32xf32> to vector<64x32xbf16>
    %cst_8 = arith.constant dense<0.000000e+00> : vector<16x32xf32>
    %13 = tpu.matmul %10, %12, %cst_8 {dimension_numbers = #tpu.dot_dimension_numbers<[1], [0], [0], [1], [0, 0, 1, 1], [], []>} : vector<16x64xbf16>, vector<64x32xbf16>, vector<16x32xf32> -> vector<16x32xf32>
    %c0_9 = arith.constant 0 : index
    %c0_10 = arith.constant 0 : index
    %14 = vector.load %arg5[%c0_9, %c0_10] : memref<1x32xf32, #tpu.memory_space<vmem>>, vector<1x32xf32>
    %15 = vector.broadcast %14 : vector<1x32xf32> to vector<16x32xf32>
    %16 = arith.addf %13, %15 : vector<16x32xf32>
    %17 = arith.addf %0, %16 : vector<16x32xf32>
    %cst_11 = arith.constant dense<0.000000e+00> : vector<16xf32>
    %18 = vector.multi_reduction <add>, %17, %cst_11 [1] : vector<16x32xf32> to vector<16xf32>
    %19 = vector.shape_cast %18 : vector<16xf32> to vector<16x1xf32>
    %cst_12 = arith.constant 3.200000e+01 : f32
    %20 = vector.broadcast %cst_12 : f32 to vector<16x1xf32>
    %21 = arith.divf %19, %20 : vector<16x1xf32>
    %22 = vector.broadcast %21 : vector<16x1xf32> to vector<16x32xf32>
    %23 = arith.subf %17, %22 : vector<16x32xf32>
    %24 = arith.mulf %23, %23 : vector<16x32xf32>
    %cst_13 = arith.constant dense<0.000000e+00> : vector<16xf32>
    %25 = vector.multi_reduction <add>, %24, %cst_13 [1] : vector<16x32xf32> to vector<16xf32>
    %26 = vector.shape_cast %25 : vector<16xf32> to vector<16x1xf32>
    %cst_14 = arith.constant 3.200000e+01 : f32
    %27 = vector.broadcast %cst_14 : f32 to vector<16x1xf32>
    %28 = arith.divf %26, %27 : vector<16x1xf32>
    %29 = vector.broadcast %21 : vector<16x1xf32> to vector<16x32xf32>
    %30 = arith.subf %17, %29 : vector<16x32xf32>
    %cst_15 = arith.constant 9.99999974E-6 : f32
    %31 = vector.broadcast %cst_15 : f32 to vector<16x1xf32>
    %32 = arith.addf %28, %31 : vector<16x1xf32>
    %33 = math.rsqrt %32 : vector<16x1xf32>
    %34 = vector.broadcast %33 : vector<16x1xf32> to vector<16x32xf32>
    %35 = arith.mulf %30, %34 : vector<16x32xf32>
    %c0_16 = arith.constant 0 : index
    %c0_17 = arith.constant 0 : index
    %36 = vector.load %arg6[%c0_16, %c0_17] : memref<1x32xf32, #tpu.memory_space<vmem>>, vector<1x32xf32>
    %37 = vector.broadcast %36 : vector<1x32xf32> to vector<16x32xf32>
    %38 = arith.mulf %35, %37 : vector<16x32xf32>
    %c0_18 = arith.constant 0 : index
    %c0_19 = arith.constant 0 : index
    %39 = vector.load %arg7[%c0_18, %c0_19] : memref<1x32xf32, #tpu.memory_space<vmem>>, vector<1x32xf32>
    %40 = vector.broadcast %39 : vector<1x32xf32> to vector<16x32xf32>
    %41 = arith.addf %38, %40 : vector<16x32xf32>
    %c0_20 = arith.constant 0 : index
    %c0_21 = arith.constant 0 : index
    %42 = vector.load %arg8[%c0_20, %c0_21] : memref<16x32xf32, #tpu.memory_space<vmem>>, vector<16x32xf32>
    tpu.vector_store %arg8[%c0_20, %c0_21], %41 {strides = array<i32>} : memref<16x32xf32, #tpu.memory_space<vmem>>, vector<16x32xf32>,
    return
  }
  func.func @transform_0(%arg0: i32) -> (i32, i32) {
    %c0_i32 = arith.constant 0 : i32
    %c0_i32_0 = arith.constant 0 : i32
    return %arg0, %c0_i32 : i32, i32
  }
  func.func @transform_1(%arg0: i32) -> (i32, i32) {
    %c0_i32 = arith.constant 0 : i32
    %c0_i32_0 = arith.constant 0 : i32
    %c0_i32_1 = arith.constant 0 : i32
    return %c0_i32, %c0_i32_0 : i32, i32
  }
  func.func @transform_2(%arg0: i32) -> (i32, i32) {
    %c0_i32 = arith.constant 0 : i32
    %c0_i32_0 = arith.constant 0 : i32
    %c0_i32_1 = arith.constant 0 : i32
    return %c0_i32, %c0_i32_0 : i32, i32
  }
  func.func @transform_3(%arg0: i32) -> (i32, i32) {
    %c0_i32 = arith.constant 0 : i32
    %c0_i32_0 = arith.constant 0 : i32
    %c0_i32_1 = arith.constant 0 : i32
    return %c0_i32, %c0_i32_0 : i32, i32
  }
  func.func @transform_4(%arg0: i32) -> (i32, i32) {
    %c0_i32 = arith.constant 0 : i32
    %c0_i32_0 = arith.constant 0 : i32
    %c0_i32_1 = arith.constant 0 : i32
    return %c0_i32, %c0_i32_0 : i32, i32
  }
  func.func @transform_5(%arg0: i32) -> (i32, i32) {
    %c0_i32 = arith.constant 0 : i32
    %c0_i32_0 = arith.constant 0 : i32
    %c0_i32_1 = arith.constant 0 : i32
    return %c0_i32, %c0_i32_0 : i32, i32
  }
  func.func @transform_6(%arg0: i32) -> (i32, i32) {
    %c0_i32 = arith.constant 0 : i32
    %c0_i32_0 = arith.constant 0 : i32
    %c0_i32_1 = arith.constant 0 : i32
    return %c0_i32, %c0_i32_0 : i32, i32
  }
  func.func @transform_7(%arg0: i32) -> (i32, i32) {
    %c0_i32 = arith.constant 0 : i32
    %c0_i32_0 = arith.constant 0 : i32
    return %arg0, %c0_i32 : i32, i32
  }
}

module attributes {stable_mosaic.version = 11 : i64} {
  func.func @_layernorm_kernel(%arg0: i32, %arg1: memref<16x32xf32, #tpu.memory_space<vmem>>, %arg2: memref<1x32xf32, #tpu.memory_space<vmem>>, %arg3: memref<1x32xf32, #tpu.memory_space<vmem>>, %arg4: memref<16x32xf32, #tpu.memory_space<vmem>>) attributes {dimension_semantics = [#tpu.dimension_semantics<parallel>], iteration_bounds = array<i64: 1>, scalar_prefetch = 0 : i64, scratch_operands = 0 : i64, tpu.core_type = #tpu.core_type<tc>, window_params = [{transform_indices = @transform_0, window_bounds = array<i64: 16, 32>}, {pipeline_mode = #tpu.pipeline_mode<synchronous>, transform_indices = @transform_1, window_bounds = array<i64: 1, 32>}, {pipeline_mode = #tpu.pipeline_mode<synchronous>, transform_indices = @transform_2, window_bounds = array<i64: 1, 32>}, {transform_indices = @transform_3, window_bounds = array<i64: 16, 32>}]} {
    %c0 = arith.constant 0 : index
    %c0_0 = arith.constant 0 : index
    %0 = vector.load %arg1[%c0, %c0_0] : memref<16x32xf32, #tpu.memory_space<vmem>>, vector<16x32xf32>
    %cst = arith.constant dense<0.000000e+00> : vector<16xf32>
    %1 = vector.multi_reduction <add>, %0, %cst [1] : vector<16x32xf32> to vector<16xf32>
    %2 = vector.shape_cast %1 : vector<16xf32> to vector<16x1xf32>
    %cst_1 = arith.constant 3.200000e+01 : f32
    %3 = vector.broadcast %cst_1 : f32 to vector<16x1xf32>
    %4 = arith.divf %2, %3 : vector<16x1xf32>
    %5 = vector.broadcast %4 : vector<16x1xf32> to vector<16x32xf32>
    %6 = arith.subf %0, %5 : vector<16x32xf32>
    %7 = arith.mulf %6, %6 : vector<16x32xf32>
    %cst_2 = arith.constant dense<0.000000e+00> : vector<16xf32>
    %8 = vector.multi_reduction <add>, %7, %cst_2 [1] : vector<16x32xf32> to vector<16xf32>
    %9 = vector.shape_cast %8 : vector<16xf32> to vector<16x1xf32>
    %cst_3 = arith.constant 3.200000e+01 : f32
    %10 = vector.broadcast %cst_3 : f32 to vector<16x1xf32>
    %11 = arith.divf %9, %10 : vector<16x1xf32>
    %12 = vector.broadcast %4 : vector<16x1xf32> to vector<16x32xf32>
    %13 = arith.subf %0, %12 : vector<16x32xf32>
    %cst_4 = arith.constant 9.99999974E-6 : f32
    %14 = vector.broadcast %cst_4 : f32 to vector<16x1xf32>
    %15 = arith.addf %11, %14 : vector<16x1xf32>
    %16 = math.rsqrt %15 : vector<16x1xf32>
    %17 = vector.broadcast %16 : vector<16x1xf32> to vector<16x32xf32>
    %18 = arith.mulf %13, %17 : vector<16x32xf32>
    %c0_5 = arith.constant 0 : index
    %c0_6 = arith.constant 0 : index
    %19 = vector.load %arg2[%c0_5, %c0_6] : memref<1x32xf32, #tpu.memory_space<vmem>>, vector<1x32xf32>
    %20 = vector.broadcast %19 : vector<1x32xf32> to vector<16x32xf32>
    %21 = arith.mulf %18, %20 : vector<16x32xf32>
    %c0_7 = arith.constant 0 : index
    %c0_8 = arith.constant 0 : index
    %22 = vector.load %arg3[%c0_7, %c0_8] : memref<1x32xf32, #tpu.memory_space<vmem>>, vector<1x32xf32>
    %23 = vector.broadcast %22 : vector<1x32xf32> to vector<16x32xf32>
    %24 = arith.addf %21, %23 : vector<16x32xf32>
    %c0_9 = arith.constant 0 : index
    %c0_10 = arith.constant 0 : index
    %25 = vector.load %arg4[%c0_9, %c0_10] : memref<16x32xf32, #tpu.memory_space<vmem>>, vector<16x32xf32>
    tpu.vector_store %arg4[%c0_9, %c0_10], %24 {strides = array<i32>} : memref<16x32xf32, #tpu.memory_space<vmem>>, vector<16x32xf32>,
    return
  }
  func.func @transform_0(%arg0: i32) -> (i32, i32) {
    %c0_i32 = arith.constant 0 : i32
    %c0_i32_0 = arith.constant 0 : i32
    return %arg0, %c0_i32 : i32, i32
  }
  func.func @transform_1(%arg0: i32) -> (i32, i32) {
    %c0_i32 = arith.constant 0 : i32
    %c0_i32_0 = arith.constant 0 : i32
    %c0_i32_1 = arith.constant 0 : i32
    return %c0_i32, %c0_i32_0 : i32, i32
  }
  func.func @transform_2(%arg0: i32) -> (i32, i32) {
    %c0_i32 = arith.constant 0 : i32
    %c0_i32_0 = arith.constant 0 : i32
    %c0_i32_1 = arith.constant 0 : i32
    return %c0_i32, %c0_i32_0 : i32, i32
  }
  func.func @transform_3(%arg0: i32) -> (i32, i32) {
    %c0_i32 = arith.constant 0 : i32
    %c0_i32_0 = arith.constant 0 : i32
    return %arg0, %c0_i32 : i32, i32
  }
}

module attributes {stable_mosaic.version = 11 : i64} {
  func.func @_linear_kernel(%arg0: i32, %arg1: memref<16x32xf32, #tpu.memory_space<vmem>>, %arg2: memref<32x64xf32, #tpu.memory_space<vmem>>, %arg3: memref<1x64xf32, #tpu.memory_space<vmem>>, %arg4: memref<16x64xf32, #tpu.memory_space<vmem>>) attributes {dimension_semantics = [#tpu.dimension_semantics<parallel>], iteration_bounds = array<i64: 1>, scalar_prefetch = 0 : i64, scratch_operands = 0 : i64, tpu.core_type = #tpu.core_type<tc>, window_params = [{transform_indices = @transform_0, window_bounds = array<i64: 16, 32>}, {pipeline_mode = #tpu.pipeline_mode<synchronous>, transform_indices = @transform_1, window_bounds = array<i64: 32, 64>}, {pipeline_mode = #tpu.pipeline_mode<synchronous>, transform_indices = @transform_2, window_bounds = array<i64: 1, 64>}, {transform_indices = @transform_3, window_bounds = array<i64: 16, 64>}]} {
    %c0 = arith.constant 0 : index
    %c0_0 = arith.constant 0 : index
    %0 = vector.load %arg1[%c0, %c0_0] : memref<16x32xf32, #tpu.memory_space<vmem>>, vector<16x32xf32>
    %1 = arith.truncf %0 : vector<16x32xf32> to vector<16x32xbf16>
    %c0_1 = arith.constant 0 : index
    %c0_2 = arith.constant 0 : index
    %2 = vector.load %arg2[%c0_1, %c0_2] : memref<32x64xf32, #tpu.memory_space<vmem>>, vector<32x64xf32>
    %3 = arith.truncf %2 : vector<32x64xf32> to vector<32x64xbf16>
    %cst = arith.constant dense<0.000000e+00> : vector<16x64xf32>
    %4 = tpu.matmul %1, %3, %cst {dimension_numbers = #tpu.dot_dimension_numbers<[1], [0], [0], [1], [0, 0, 1, 1], [], []>} : vector<16x32xbf16>, vector<32x64xbf16>, vector<16x64xf32> -> vector<16x64xf32>
    %c0_3 = arith.constant 0 : index
    %c0_4 = arith.constant 0 : index
    %5 = vector.load %arg3[%c0_3, %c0_4] : memref<1x64xf32, #tpu.memory_space<vmem>>, vector<1x64xf32>
    %6 = vector.broadcast %5 : vector<1x64xf32> to vector<16x64xf32>
    %7 = arith.addf %4, %6 : vector<16x64xf32>
    %c0_5 = arith.constant 0 : index
    %c0_6 = arith.constant 0 : index
    %8 = vector.load %arg4[%c0_5, %c0_6] : memref<16x64xf32, #tpu.memory_space<vmem>>, vector<16x64xf32>
    tpu.vector_store %arg4[%c0_5, %c0_6], %7 {strides = array<i32>} : memref<16x64xf32, #tpu.memory_space<vmem>>, vector<16x64xf32>,
    return
  }
  func.func @transform_0(%arg0: i32) -> (i32, i32) {
    %c0_i32 = arith.constant 0 : i32
    %c0_i32_0 = arith.constant 0 : i32
    return %arg0, %c0_i32 : i32, i32
  }
  func.func @transform_1(%arg0: i32) -> (i32, i32) {
    %c0_i32 = arith.constant 0 : i32
    %c0_i32_0 = arith.constant 0 : i32
    %c0_i32_1 = arith.constant 0 : i32
    return %c0_i32, %c0_i32_0 : i32, i32
  }
  func.func @transform_2(%arg0: i32) -> (i32, i32) {
    %c0_i32 = arith.constant 0 : i32
    %c0_i32_0 = arith.constant 0 : i32
    %c0_i32_1 = arith.constant 0 : i32
    return %c0_i32, %c0_i32_0 : i32, i32
  }
  func.func @transform_3(%arg0: i32) -> (i32, i32) {
    %c0_i32 = arith.constant 0 : i32
    %c0_i32_0 = arith.constant 0 : i32
    return %arg0, %c0_i32 : i32, i32
  }
}

module attributes {stable_mosaic.version = 11 : i64} {
  func.func @_mha_kernel(%arg0: i32, %arg1: memref<1x6x32xf32, #tpu.memory_space<vmem>>, %arg2: memref<1x8x32xf32, #tpu.memory_space<vmem>>, %arg3: memref<1x8x32xf32, #tpu.memory_space<vmem>>, %arg4: memref<1x6x32xf32, #tpu.memory_space<vmem>>) attributes {dimension_semantics = [#tpu.dimension_semantics<parallel>], iteration_bounds = array<i64: 2>, scalar_prefetch = 0 : i64, scratch_operands = 0 : i64, tpu.core_type = #tpu.core_type<tc>, window_params = [{transform_indices = @transform_0, window_bounds = array<i64: 1, 6, 32>}, {transform_indices = @transform_1, window_bounds = array<i64: 1, 8, 32>}, {transform_indices = @transform_2, window_bounds = array<i64: 1, 8, 32>}, {transform_indices = @transform_3, window_bounds = array<i64: 1, 6, 32>}]} {
    %c0 = arith.constant 0 : index
    %c0_0 = arith.constant 0 : index
    %c0_1 = arith.constant 0 : index
    %0 = vector.load %arg1[%c0, %c0_0, %c0_1] : memref<1x6x32xf32, #tpu.memory_space<vmem>>, vector<1x6x32xf32>
    %1 = vector.shape_cast %0 : vector<1x6x32xf32> to vector<6x32xf32>
    %c0_2 = arith.constant 0 : index
    %c0_3 = arith.constant 0 : index
    %c0_4 = arith.constant 0 : index
    %2 = vector.load %arg2[%c0_2, %c0_3, %c0_4] : memref<1x8x32xf32, #tpu.memory_space<vmem>>, vector<1x8x32xf32>
    %3 = vector.shape_cast %2 : vector<1x8x32xf32> to vector<8x32xf32>
    %c0_5 = arith.constant 0 : index
    %c0_6 = arith.constant 0 : index
    %c0_7 = arith.constant 0 : index
    %4 = vector.load %arg3[%c0_5, %c0_6, %c0_7] : memref<1x8x32xf32, #tpu.memory_space<vmem>>, vector<1x8x32xf32>
    %5 = vector.shape_cast %4 : vector<1x8x32xf32> to vector<8x32xf32>
    %6 = vector.extract_strided_slice %1 {offsets = [0, 0], sizes = [6, 16], strides = [1, 1]} : vector<6x32xf32> to vector<6x16xf32>
    %7 = arith.truncf %6 : vector<6x16xf32> to vector<6x16xbf16>
    %8 = vector.extract_strided_slice %3 {offsets = [0, 0], sizes = [8, 16], strides = [1, 1]} : vector<8x32xf32> to vector<8x16xf32>
    %9 = arith.truncf %8 : vector<8x16xf32> to vector<8x16xbf16>
    %10 = vector.extract_strided_slice %5 {offsets = [0, 0], sizes = [8, 16], strides = [1, 1]} : vector<8x32xf32> to vector<8x16xf32>
    %11 = arith.truncf %10 : vector<8x16xf32> to vector<8x16xbf16>
    "tpu.trace_start"() <{level = 10 : i32, message = "qd,kd->qk"}> : () -> ()
    %cst = arith.constant dense<0.000000e+00> : vector<6x8xf32>
    %12 = tpu.matmul %7, %9, %cst {dimension_numbers = #tpu.dot_dimension_numbers<[1], [1], [0], [0], [0, 0, 1, 0], [], []>} : vector<6x16xbf16>, vector<8x16xbf16>, vector<6x8xf32> -> vector<6x8xf32>
    "tpu.trace_stop"() : () -> ()
    %cst_8 = arith.constant 2.500000e-01 : f32
    %13 = vector.broadcast %cst_8 : f32 to vector<6x8xf32>
    %14 = arith.mulf %12, %13 : vector<6x8xf32>
    %cst_9 = arith.constant dense<0xFF800000> : vector<6xf32>
    %15 = vector.multi_reduction <maximumf>, %14, %cst_9 [1] : vector<6x8xf32> to vector<6xf32>
    %16 = vector.shape_cast %15 : vector<6xf32> to vector<6x1xf32>
    %17 = vector.broadcast %16 : vector<6x1xf32> to vector<6x8xf32>
    %18 = arith.subf %14, %17 : vector<6x8xf32>
    %19 = math.exp %18 : vector<6x8xf32>
    %cst_10 = arith.constant dense<0.000000e+00> : vector<6xf32>
    %20 = vector.multi_reduction <add>, %19, %cst_10 [1] : vector<6x8xf32> to vector<6xf32>
    %21 = vector.shape_cast %20 : vector<6xf32> to vector<6x1xf32>
    %22 = tpu.reciprocal %21 {approx = true} : vector<6x1xf32> -> vector<6x1xf32>
    %23 = vector.broadcast %22 : vector<6x1xf32> to vector<6x8xf32>
    %24 = arith.mulf %19, %23 : vector<6x8xf32>
    %25 = arith.truncf %24 : vector<6x8xf32> to vector<6x8xbf16>
    %cst_11 = arith.constant dense<0.000000e+00> : vector<6x16xf32>
    %26 = tpu.matmul %25, %11, %cst_11 {dimension_numbers = #tpu.dot_dimension_numbers<[1], [0], [0], [1], [0, 0, 1, 1], [], []>} : vector<6x8xbf16>, vector<8x16xbf16>, vector<6x16xf32> -> vector<6x16xf32>
    %27 = vector.extract_strided_slice %1 {offsets = [0, 16], sizes = [6, 16], strides = [1, 1]} : vector<6x32xf32> to vector<6x16xf32>
    %28 = arith.truncf %27 : vector<6x16xf32> to vector<6x16xbf16>
    %29 = vector.extract_strided_slice %3 {offsets = [0, 16], sizes = [8, 16], strides = [1, 1]} : vector<8x32xf32> to vector<8x16xf32>
    %30 = arith.truncf %29 : vector<8x16xf32> to vector<8x16xbf16>
    %31 = vector.extract_strided_slice %5 {offsets = [0, 16], sizes = [8, 16], strides = [1, 1]} : vector<8x32xf32> to vector<8x16xf32>
    %32 = arith.truncf %31 : vector<8x16xf32> to vector<8x16xbf16>
    "tpu.trace_start"() <{level = 10 : i32, message = "qd,kd->qk"}> : () -> ()
    %cst_12 = arith.constant dense<0.000000e+00> : vector<6x8xf32>
    %33 = tpu.matmul %28, %30, %cst_12 {dimension_numbers = #tpu.dot_dimension_numbers<[1], [1], [0], [0], [0, 0, 1, 0], [], []>} : vector<6x16xbf16>, vector<8x16xbf16>, vector<6x8xf32> -> vector<6x8xf32>
    "tpu.trace_stop"() : () -> ()
    %cst_13 = arith.constant 2.500000e-01 : f32
    %34 = vector.broadcast %cst_13 : f32 to vector<6x8xf32>
    %35 = arith.mulf %33, %34 : vector<6x8xf32>
    %cst_14 = arith.constant dense<0xFF800000> : vector<6xf32>
    %36 = vector.multi_reduction <maximumf>, %35, %cst_14 [1] : vector<6x8xf32> to vector<6xf32>
    %37 = vector.shape_cast %36 : vector<6xf32> to vector<6x1xf32>
    %38 = vector.broadcast %37 : vector<6x1xf32> to vector<6x8xf32>
    %39 = arith.subf %35, %38 : vector<6x8xf32>
    %40 = math.exp %39 : vector<6x8xf32>
    %cst_15 = arith.constant dense<0.000000e+00> : vector<6xf32>
    %41 = vector.multi_reduction <add>, %40, %cst_15 [1] : vector<6x8xf32> to vector<6xf32>
    %42 = vector.shape_cast %41 : vector<6xf32> to vector<6x1xf32>
    %43 = tpu.reciprocal %42 {approx = true} : vector<6x1xf32> -> vector<6x1xf32>
    %44 = vector.broadcast %43 : vector<6x1xf32> to vector<6x8xf32>
    %45 = arith.mulf %40, %44 : vector<6x8xf32>
    %46 = arith.truncf %45 : vector<6x8xf32> to vector<6x8xbf16>
    %cst_16 = arith.constant dense<0.000000e+00> : vector<6x16xf32>
    %47 = tpu.matmul %46, %32, %cst_16 {dimension_numbers = #tpu.dot_dimension_numbers<[1], [0], [0], [1], [0, 0, 1, 1], [], []>} : vector<6x8xbf16>, vector<8x16xbf16>, vector<6x16xf32> -> vector<6x16xf32>
    %48 = tpu.concatenate %26, %47 in 1 : vector<6x16xf32>, vector<6x16xf32> -> vector<6x32xf32>
    %c0_17 = arith.constant 0 : index
    %c0_18 = arith.constant 0 : index
    %c0_19 = arith.constant 0 : index
    %49 = vector.load %arg4[%c0_17, %c0_18, %c0_19] : memref<1x6x32xf32, #tpu.memory_space<vmem>>, vector<1x6x32xf32>
    %50 = vector.shape_cast %49 : vector<1x6x32xf32> to vector<6x32xf32>
    %51 = vector.shape_cast %48 : vector<6x32xf32> to vector<1x6x32xf32>
    tpu.vector_store %arg4[%c0_17, %c0_18, %c0_19], %51 {strides = array<i32>} : memref<1x6x32xf32, #tpu.memory_space<vmem>>, vector<1x6x32xf32>,
    return
  }
  func.func @transform_0(%arg0: i32) -> (i32, i32, i32) {
    %c0_i32 = arith.constant 0 : i32
    %c0_i32_0 = arith.constant 0 : i32
    %c0_i32_1 = arith.constant 0 : i32
    return %arg0, %c0_i32, %c0_i32_0 : i32, i32, i32
  }
  func.func @transform_1(%arg0: i32) -> (i32, i32, i32) {
    %c0_i32 = arith.constant 0 : i32
    %c0_i32_0 = arith.constant 0 : i32
    %c0_i32_1 = arith.constant 0 : i32
    return %arg0, %c0_i32, %c0_i32_0 : i32, i32, i32
  }
  func.func @transform_2(%arg0: i32) -> (i32, i32, i32) {
    %c0_i32 = arith.constant 0 : i32
    %c0_i32_0 = arith.constant 0 : i32
    %c0_i32_1 = arith.constant 0 : i32
    return %arg0, %c0_i32, %c0_i32_0 : i32, i32, i32
  }
  func.func @transform_3(%arg0: i32) -> (i32, i32, i32) {
    %c0_i32 = arith.constant 0 : i32
    %c0_i32_0 = arith.constant 0 : i32
    %c0_i32_1 = arith.constant 0 : i32
    return %arg0, %c0_i32, %c0_i32_0 : i32, i32, i32
  }
}

module attributes {stable_mosaic.version = 11 : i64} {
  func.func @_linear_add_ln_kernel(%arg0: i32, %arg1: memref<12x32xf32, #tpu.memory_space<vmem>>, %arg2: memref<32x32xf32, #tpu.memory_space<vmem>>, %arg3: memref<1x32xf32, #tpu.memory_space<vmem>>, %arg4: memref<12x32xf32, #tpu.memory_space<vmem>>, %arg5: memref<1x32xf32, #tpu.memory_space<vmem>>, %arg6: memref<1x32xf32, #tpu.memory_space<vmem>>, %arg7: memref<12x32xf32, #tpu.memory_space<vmem>>) attributes {dimension_semantics = [#tpu.dimension_semantics<parallel>], iteration_bounds = array<i64: 1>, scalar_prefetch = 0 : i64, scratch_operands = 0 : i64, tpu.core_type = #tpu.core_type<tc>, window_params = [{transform_indices = @transform_0, window_bounds = array<i64: 12, 32>}, {pipeline_mode = #tpu.pipeline_mode<synchronous>, transform_indices = @transform_1, window_bounds = array<i64: 32, 32>}, {pipeline_mode = #tpu.pipeline_mode<synchronous>, transform_indices = @transform_2, window_bounds = array<i64: 1, 32>}, {transform_indices = @transform_3, window_bounds = array<i64: 12, 32>}, {pipeline_mode = #tpu.pipeline_mode<synchronous>, transform_indices = @transform_4, window_bounds = array<i64: 1, 32>}, {pipeline_mode = #tpu.pipeline_mode<synchronous>, transform_indices = @transform_5, window_bounds = array<i64: 1, 32>}, {transform_indices = @transform_6, window_bounds = array<i64: 12, 32>}]} {
    %c0 = arith.constant 0 : index
    %c0_0 = arith.constant 0 : index
    %0 = vector.load %arg1[%c0, %c0_0] : memref<12x32xf32, #tpu.memory_space<vmem>>, vector<12x32xf32>
    %1 = arith.truncf %0 : vector<12x32xf32> to vector<12x32xbf16>
    %c0_1 = arith.constant 0 : index
    %c0_2 = arith.constant 0 : index
    %2 = vector.load %arg2[%c0_1, %c0_2] : memref<32x32xf32, #tpu.memory_space<vmem>>, vector<32x32xf32>
    %3 = arith.truncf %2 : vector<32x32xf32> to vector<32x32xbf16>
    %cst = arith.constant dense<0.000000e+00> : vector<12x32xf32>
    %4 = tpu.matmul %1, %3, %cst {dimension_numbers = #tpu.dot_dimension_numbers<[1], [0], [0], [1], [0, 0, 1, 1], [], []>} : vector<12x32xbf16>, vector<32x32xbf16>, vector<12x32xf32> -> vector<12x32xf32>
    %c0_3 = arith.constant 0 : index
    %c0_4 = arith.constant 0 : index
    %5 = vector.load %arg3[%c0_3, %c0_4] : memref<1x32xf32, #tpu.memory_space<vmem>>, vector<1x32xf32>
    %6 = vector.broadcast %5 : vector<1x32xf32> to vector<12x32xf32>
    %7 = arith.addf %4, %6 : vector<12x32xf32>
    %c0_5 = arith.constant 0 : index
    %c0_6 = arith.constant 0 : index
    %8 = vector.load %arg4[%c0_5, %c0_6] : memref<12x32xf32, #tpu.memory_space<vmem>>, vector<12x32xf32>
    %9 = arith.addf %8, %7 : vector<12x32xf32>
    %cst_7 = arith.constant dense<0.000000e+00> : vector<12xf32>
    %10 = vector.multi_reduction <add>, %9, %cst_7 [1] : vector<12x32xf32> to vector<12xf32>
    %11 = vector.shape_cast %10 : vector<12xf32> to vector<12x1xf32>
    %cst_8 = arith.constant 3.200000e+01 : f32
    %12 = vector.broadcast %cst_8 : f32 to vector<12x1xf32>
    %13 = arith.divf %11, %12 : vector<12x1xf32>
    %14 = vector.broadcast %13 : vector<12x1xf32> to vector<12x32xf32>
    %15 = arith.subf %9, %14 : vector<12x32xf32>
    %16 = arith.mulf %15, %15 : vector<12x32xf32>
    %cst_9 = arith.constant dense<0.000000e+00> : vector<12xf32>
    %17 = vector.multi_reduction <add>, %16, %cst_9 [1] : vector<12x32xf32> to vector<12xf32>
    %18 = vector.shape_cast %17 : vector<12xf32> to vector<12x1xf32>
    %cst_10 = arith.constant 3.200000e+01 : f32
    %19 = vector.broadcast %cst_10 : f32 to vector<12x1xf32>
    %20 = arith.divf %18, %19 : vector<12x1xf32>
    %21 = vector.broadcast %13 : vector<12x1xf32> to vector<12x32xf32>
    %22 = arith.subf %9, %21 : vector<12x32xf32>
    %cst_11 = arith.constant 9.99999974E-6 : f32
    %23 = vector.broadcast %cst_11 : f32 to vector<12x1xf32>
    %24 = arith.addf %20, %23 : vector<12x1xf32>
    %25 = math.rsqrt %24 : vector<12x1xf32>
    %26 = vector.broadcast %25 : vector<12x1xf32> to vector<12x32xf32>
    %27 = arith.mulf %22, %26 : vector<12x32xf32>
    %c0_12 = arith.constant 0 : index
    %c0_13 = arith.constant 0 : index
    %28 = vector.load %arg5[%c0_12, %c0_13] : memref<1x32xf32, #tpu.memory_space<vmem>>, vector<1x32xf32>
    %29 = vector.broadcast %28 : vector<1x32xf32> to vector<12x32xf32>
    %30 = arith.mulf %27, %29 : vector<12x32xf32>
    %c0_14 = arith.constant 0 : index
    %c0_15 = arith.constant 0 : index
    %31 = vector.load %arg6[%c0_14, %c0_15] : memref<1x32xf32, #tpu.memory_space<vmem>>, vector<1x32xf32>
    %32 = vector.broadcast %31 : vector<1x32xf32> to vector<12x32xf32>
    %33 = arith.addf %30, %32 : vector<12x32xf32>
    %c0_16 = arith.constant 0 : index
    %c0_17 = arith.constant 0 : index
    %34 = vector.load %arg7[%c0_16, %c0_17] : memref<12x32xf32, #tpu.memory_space<vmem>>, vector<12x32xf32>
    tpu.vector_store %arg7[%c0_16, %c0_17], %33 {strides = array<i32>} : memref<12x32xf32, #tpu.memory_space<vmem>>, vector<12x32xf32>,
    return
  }
  func.func @transform_0(%arg0: i32) -> (i32, i32) {
    %c0_i32 = arith.constant 0 : i32
    %c0_i32_0 = arith.constant 0 : i32
    return %arg0, %c0_i32 : i32, i32
  }
  func.func @transform_1(%arg0: i32) -> (i32, i32) {
    %c0_i32 = arith.constant 0 : i32
    %c0_i32_0 = arith.constant 0 : i32
    %c0_i32_1 = arith.constant 0 : i32
    return %c0_i32, %c0_i32_0 : i32, i32
  }
  func.func @transform_2(%arg0: i32) -> (i32, i32) {
    %c0_i32 = arith.constant 0 : i32
    %c0_i32_0 = arith.constant 0 : i32
    %c0_i32_1 = arith.constant 0 : i32
    return %c0_i32, %c0_i32_0 : i32, i32
  }
  func.func @transform_3(%arg0: i32) -> (i32, i32) {
    %c0_i32 = arith.constant 0 : i32
    %c0_i32_0 = arith.constant 0 : i32
    return %arg0, %c0_i32 : i32, i32
  }
  func.func @transform_4(%arg0: i32) -> (i32, i32) {
    %c0_i32 = arith.constant 0 : i32
    %c0_i32_0 = arith.constant 0 : i32
    %c0_i32_1 = arith.constant 0 : i32
    return %c0_i32, %c0_i32_0 : i32, i32
  }
  func.func @transform_5(%arg0: i32) -> (i32, i32) {
    %c0_i32 = arith.constant 0 : i32
    %c0_i32_0 = arith.constant 0 : i32
    %c0_i32_1 = arith.constant 0 : i32
    return %c0_i32, %c0_i32_0 : i32, i32
  }
  func.func @transform_6(%arg0: i32) -> (i32, i32) {
    %c0_i32 = arith.constant 0 : i32
    %c0_i32_0 = arith.constant 0 : i32
    return %arg0, %c0_i32 : i32, i32
  }
}

module attributes {stable_mosaic.version = 11 : i64} {
  func.func @_ffn_add_ln_kernel(%arg0: i32, %arg1: memref<12x32xf32, #tpu.memory_space<vmem>>, %arg2: memref<32x64xf32, #tpu.memory_space<vmem>>, %arg3: memref<1x64xf32, #tpu.memory_space<vmem>>, %arg4: memref<64x32xf32, #tpu.memory_space<vmem>>, %arg5: memref<1x32xf32, #tpu.memory_space<vmem>>, %arg6: memref<1x32xf32, #tpu.memory_space<vmem>>, %arg7: memref<1x32xf32, #tpu.memory_space<vmem>>, %arg8: memref<12x32xf32, #tpu.memory_space<vmem>>) attributes {dimension_semantics = [#tpu.dimension_semantics<parallel>], iteration_bounds = array<i64: 1>, scalar_prefetch = 0 : i64, scratch_operands = 0 : i64, tpu.core_type = #tpu.core_type<tc>, window_params = [{transform_indices = @transform_0, window_bounds = array<i64: 12, 32>}, {pipeline_mode = #tpu.pipeline_mode<synchronous>, transform_indices = @transform_1, window_bounds = array<i64: 32, 64>}, {pipeline_mode = #tpu.pipeline_mode<synchronous>, transform_indices = @transform_2, window_bounds = array<i64: 1, 64>}, {pipeline_mode = #tpu.pipeline_mode<synchronous>, transform_indices = @transform_3, window_bounds = array<i64: 64, 32>}, {pipeline_mode = #tpu.pipeline_mode<synchronous>, transform_indices = @transform_4, window_bounds = array<i64: 1, 32>}, {pipeline_mode = #tpu.pipeline_mode<synchronous>, transform_indices = @transform_5, window_bounds = array<i64: 1, 32>}, {pipeline_mode = #tpu.pipeline_mode<synchronous>, transform_indices = @transform_6, window_bounds = array<i64: 1, 32>}, {transform_indices = @transform_7, window_bounds = array<i64: 12, 32>}]} {
    %c0 = arith.constant 0 : index
    %c0_0 = arith.constant 0 : index
    %0 = vector.load %arg1[%c0, %c0_0] : memref<12x32xf32, #tpu.memory_space<vmem>>, vector<12x32xf32>
    %1 = arith.truncf %0 : vector<12x32xf32> to vector<12x32xbf16>
    %c0_1 = arith.constant 0 : index
    %c0_2 = arith.constant 0 : index
    %2 = vector.load %arg2[%c0_1, %c0_2] : memref<32x64xf32, #tpu.memory_space<vmem>>, vector<32x64xf32>
    %3 = arith.truncf %2 : vector<32x64xf32> to vector<32x64xbf16>
    %cst = arith.constant dense<0.000000e+00> : vector<12x64xf32>
    %4 = tpu.matmul %1, %3, %cst {dimension_numbers = #tpu.dot_dimension_numbers<[1], [0], [0], [1], [0, 0, 1, 1], [], []>} : vector<12x32xbf16>, vector<32x64xbf16>, vector<12x64xf32> -> vector<12x64xf32>
    %c0_3 = arith.constant 0 : index
    %c0_4 = arith.constant 0 : index
    %5 = vector.load %arg3[%c0_3, %c0_4] : memref<1x64xf32, #tpu.memory_space<vmem>>, vector<1x64xf32>
    %6 = vector.broadcast %5 : vector<1x64xf32> to vector<12x64xf32>
    %7 = arith.addf %4, %6 : vector<12x64xf32>
    %cst_5 = arith.constant 0.000000e+00 : f32
    %8 = vector.broadcast %cst_5 : f32 to vector<12x64xf32>
    %9 = arith.maximumf %7, %8 : vector<12x64xf32>
    %10 = arith.truncf %9 : vector<12x64xf32> to vector<12x64xbf16>
    %c0_6 = arith.constant 0 : index
    %c0_7 = arith.constant 0 : index
    %11 = vector.load %arg4[%c0_6, %c0_7] : memref<64x32xf32, #tpu.memory_space<vmem>>, vector<64x32xf32>
    %12 = arith.truncf %11 : vector<64x32xf32> to vector<64x32xbf16>
    %cst_8 = arith.constant dense<0.000000e+00> : vector<12x32xf32>
    %13 = tpu.matmul %10, %12, %cst_8 {dimension_numbers = #tpu.dot_dimension_numbers<[1], [0], [0], [1], [0, 0, 1, 1], [], []>} : vector<12x64xbf16>, vector<64x32xbf16>, vector<12x32xf32> -> vector<12x32xf32>
    %c0_9 = arith.constant 0 : index
    %c0_10 = arith.constant 0 : index
    %14 = vector.load %arg5[%c0_9, %c0_10] : memref<1x32xf32, #tpu.memory_space<vmem>>, vector<1x32xf32>
    %15 = vector.broadcast %14 : vector<1x32xf32> to vector<12x32xf32>
    %16 = arith.addf %13, %15 : vector<12x32xf32>
    %17 = arith.addf %0, %16 : vector<12x32xf32>
    %cst_11 = arith.constant dense<0.000000e+00> : vector<12xf32>
    %18 = vector.multi_reduction <add>, %17, %cst_11 [1] : vector<12x32xf32> to vector<12xf32>
    %19 = vector.shape_cast %18 : vector<12xf32> to vector<12x1xf32>
    %cst_12 = arith.constant 3.200000e+01 : f32
    %20 = vector.broadcast %cst_12 : f32 to vector<12x1xf32>
    %21 = arith.divf %19, %20 : vector<12x1xf32>
    %22 = vector.broadcast %21 : vector<12x1xf32> to vector<12x32xf32>
    %23 = arith.subf %17, %22 : vector<12x32xf32>
    %24 = arith.mulf %23, %23 : vector<12x32xf32>
    %cst_13 = arith.constant dense<0.000000e+00> : vector<12xf32>
    %25 = vector.multi_reduction <add>, %24, %cst_13 [1] : vector<12x32xf32> to vector<12xf32>
    %26 = vector.shape_cast %25 : vector<12xf32> to vector<12x1xf32>
    %cst_14 = arith.constant 3.200000e+01 : f32
    %27 = vector.broadcast %cst_14 : f32 to vector<12x1xf32>
    %28 = arith.divf %26, %27 : vector<12x1xf32>
    %29 = vector.broadcast %21 : vector<12x1xf32> to vector<12x32xf32>
    %30 = arith.subf %17, %29 : vector<12x32xf32>
    %cst_15 = arith.constant 9.99999974E-6 : f32
    %31 = vector.broadcast %cst_15 : f32 to vector<12x1xf32>
    %32 = arith.addf %28, %31 : vector<12x1xf32>
    %33 = math.rsqrt %32 : vector<12x1xf32>
    %34 = vector.broadcast %33 : vector<12x1xf32> to vector<12x32xf32>
    %35 = arith.mulf %30, %34 : vector<12x32xf32>
    %c0_16 = arith.constant 0 : index
    %c0_17 = arith.constant 0 : index
    %36 = vector.load %arg6[%c0_16, %c0_17] : memref<1x32xf32, #tpu.memory_space<vmem>>, vector<1x32xf32>
    %37 = vector.broadcast %36 : vector<1x32xf32> to vector<12x32xf32>
    %38 = arith.mulf %35, %37 : vector<12x32xf32>
    %c0_18 = arith.constant 0 : index
    %c0_19 = arith.constant 0 : index
    %39 = vector.load %arg7[%c0_18, %c0_19] : memref<1x32xf32, #tpu.memory_space<vmem>>, vector<1x32xf32>
    %40 = vector.broadcast %39 : vector<1x32xf32> to vector<12x32xf32>
    %41 = arith.addf %38, %40 : vector<12x32xf32>
    %c0_20 = arith.constant 0 : index
    %c0_21 = arith.constant 0 : index
    %42 = vector.load %arg8[%c0_20, %c0_21] : memref<12x32xf32, #tpu.memory_space<vmem>>, vector<12x32xf32>
    tpu.vector_store %arg8[%c0_20, %c0_21], %41 {strides = array<i32>} : memref<12x32xf32, #tpu.memory_space<vmem>>, vector<12x32xf32>,
    return
  }
  func.func @transform_0(%arg0: i32) -> (i32, i32) {
    %c0_i32 = arith.constant 0 : i32
    %c0_i32_0 = arith.constant 0 : i32
    return %arg0, %c0_i32 : i32, i32
  }
  func.func @transform_1(%arg0: i32) -> (i32, i32) {
    %c0_i32 = arith.constant 0 : i32
    %c0_i32_0 = arith.constant 0 : i32
    %c0_i32_1 = arith.constant 0 : i32
    return %c0_i32, %c0_i32_0 : i32, i32
  }
  func.func @transform_2(%arg0: i32) -> (i32, i32) {
    %c0_i32 = arith.constant 0 : i32
    %c0_i32_0 = arith.constant 0 : i32
    %c0_i32_1 = arith.constant 0 : i32
    return %c0_i32, %c0_i32_0 : i32, i32
  }
  func.func @transform_3(%arg0: i32) -> (i32, i32) {
    %c0_i32 = arith.constant 0 : i32
    %c0_i32_0 = arith.constant 0 : i32
    %c0_i32_1 = arith.constant 0 : i32
    return %c0_i32, %c0_i32_0 : i32, i32
  }
  func.func @transform_4(%arg0: i32) -> (i32, i32) {
    %c0_i32 = arith.constant 0 : i32
    %c0_i32_0 = arith.constant 0 : i32
    %c0_i32_1 = arith.constant 0 : i32
    return %c0_i32, %c0_i32_0 : i32, i32
  }
  func.func @transform_5(%arg0: i32) -> (i32, i32) {
    %c0_i32 = arith.constant 0 : i32
    %c0_i32_0 = arith.constant 0 : i32
    %c0_i32_1 = arith.constant 0 : i32
    return %c0_i32, %c0_i32_0 : i32, i32
  }
  func.func @transform_6(%arg0: i32) -> (i32, i32) {
    %c0_i32 = arith.constant 0 : i32
    %c0_i32_0 = arith.constant 0 : i32
    %c0_i32_1 = arith.constant 0 : i32
    return %c0_i32, %c0_i32_0 : i32, i32
  }
  func.func @transform_7(%arg0: i32) -> (i32, i32) {
    %c0_i32 = arith.constant 0 : i32
    %c0_i32_0 = arith.constant 0 : i32
    return %arg0, %c0_i32 : i32, i32
  }
}

module attributes {stable_mosaic.version = 11 : i64} {
  func.func @_layernorm_kernel(%arg0: i32, %arg1: memref<12x32xf32, #tpu.memory_space<vmem>>, %arg2: memref<1x32xf32, #tpu.memory_space<vmem>>, %arg3: memref<1x32xf32, #tpu.memory_space<vmem>>, %arg4: memref<12x32xf32, #tpu.memory_space<vmem>>) attributes {dimension_semantics = [#tpu.dimension_semantics<parallel>], iteration_bounds = array<i64: 1>, scalar_prefetch = 0 : i64, scratch_operands = 0 : i64, tpu.core_type = #tpu.core_type<tc>, window_params = [{transform_indices = @transform_0, window_bounds = array<i64: 12, 32>}, {pipeline_mode = #tpu.pipeline_mode<synchronous>, transform_indices = @transform_1, window_bounds = array<i64: 1, 32>}, {pipeline_mode = #tpu.pipeline_mode<synchronous>, transform_indices = @transform_2, window_bounds = array<i64: 1, 32>}, {transform_indices = @transform_3, window_bounds = array<i64: 12, 32>}]} {
    %c0 = arith.constant 0 : index
    %c0_0 = arith.constant 0 : index
    %0 = vector.load %arg1[%c0, %c0_0] : memref<12x32xf32, #tpu.memory_space<vmem>>, vector<12x32xf32>
    %cst = arith.constant dense<0.000000e+00> : vector<12xf32>
    %1 = vector.multi_reduction <add>, %0, %cst [1] : vector<12x32xf32> to vector<12xf32>
    %2 = vector.shape_cast %1 : vector<12xf32> to vector<12x1xf32>
    %cst_1 = arith.constant 3.200000e+01 : f32
    %3 = vector.broadcast %cst_1 : f32 to vector<12x1xf32>
    %4 = arith.divf %2, %3 : vector<12x1xf32>
    %5 = vector.broadcast %4 : vector<12x1xf32> to vector<12x32xf32>
    %6 = arith.subf %0, %5 : vector<12x32xf32>
    %7 = arith.mulf %6, %6 : vector<12x32xf32>
    %cst_2 = arith.constant dense<0.000000e+00> : vector<12xf32>
    %8 = vector.multi_reduction <add>, %7, %cst_2 [1] : vector<12x32xf32> to vector<12xf32>
    %9 = vector.shape_cast %8 : vector<12xf32> to vector<12x1xf32>
    %cst_3 = arith.constant 3.200000e+01 : f32
    %10 = vector.broadcast %cst_3 : f32 to vector<12x1xf32>
    %11 = arith.divf %9, %10 : vector<12x1xf32>
    %12 = vector.broadcast %4 : vector<12x1xf32> to vector<12x32xf32>
    %13 = arith.subf %0, %12 : vector<12x32xf32>
    %cst_4 = arith.constant 9.99999974E-6 : f32
    %14 = vector.broadcast %cst_4 : f32 to vector<12x1xf32>
    %15 = arith.addf %11, %14 : vector<12x1xf32>
    %16 = math.rsqrt %15 : vector<12x1xf32>
    %17 = vector.broadcast %16 : vector<12x1xf32> to vector<12x32xf32>
    %18 = arith.mulf %13, %17 : vector<12x32xf32>
    %c0_5 = arith.constant 0 : index
    %c0_6 = arith.constant 0 : index
    %19 = vector.load %arg2[%c0_5, %c0_6] : memref<1x32xf32, #tpu.memory_space<vmem>>, vector<1x32xf32>
    %20 = vector.broadcast %19 : vector<1x32xf32> to vector<12x32xf32>
    %21 = arith.mulf %18, %20 : vector<12x32xf32>
    %c0_7 = arith.constant 0 : index
    %c0_8 = arith.constant 0 : index
    %22 = vector.load %arg3[%c0_7, %c0_8] : memref<1x32xf32, #tpu.memory_space<vmem>>, vector<1x32xf32>
    %23 = vector.broadcast %22 : vector<1x32xf32> to vector<12x32xf32>
    %24 = arith.addf %21, %23 : vector<12x32xf32>
    %c0_9 = arith.constant 0 : index
    %c0_10 = arith.constant 0 : index
    %25 = vector.load %arg4[%c0_9, %c0_10] : memref<12x32xf32, #tpu.memory_space<vmem>>, vector<12x32xf32>
    tpu.vector_store %arg4[%c0_9, %c0_10], %24 {strides = array<i32>} : memref<12x32xf32, #tpu.memory_space<vmem>>, vector<12x32xf32>,
    return
  }
  func.func @transform_0(%arg0: i32) -> (i32, i32) {
    %c0_i32 = arith.constant 0 : i32
    %c0_i32_0 = arith.constant 0 : i32
    return %arg0, %c0_i32 : i32, i32
  }
  func.func @transform_1(%arg0: i32) -> (i32, i32) {
    %c0_i32 = arith.constant 0 : i32
    %c0_i32_0 = arith.constant 0 : i32
    %c0_i32_1 = arith.constant 0 : i32
    return %c0_i32, %c0_i32_0 : i32, i32
  }
  func.func @transform_2(%arg0: i32) -> (i32, i32) {
    %c0_i32 = arith.constant 0 : i32
    %c0_i32_0 = arith.constant 0 : i32
    %c0_i32_1 = arith.constant 0 : i32
    return %c0_i32, %c0_i32_0 : i32, i32
  }
  func.func @transform_3(%arg0: i32) -> (i32, i32) {
    %c0_i32 = arith.constant 0 : i32
    %c0_i32_0 = arith.constant 0 : i32
    return %arg0, %c0_i32 : i32, i32
  }
}

module attributes {stable_mosaic.version = 11 : i64} {
  func.func @_linear_kernel(%arg0: i32, %arg1: memref<12x32xf32, #tpu.memory_space<vmem>>, %arg2: memref<32x16xf32, #tpu.memory_space<vmem>>, %arg3: memref<1x16xf32, #tpu.memory_space<vmem>>, %arg4: memref<12x16xf32, #tpu.memory_space<vmem>>) attributes {dimension_semantics = [#tpu.dimension_semantics<parallel>], iteration_bounds = array<i64: 1>, scalar_prefetch = 0 : i64, scratch_operands = 0 : i64, tpu.core_type = #tpu.core_type<tc>, window_params = [{transform_indices = @transform_0, window_bounds = array<i64: 12, 32>}, {pipeline_mode = #tpu.pipeline_mode<synchronous>, transform_indices = @transform_1, window_bounds = array<i64: 32, 16>}, {pipeline_mode = #tpu.pipeline_mode<synchronous>, transform_indices = @transform_2, window_bounds = array<i64: 1, 16>}, {transform_indices = @transform_3, window_bounds = array<i64: 12, 16>}]} {
    %c0 = arith.constant 0 : index
    %c0_0 = arith.constant 0 : index
    %0 = vector.load %arg1[%c0, %c0_0] : memref<12x32xf32, #tpu.memory_space<vmem>>, vector<12x32xf32>
    %1 = arith.truncf %0 : vector<12x32xf32> to vector<12x32xbf16>
    %c0_1 = arith.constant 0 : index
    %c0_2 = arith.constant 0 : index
    %2 = vector.load %arg2[%c0_1, %c0_2] : memref<32x16xf32, #tpu.memory_space<vmem>>, vector<32x16xf32>
    %3 = arith.truncf %2 : vector<32x16xf32> to vector<32x16xbf16>
    %cst = arith.constant dense<0.000000e+00> : vector<12x16xf32>
    %4 = tpu.matmul %1, %3, %cst {dimension_numbers = #tpu.dot_dimension_numbers<[1], [0], [0], [1], [0, 0, 1, 1], [], []>} : vector<12x32xbf16>, vector<32x16xbf16>, vector<12x16xf32> -> vector<12x16xf32>
    %c0_3 = arith.constant 0 : index
    %c0_4 = arith.constant 0 : index
    %5 = vector.load %arg3[%c0_3, %c0_4] : memref<1x16xf32, #tpu.memory_space<vmem>>, vector<1x16xf32>
    %6 = vector.broadcast %5 : vector<1x16xf32> to vector<12x16xf32>
    %7 = arith.addf %4, %6 : vector<12x16xf32>
    %c0_5 = arith.constant 0 : index
    %c0_6 = arith.constant 0 : index
    %8 = vector.load %arg4[%c0_5, %c0_6] : memref<12x16xf32, #tpu.memory_space<vmem>>, vector<12x16xf32>
    tpu.vector_store %arg4[%c0_5, %c0_6], %7 {strides = array<i32>} : memref<12x16xf32, #tpu.memory_space<vmem>>, vector<12x16xf32>,
    return
  }
  func.func @transform_0(%arg0: i32) -> (i32, i32) {
    %c0_i32 = arith.constant 0 : i32
    %c0_i32_0 = arith.constant 0 : i32
    return %arg0, %c0_i32 : i32, i32
  }
  func.func @transform_1(%arg0: i32) -> (i32, i32) {
    %c0_i32 = arith.constant 0 : i32
    %c0_i32_0 = arith.constant 0 : i32
    %c0_i32_1 = arith.constant 0 : i32
    return %c0_i32, %c0_i32_0 : i32, i32
  }
  func.func @transform_2(%arg0: i32) -> (i32, i32) {
    %c0_i32 = arith.constant 0 : i32
    %c0_i32_0 = arith.constant 0 : i32
    %c0_i32_1 = arith.constant 0 : i32
    return %c0_i32, %c0_i32_0 : i32, i32
  }
  func.func @transform_3(%arg0: i32) -> (i32, i32) {
    %c0_i32 = arith.constant 0 : i32
    %c0_i32_0 = arith.constant 0 : i32
    return %arg0, %c0_i32 : i32, i32
  }
}

</mosaic_0001>

<bundles_post_ra>
// kernel: onset_transformer_forward.24
= control target key start
LH: loop header
LB: loop body
LE: loop exit
PB: predicated region body
PF: predicated region fallthrough
CT: control target
= control target key end

     0   :  { %11 = vsyncpa [#allocation3], 0  ;;  %s385_s0 = inlined_call_operand.vmem [shape: f32[12,32], index: 0, kind: input, shape index: {}]   ;;  %s386_s1 = inlined_call_operand.vmem [shape: f32[32,32], index: 1, kind: input, shape index: {}]   ;;  %s387_s2 = inlined_call_operand.hbm [shape: f32[1,32], index: 2, kind: input, shape index: {}]   ;;  %s388_s3 = inlined_call_operand.vmem [shape: f32[12,32], index: 3, kind: input, shape index: {}]   ;;  %s389_s4 = inlined_call_operand.hbm [shape: f32[1,32], index: 4, kind: input, shape index: {}]   ;;  %s390_s5 = inlined_call_operand.hbm [shape: f32[1,32], index: 5, kind: input, shape index: {}]   ;;  %s391_s6 = inlined_call_operand.vmem [shape: f32[12,32], index: 6, kind: output, shape index: {}]  }
   0x1   :  { %12 = vsyncpa [#allocation5], 0  ;;  %s272_s21 = smov [#allocation4]   ;;  %s273_s23 = smov [#allocation2]  }
   0x2   :  { %s35_s22 = sshll.u32 %s272_s21, 4  ;;  %s23_s24 = sshll.u32 %s273_s23, 4  ;;  %s36_s22 = int_to_ptr.vmem [resolvable:$true] %s35_s22  ;;  %s24_s24 = int_to_ptr.vmem [resolvable:$true] %s23_s24 }
   0x3   :  { %s202_s27 = scalar_lea.hbm %s389_s4, 16 }
   0x4   :  { %p203_p0 = scmp.ne.s32.totalorder %s389_s4, %s202_s27  ;;  %p206_p1 = scmp.lt.u32.totalorder %s202_s27, %s389_s4 }
   0x6   :  { %p208_p2 = pnand %p206_p1, %p203_p0 }
   0x8   :  { %211 = shalt.err (!%p208_p2)
}
   0x9   :  { %s212_s8 = scalar_lea.vmem %s36_s22, 16  ;;  %s216_s9 = scalar_lea.vmem %s36_s22, 32 }
   0xa   :  { %p213_p3 = scmp.ne.s32.totalorder %s36_s22, %s212_s8  ;;  %p217_p4 = scmp.lt.s32.totalorder %s36_s22, %s36_s22 }
   0xb   :  { %p218_p5 = scmp.lt.s32.totalorder %s216_s9, %s212_s8 }
   0xd   :  { %p219_p6 = por %p218_p5, %p217_p4 }
   0xf   :  { %p220_p7 = pnand %p219_p6, %p213_p3 }
  0x11   :  { %223 = shalt.err (!%p220_p7)
}
  0x12   :  { %38 = dma.hbm_to_vmem [thread:$0]  %s389_s4, 16, %s36_s22, [#allocation5]  }
  0x13   :  { %s224_s14 = scalar_lea.hbm %s387_s2, 16 }
  0x14   :  { %p225_p8 = scmp.ne.s32.totalorder %s387_s2, %s224_s14  ;;  %p228_p9 = scmp.lt.u32.totalorder %s224_s14, %s387_s2 }
  0x16   :  { %p230_p10 = pnand %p228_p9, %p225_p8 }
  0x18   :  { %233 = shalt.err (!%p230_p10)
}
  0x19   :  { %s234_s19 = scalar_lea.vmem %s24_s24, 16  ;;  %s238_s20 = scalar_lea.vmem %s24_s24, 32 }
  0x1a   :  { %p235_p11 = scmp.ne.s32.totalorder %s24_s24, %s234_s19  ;;  %p239_p12 = scmp.lt.s32.totalorder %s24_s24, %s24_s24 }
  0x1b   :  { %p240_p13 = scmp.lt.s32.totalorder %s238_s20, %s234_s19 }
  0x1d   :  { %p241_p0 = por %p240_p13, %p239_p12 }
  0x1f   :  { %p242_p1 = pnand %p241_p0, %p235_p11 }
  0x21   :  { %245 = shalt.err (!%p242_p1)
}
  0x22   :  { %26 = dma.hbm_to_vmem [thread:$0]  %s387_s2, 16, %s24_s24, [#allocation3]  }
  0x23   :  { %s274_s22 = smov [#allocation6]   ;;  %s246_s27 = scalar_lea.hbm %s390_s5, 16 }
  0x24   :  { %s45_s23 = sshll.u32 %s274_s22, 4  ;;  %p247_p2 = scmp.ne.s32.totalorder %s390_s5, %s246_s27  ;;  %s46_s23 = int_to_ptr.vmem [resolvable:$true] %s45_s23 }
  0x25   :  { %p250_p3 = scmp.lt.u32.totalorder %s246_s27, %s390_s5 }
  0x27   :  { %p252_p4 = pnand %p250_p3, %p247_p2 }
  0x29   :  { %255 = shalt.err (!%p252_p4)
}
  0x2a   :  { %s256_s8 = scalar_lea.vmem %s46_s23, 16  ;;  %s260_s2 = scalar_lea.vmem %s46_s23, 32 }
  0x2b   :  { %p257_p5 = scmp.ne.s32.totalorder %s46_s23, %s256_s8  ;;  %p261_p6 = scmp.lt.s32.totalorder %s46_s23, %s46_s23 }
  0x2c   :  { %p262_p7 = scmp.lt.s32.totalorder %s260_s2, %s256_s8 }
  0x2e   :  { %p263_p8 = por %p262_p7, %p261_p6 }
  0x30   :  { %p264_p9 = pnand %p263_p8, %p257_p5 }
  0x32   :  { %267 = shalt.err (!%p264_p9)
}
  0x33   :  { %48 = dma.hbm_to_vmem [thread:$0]  %s390_s5, 16, %s46_s23, [#allocation5]  }
  0x34   :  { %268 = dma.done.wait [#allocation3], 16  }
  0x35   :  { %269 = vsyncadd [#allocation3], 4294967280 }
  0x36   :  { %270 = dma.done.wait [#allocation5], 32  }
  0x37   :  { %271 = vsyncadd [#allocation5], 4294967264  ;;  %v275_v0 = vmov 0.0   ;;  %vm276_vm0 = vmmov 0   ;;  %v62_v1 = vld [vmem:[%s386_s1] sm:$0xff]  ;;  %v63_v2 = vld [vmem:[%s386_s1 + $0x8] sm:$0xff] }
  0x38   :  { %185 = vmatprep.subr.bf16.mxu0 %v275_v0  ;;  %189 = vmatprep.mubr.msk.bf16.mxu0 %vm276_vm0, %v275_v0  ;;  %v64_v3 = vld [vmem:[%s386_s1 + $0x10] sm:$0xff]  ;;  %v66_v4 = vpack.c.bf16 %v63_v2, %v62_v1  ;;  %v65_v5 = vld [vmem:[%s386_s1 + $0x18] sm:$0xff]  ;;  %v59_v7 = vld [vmem:[%s385_s0] sm:$0xff]  ;;  %vm75_vm1 = vcmask 261120   ;;  %vm127_vm2 = vcmask 257024  }
  0x39   :  { %v67_v6 = vpack.c.bf16 %v65_v5, %v64_v3  ;;  %v60_v8 = vld [vmem:[%s385_s0 + $0x8] sm:$0xf]  ;;  %v178_v10 = vld [vmem:[#allocation2] ss:$0 sm:$0xff]  ;;  %v180_v40 = vld [vmem:[#allocation4] ss:$0 sm:$0xff] }
  0x3a   :  { %186 = vmatpush3.bf16.msra.mxu0 %v66_v4  ;;  %v61_v9 = vpack.c.bf16 %v60_v8, %v59_v7  ;;  %v120_v12 = vld [vmem:[%s388_s3] sm:$0xff]  ;;  %v121_v16 = vld [vmem:[%s388_s3 + $0x8] sm:$0xf] }
  0x3b   :  { %187 = vmatprep.subr.bf16.mxu0 %v275_v0  ;;  %v181_v42 = vld [vmem:[#allocation6] ss:$0 sm:$0xff] }
  0x3e   :  { %188 = vmatpush3.bf16.msra.mxu0 %v67_v6 }
  0x41   :  { %190 = vmatmul.mubr.msk.bf16.vlgmr.msra.gmra.mrb[0].mxu0 %vm75_vm1, %v61_v9 }
 0x114   :  { %v113_v11 = vpop.f32.mrb[0].mxu0 }
 0x115   :  { %v114_v13 = vadd.f32 %v178_v10, %v113_v11  ;;  %v191_v14 = vpop.f32.mrb[1].mxu0 }
 0x116   :  { %v116_v15 = vpop.f32.mrb[2].mxu0 }
 0x117   :  { %v117_v17 = vadd.f32 %v178_v10, %v116_v15  ;;  %v192_v18 = vpop.f32.mrb[3].mxu0  ;;  %v122_v19 = vadd.f32 %v120_v12, %v114_v13 }
 0x119   :  { %v124_v20 = vsel %vm75_vm1, %v122_v19, 0.0  ;;  %v123_v21 = vadd.f32 %v121_v16, %v117_v17 }
 0x11a   :  { %125 = vadd.xlane.f32.xlu0 %v124_v20 }
 0x11b   :  { %v128_v22 = vsel %vm127_vm2, %v123_v21, 0.0 }
 0x11e   :  { %129 = vadd.xlane.f32.xlu0 %v128_v22 }
 0x1a7   :  { %v126_v23 = vpop.xlane.xlu0 %125 }
 0x1a8   :  { %v132_v24 = vmul.f32 0.03125, %v126_v23 }
 0x1aa   :  { %v134_v25 = vsub.f32 %v122_v19, %v132_v24 }
 0x1ab   :  { %v130_v26 = vpop.xlane.xlu0 %129 }
 0x1ac   :  { %v133_v27 = vmul.f32 0.03125, %v130_v26  ;;  %v136_v28 = vmul.f32 %v134_v25, %v134_v25 }
 0x1ae   :  { %v135_v29 = vsub.f32 %v123_v21, %v133_v27  ;;  %v138_v30 = vsel %vm75_vm1, %v136_v28, 0.0 }
 0x1af   :  { %139 = vadd.xlane.f32.xlu1 %v138_v30 }
 0x1b0   :  { %v137_v31 = vmul.f32 %v135_v29, %v135_v29 }
 0x1b2   :  { %v141_v32 = vsel %vm127_vm2, %v137_v31, 0.0 }
 0x1b3   :  { %142 = vadd.xlane.f32.xlu1 %v141_v32 }
 0x23c   :  { %v140_v33 = vpop.xlane.xlu1 %139 }
 0x23d   :  { %v144_v34 = vmul.f32 0.03125, %v140_v33 }
 0x23f   :  { %v146_v35 = vadd.f32 1e-05, %v144_v34 }
 0x240   :  { %v143_v36 = vpop.xlane.xlu1 %142 }
 0x241   :  { %198 = vrsqrt.f32 %v146_v35  ;;  %v145_v37 = vmul.f32 0.03125, %v143_v36 }
 0x243   :  { %v147_v38 = vadd.f32 1e-05, %v145_v37 }
 0x245   :  { %200 = vrsqrt.f32 %v147_v38 }
 0x24b   :  { %v199_v39 = vpop.eup %198 }
 0x24c   :  { %v150_v41 = vmul.f32 %v199_v39, %v134_v25 }
 0x24e   :  { %v159_v43 = vmul.f32 %v180_v40, %v150_v41 }
 0x24f   :  { %v201_v44 = vpop.eup %200 }
 0x250   :  { %v168_v45 = vadd.f32 %v181_v42, %v159_v43  ;;  %v151_v46 = vmul.f32 %v201_v44, %v135_v29 }
 0x252   :  { %170 = vst.msk [vmem:[%s391_s6] sm:$0xff] %vm75_vm1, %v168_v45  ;;  %v160_v47 = vmul.f32 %v180_v40, %v151_v46 }
 0x254   :  { %v169_v48 = vadd.f32 %v181_v42, %v160_v47 }
 0x256   :  { %171 = vst.msk [vmem:[%s391_s6 + $0x8] sm:$0xf] %vm127_vm2, %v169_v48 }
 0x257   :  { %176 = vsyncpa [#allocation3], 1 }
 0x258   :  { %177 = vsyncpa [#allocation5], 1 }

// kernel: onset_transformer_forward.23
= control target key start
LH: loop header
LB: loop body
LE: loop exit
PB: predicated region body
PF: predicated region fallthrough
CT: control target
= control target key end

     0   :  { %s623_s12 = smov 0   ;;  %s672_s0 = inlined_call_operand.vmem [shape: f32[2,6,32], index: 0, kind: input, shape index: {}]   ;;  %s673_s1 = inlined_call_operand.vmem [shape: f32[2,6,32], index: 1, kind: input, shape index: {}]   ;;  %s674_s2 = inlined_call_operand.vmem [shape: f32[2,6,32], index: 2, kind: input, shape index: {}]   ;;  %s675_s3 = inlined_call_operand.vmem [shape: f32[2,6,32], index: 3, kind: output, shape index: {}]  }
   0x1 LB: > { %s522_s13 = sadd.s32 4294967295, %s596_s12   ;;  %p526_p0 = scmp.ge.s32.totalorder %s596_s12, 1  ;;  %s596_s12 = sphi %s623_s12, %s13_s12  }
   0x2   : > { %p154_p1 = scmp.lt.s32.totalorder %s596_s12, 3 }
   0x4   : > { %p155_p2 = pnand %p526_p0, %p154_p1 }
   0x5   : > { %p184_p3 = scmp.lt.s32.totalorder (!%p155_p2), %s522_s13, 1  ;;  %v598_v0 = vmov (!%p155_p2), 0.0   ;;  %vm599_vm0 = vmmov (!%p155_p2), 0   ;;  %vm213_vm1 = vcmask (!%p155_p2), 130048   ;;  %v204_v6 = vlaneseq (!%p155_p2)  ;;  %s601_s21 = smov (!%p155_p2), 112  }
   0x6   : > { %158 = sbr.rel (%p155_p2) target bundleno = 1428 (0x594), region = 32  ;;  %545 = vmatprep.subr.bf16.mxu0 (!%p155_p2), %v598_v0  ;;  %547 = vmatprep.mubr.msk.bf16.mxu0 (!%p155_p2), %vm599_vm0, %v598_v0  ;;  %v600_v10 = vmov (!%p155_p2), -1e+30   ;;  %vm262_vm3 = vcmask (!%p155_p2), 46080   ;;  %vm279_vm4 = vcmask (!%p155_p2), 1042432   ;;  %vm275_vm5 = vcmask (!%p155_p2), 48128  }
   0x7   : > { %551 = vmatprep.subr.bf16.mxu1 (!%p155_p2), %v598_v0  ;;  %553 = vmatprep.mubr.msk.bf16.mxu1 (!%p155_p2), %vm599_vm0, %v598_v0  ;;  %v205_v7 = vshrl.u32 (!%p155_p2), %v204_v6, 7  ;;  %v207_v8 = vand.u32 (!%p155_p2), 127, %v204_v6  ;;  %s602_s25 = smov (!%p155_p2), 16   ;;  %vm443_vm6 = vcmask (!%p155_p2), 259072  }
   0x9   : > { %vm208_vm2 = vcmp.ge.s32.totalorder (!%p155_p2), %v205_v7, %v207_v8 }
   0xa   : > { %v209_v11 = vsel (!%p155_p2), %vm208_vm2, 0.0, %v600_v10 }
   0xd   : > { %s677_s13 = smov (!%p184_p3, %s522_s13), 1 }
   0xe   : > { %s633_s14 = sshll.u32 %s677_s13, 3 }
   0xf   : > { %s191_s17 = scalar_lea.vmem %s673_s1, %s633_s14  ;;  %s187_s20 = scalar_lea.vmem %s672_s0, %s633_s14 }
  0x10   : > { %v202_v1 = vld [vmem:[%s191_s17] sm:$0x3f]  ;;  %s195_s24 = scalar_lea.vmem %s674_s2, %s633_s14  ;;  %s199_s28 = scalar_lea.vmem %s675_s3, %s633_s14 }
  0x11   : > { %v211_v2 = vpack.c.bf16 %v202_v1, %v202_v1  ;;  %v201_v4 = vld [vmem:[%s187_s20] sm:$0x3f] }
  0x12   : > { %v210_v5 = vpack.c.bf16 %v201_v4, %v201_v4  ;;  %v203_v23 = vld [vmem:[%s195_s24] sm:$0x3f] }
  0x13   : > { %v218_v3 = vsel %vm213_vm1, %v211_v2, 0  ;;  %327 = vrot.lane.b32.xlu1 %v211_v2, %s601_s21  ;;  %v212_v24 = vpack.c.bf16 %v203_v23, %v203_v23 }
  0x14   : > { %546 = vmatpush3.bf16.xpose.msra.mxu0 %v218_v3 }
  0x15   : > { %563 = vmatprep.subr.bf16.mxu0 %v598_v0  ;;  %v281_v25 = vsel %vm279_vm4, %v212_v24, 0 }
  0x16   : > { %552 = vmatpush3.bf16.msra.mxu1 %v281_v25 }
  0x17   : > { %324 = vrot.lane.b32.xlu1 %v210_v5, %s601_s21  ;;  %557 = vmatprep.subr.bf16.mxu1 %v598_v0 }
  0x1b   : > { %548 = vmatmul.mubr.msk.bf16.vlgmr.msra.gmra.mrb[0].mxu0 %vm213_vm1, %v210_v5 }
  0x1c   : > { %565 = vmatprep.mubr.msk.bf16.mxu0 %vm599_vm0, %v598_v0 }
  0x85   : > { %v328_v28 = vpop.permute.xlu1 %327 }
  0x86   : > { %v333_v30 = vsel %vm213_vm1, %v328_v28, 0 }
  0x89   : > { %v325_v32 = vpop.permute.xlu1 %324 }
  0xee   : > { %v254_v9 = vpop.f32.mrb[0].mxu0 }
  0xef   : > { %v260_v12 = vmul.f32 0.25, %v254_v9  ;;  %v549_v13 = vpop.f32.mrb[1].mxu0 }
  0xf0   : > { %v257_v14 = vpop.f32.mrb[2].mxu0 }
  0xf1   : > { %v550_v15 = vpop.f32.mrb[3].mxu0  ;;  %v261_v16 = vadd.f32 %v260_v12, %v209_v11 }
  0xf3   : > { %v263_v17 = vsel %vm262_vm3, %v261_v16, -inf }
  0xf4   : > { %264 = vmax.xlane.f32.xlu0 %v263_v17 }
 0x181   : > { %v265_v18 = vpop.xlane.xlu0 %264 }
 0x182   : > { %v266_v19 = vsub.f32 %v261_v16, %v265_v18 }
 0x184   : > { %v267_v20 = vmul.f32 1.442695, %v266_v19 }
 0x186   : > { %582 = vpow2.f32 %v267_v20 }
 0x190   : > { %v583_v21 = vpop.eup %582 }
 0x191   : > { %v269_v22 = vsel %vm262_vm3, %v583_v21, 0.0 }
 0x192   : > { %270 = vadd.xlane.f32.xlu0 %v269_v22 }
 0x21f   : > { %v271_v26 = vpop.xlane.xlu0 %270 }
 0x220   : > { %584 = vrcp.f32 %v271_v26 }
 0x22a   : > { %v585_v27 = vpop.eup %584 }
 0x22b   : > { %v273_v29 = vmul.f32 %v585_v27, %v583_v21 }
 0x22d   : > { %v274_v31 = vpack.c.bf16 %v273_v29, %v273_v29 }
 0x22f   : > { %554 = vmatmul.mubr.msk.bf16.vlgmr.msra.gmra.mrb[0].mxu1 %vm275_vm5, %v274_v31 }
 0x230   : > { %558 = vmatpush3.bf16.xpose.msra.mxu1 %v333_v30  ;;  %559 = vmatprep.mubr.msk.bf16.mxu1 %vm599_vm0, %v598_v0 }
 0x237   : > { %560 = vmatmul.mubr.msk.bf16.vlgmr.msra.gmra.mrb[4].mxu1 %vm213_vm1, %v325_v32 }
 0x302   : > { %v317_v33 = vpop.f32.mrb[0].mxu1 }
 0x303   : > { %v555_v34 = vpop.f32.mrb[1].mxu1 }
 0x304   : > { %v320_v35 = vpop.f32.mrb[2].mxu1 }
 0x305   : > { %v556_v36 = vpop.f32.mrb[3].mxu1 }
 0x30a   : > { %v369_v37 = vpop.f32.mrb[4].mxu1 }
 0x30b   : > { %v375_v38 = vmul.f32 0.25, %v369_v37  ;;  %v561_v39 = vpop.f32.mrb[5].mxu1 }
 0x30c   : > { %v372_v40 = vpop.f32.mrb[6].mxu1 }
 0x30d   : > { %v562_v41 = vpop.f32.mrb[7].mxu1  ;;  %v376_v42 = vadd.f32 %v375_v38, %v209_v11 }
 0x30f   : > { %v377_v43 = vsel %vm262_vm3, %v376_v42, -inf }
 0x310   : > { %378 = vmax.xlane.f32.xlu0 %v377_v43 }
 0x326   : > { %390 = vrot.lane.b32.xlu0 %v212_v24, %s601_s21 }
 0x39d   : > { %v379_v44 = vpop.xlane.xlu0 %378 }
 0x39e   : > { %v380_v45 = vsub.f32 %v376_v42, %v379_v44 }
 0x3a0   : > { %v381_v46 = vmul.f32 1.442695, %v380_v45 }
 0x3a1   : > { %v391_v49 = vpop.permute.xlu0 %390 }
 0x3a2   : > { %586 = vpow2.f32 %v381_v46  ;;  %v396_v50 = vsel %vm279_vm4, %v391_v49, 0 }
 0x3a3   : > { %564 = vmatpush3.bf16.msra.mxu0 %v396_v50 }
 0x3ac   : > { %v587_v47 = vpop.eup %586 }
 0x3ad   : > { %v383_v48 = vsel %vm262_vm3, %v587_v47, 0.0 }
 0x3ae   : > { %384 = vadd.xlane.f32.xlu1 %v383_v48 }
 0x43b   : > { %v385_v51 = vpop.xlane.xlu1 %384 }
 0x43c   : > { %588 = vrcp.f32 %v385_v51 }
 0x446   : > { %v589_v52 = vpop.eup %588 }
 0x447   : > { %v387_v53 = vmul.f32 %v589_v52, %v587_v47 }
 0x449   : > { %v388_v54 = vpack.c.bf16 %v387_v53, %v387_v53 }
 0x44b   : > { %566 = vmatmul.mubr.msk.bf16.vlgmr.msra.gmra.mrb[4].mxu0 %vm275_vm5, %v388_v54 }
 0x51e   : > { %v432_v55 = vpop.f32.mrb[4].mxu0 }
 0x51f   : > { %439 = vrot.lane.b32.xlu0 %v432_v55, %s602_s25  ;;  %v567_v56 = vpop.f32.mrb[5].mxu0 }
 0x520   : > { %v435_v57 = vpop.f32.mrb[6].mxu0 }
 0x521   : > { %v568_v58 = vpop.f32.mrb[7].mxu0 }
 0x591   : > { %v440_v59 = vpop.permute.xlu0 %439 }
 0x592   : > { %v442_v60 = vsel %vm213_vm1, %v317_v33, %v440_v59 }
 0x593   : > { %444 = vst.msk [vmem:[%s199_s28] sm:$0x3f] %vm443_vm6, %v442_v60 }
 0x594 PF: > { %s13_s12 = sadd.s32 1, %s596_s12  }
 0x595   : > { %p10_p4 = scmp.ge.s32.totalorder %s13_s12, 4  }
 0x597   :  { %12 = sbr.rel (!%p10_p4) target bundleno = 1 (0x1), region = 68 }

// kernel: onset_transformer_forward.22
= control target key start
LH: loop header
LB: loop body
LE: loop exit
PB: predicated region body
PF: predicated region fallthrough
CT: control target
= control target key end

     0   :  { %8 = vsyncpa [#allocation3], 0  ;;  %s241_s0 = inlined_call_operand.vmem [shape: f32[12,32], index: 0, kind: input, shape index: {}]   ;;  %s242_s1 = inlined_call_operand.hbm [shape: f32[32,96], index: 1, kind: input, shape index: {}]   ;;  %s243_s2 = inlined_call_operand.hbm [shape: f32[1,96], index: 2, kind: input, shape index: {}]   ;;  %s244_s3 = inlined_call_operand.vmem [shape: f32[12,96], index: 3, kind: output, shape index: {}]  }
   0x1   :  { %9 = vsyncpa [#allocation5], 0  ;;  %s179_s12 = smov [#allocation2]   ;;  %s131_s16 = scalar_lea.hbm %s242_s1, 512 }
   0x2   :  { %s17_s13 = sshll.u32 %s179_s12, 4  ;;  %p132_p0 = scmp.ne.s32.totalorder %s242_s1, %s131_s16  ;;  %s18_s13 = int_to_ptr.vmem [resolvable:$true] %s17_s13 }
   0x3   :  { %p135_p1 = scmp.lt.u32.totalorder %s131_s16, %s242_s1 }
   0x5   :  { %p137_p2 = pnand %p135_p1, %p132_p0 }
   0x7   :  { %140 = shalt.err (!%p137_p2)
}
   0x8   :  { %s141_s21 = scalar_lea.vmem %s18_s13, 512  ;;  %p146_p4 = scmp.lt.s32.totalorder %s18_s13, %s18_s13 }
   0x9   :  { %p142_p3 = scmp.ne.s32.totalorder %s18_s13, %s141_s21  ;;  %p147_p5 = scmp.lt.s32.totalorder %s141_s21, %s141_s21 }
   0xb   :  { %p148_p6 = por %p147_p5, %p146_p4 }
   0xd   :  { %p149_p7 = pnand %p148_p6, %p142_p3 }
   0xf   :  { %152 = shalt.err (!%p149_p7)
}
  0x10   :  { %s180_s22 = smov 128   ;;  %s181_s23 = smov 8  }
  0x11   :  { %23 = dma.hbm_to_vmem [thread:$0]  %s242_s1, 512, %s18_s13, [#allocation3], %s180_s22, %s180_s22, %s181_s23  }
  0x12   :  { %s182_s26 = smov [#allocation4]   ;;  %s153_s30 = scalar_lea.hbm %s243_s2, 16 }
  0x13   :  { %s30_s27 = sshll.u32 %s182_s26, 4  ;;  %p154_p8 = scmp.ne.s32.totalorder %s243_s2, %s153_s30  ;;  %s31_s27 = int_to_ptr.vmem [resolvable:$true] %s30_s27 }
  0x14   :  { %p157_p9 = scmp.lt.u32.totalorder %s153_s30, %s243_s2 }
  0x16   :  { %p159_p10 = pnand %p157_p9, %p154_p8 }
  0x18   :  { %162 = shalt.err (!%p159_p10)
}
  0x19   :  { %s163_s8 = scalar_lea.vmem %s31_s27, 16  ;;  %s167_s1 = scalar_lea.vmem %s31_s27, 32 }
  0x1a   :  { %p164_p11 = scmp.ne.s32.totalorder %s31_s27, %s163_s8  ;;  %p168_p12 = scmp.lt.s32.totalorder %s31_s27, %s31_s27 }
  0x1b   :  { %p169_p13 = scmp.lt.s32.totalorder %s167_s1, %s163_s8 }
  0x1d   :  { %p170_p0 = por %p169_p13, %p168_p12 }
  0x1f   :  { %p171_p1 = pnand %p170_p0, %p164_p11 }
  0x21   :  { %174 = shalt.err (!%p171_p1)
}
  0x22   :  { %33 = dma.hbm_to_vmem [thread:$0]  %s243_s2, 16, %s31_s27, [#allocation5]  }
  0x23   :  { %175 = dma.done.wait [#allocation3], 512  }
  0x24   :  { %176 = vsyncadd [#allocation3], 4294966784 }
  0x25   :  { %177 = dma.done.wait [#allocation5], 16  }
  0x26   :  { %178 = vsyncadd [#allocation5], 4294967280  ;;  %v183_v0 = vmov 0.0   ;;  %vm184_vm0 = vmmov 0   ;;  %v44_v1 = vld [vmem:[#allocation2] sm:$0xff]  ;;  %v45_v2 = vld [vmem:[#allocation2 + $0x8] sm:$0xff] }
  0x27   :  { %117 = vmatprep.subr.bf16.mxu0 %v183_v0  ;;  %121 = vmatprep.mubr.msk.bf16.mxu0 %vm184_vm0, %v183_v0  ;;  %v46_v3 = vld [vmem:[#allocation2 + $0x10] sm:$0xff]  ;;  %v48_v4 = vpack.c.bf16 %v45_v2, %v44_v1  ;;  %v47_v5 = vld [vmem:[#allocation2 + $0x18] sm:$0xff]  ;;  %v41_v7 = vld [vmem:[%s241_s0] sm:$0xff]  ;;  %vm57_vm1 = vcmask 261120   ;;  %vm102_vm2 = vcmask 785408   ;;  %vm104_vm3 = vcmask 781312  }
  0x28   :  { %v49_v6 = vpack.c.bf16 %v47_v5, %v46_v3  ;;  %v42_v8 = vld [vmem:[%s241_s0 + $0x8] sm:$0xf]  ;;  %v112_v10 = vld [vmem:[#allocation4] ss:$0 sm:$0xff] }
  0x29   :  { %118 = vmatpush3.bf16.msra.mxu0 %v48_v4  ;;  %v43_v9 = vpack.c.bf16 %v42_v8, %v41_v7 }
  0x2a   :  { %119 = vmatprep.subr.bf16.mxu0 %v183_v0 }
  0x2d   :  { %120 = vmatpush3.bf16.msra.mxu0 %v49_v6 }
  0x30   :  { %122 = vmatmul.mubr.msk.bf16.vlgmr.msra.gmra.mrb[0].mxu0 %vm57_vm1, %v43_v9 }
 0x103   :  { %v95_v11 = vpop.f32.mrb[0].mxu0 }
 0x104   :  { %v96_v12 = vadd.f32 %v112_v10, %v95_v11  ;;  %v123_v13 = vpop.f32.mrb[1].mxu0 }
 0x105   :  { %v98_v14 = vpop.f32.mrb[2].mxu0 }
 0x106   :  { %103 = vst.msk [vmem:[%s244_s3] sm:$0xff] %vm102_vm2, %v96_v12  ;;  %v99_v15 = vadd.f32 %v112_v10, %v98_v14  ;;  %v124_v16 = vpop.f32.mrb[3].mxu0 }
 0x108   :  { %105 = vst.msk [vmem:[%s244_s3 + $0x8] sm:$0xf] %vm104_vm3, %v99_v15 }
 0x109   :  { %110 = vsyncpa [#allocation3], 1 }
 0x10a   :  { %111 = vsyncpa [#allocation5], 1 }

// kernel: onset_transformer_forward.25
= control target key start
LH: loop header
LB: loop body
LE: loop exit
PB: predicated region body
PF: predicated region fallthrough
CT: control target
= control target key end

     0   :  { %v98_v0 = vmov 0.0   ;;  %vm99_vm0 = vmmov 0   ;;  %vm31_vm1 = vcmask 261120   ;;  %vm77_vm2 = vcmask 257024   ;;  %s147_s1 = inlined_call_operand.vmem [shape: f32[32,32], index: 1, kind: input, shape index: {}]   ;;  %s148_s0 = inlined_call_operand.vmem [shape: f32[12,32], index: 0, kind: input, shape index: {}]   ;;  %s149_s2 = inlined_call_operand.vmem [shape: f32[1,32], index: 2, kind: input, shape index: {}]   ;;  %s150_s3 = inlined_call_operand.vmem [shape: f32[12,32], index: 3, kind: output, shape index: {}]  }
   0x1   :  { %88 = vmatprep.subr.bf16.mxu0 %v98_v0  ;;  %v18_v1 = vld [vmem:[%s147_s1] sm:$0xff]  ;;  %v19_v2 = vld [vmem:[%s147_s1 + $0x8] sm:$0xff]  ;;  %v20_v3 = vld [vmem:[%s147_s1 + $0x10] sm:$0xff]  ;;  %92 = vmatprep.mubr.msk.bf16.mxu0 %vm99_vm0, %v98_v0 }
   0x2   :  { %v22_v4 = vpack.c.bf16 %v19_v2, %v18_v1  ;;  %v21_v5 = vld [vmem:[%s147_s1 + $0x18] sm:$0xff]  ;;  %v15_v7 = vld [vmem:[%s148_s0] sm:$0xff]  ;;  %v16_v8 = vld [vmem:[%s148_s0 + $0x8] sm:$0xf] }
   0x3   :  { %v23_v6 = vpack.c.bf16 %v21_v5, %v20_v3  ;;  %v17_v9 = vpack.c.bf16 %v16_v8, %v15_v7  ;;  %v83_v10 = vld [vmem:[%s149_s2] ss:$0 sm:$0xff] }
   0x4   :  { %89 = vmatpush3.bf16.msra.mxu0 %v22_v4 }
   0x5   :  { %90 = vmatprep.subr.bf16.mxu0 %v98_v0 }
   0x8   :  { %91 = vmatpush3.bf16.msra.mxu0 %v23_v6 }
   0xb   :  { %93 = vmatmul.mubr.msk.bf16.vlgmr.msra.gmra.mrb[0].mxu0 %vm31_vm1, %v17_v9 }
  0xde   :  { %v69_v11 = vpop.f32.mrb[0].mxu0 }
  0xdf   :  { %v70_v12 = vadd.f32 %v83_v10, %v69_v11  ;;  %v94_v13 = vpop.f32.mrb[1].mxu0 }
  0xe0   :  { %v72_v14 = vpop.f32.mrb[2].mxu0 }
  0xe1   :  { %76 = vst.msk [vmem:[%s150_s3] sm:$0xff] %vm31_vm1, %v70_v12  ;;  %v73_v15 = vadd.f32 %v83_v10, %v72_v14  ;;  %v95_v16 = vpop.f32.mrb[3].mxu0 }
  0xe3   :  { %78 = vst.msk [vmem:[%s150_s3 + $0x8] sm:$0xf] %vm77_vm2, %v73_v15 }

// kernel: onset_transformer_forward.17
= control target key start
LH: loop header
LB: loop body
LE: loop exit
PB: predicated region body
PF: predicated region fallthrough
CT: control target
= control target key end

     0   :  { %v98_v0 = vmov 0.0   ;;  %vm99_vm0 = vmmov 0   ;;  %vm31_vm1 = vcmask 261120   ;;  %vm76_vm2 = vcmask 785408   ;;  %s147_s1 = inlined_call_operand.vmem [shape: f32[32,96], index: 1, kind: input, shape index: {}]   ;;  %s148_s0 = inlined_call_operand.vmem [shape: f32[16,32], index: 0, kind: input, shape index: {}]   ;;  %s149_s2 = inlined_call_operand.vmem [shape: f32[1,96], index: 2, kind: input, shape index: {}]   ;;  %s150_s3 = inlined_call_operand.vmem [shape: f32[16,96], index: 3, kind: output, shape index: {}]  }
   0x1   :  { %88 = vmatprep.subr.bf16.mxu0 %v98_v0  ;;  %v18_v1 = vld [vmem:[%s147_s1] sm:$0xff]  ;;  %v19_v2 = vld [vmem:[%s147_s1 + $0x8] sm:$0xff]  ;;  %v20_v3 = vld [vmem:[%s147_s1 + $0x10] sm:$0xff]  ;;  %92 = vmatprep.mubr.msk.bf16.mxu0 %vm99_vm0, %v98_v0 }
   0x2   :  { %v22_v4 = vpack.c.bf16 %v19_v2, %v18_v1  ;;  %v21_v5 = vld [vmem:[%s147_s1 + $0x18] sm:$0xff]  ;;  %v15_v7 = vld [vmem:[%s148_s0] sm:$0xff]  ;;  %v16_v8 = vld [vmem:[%s148_s0 + $0x8] sm:$0xff] }
   0x3   :  { %v23_v6 = vpack.c.bf16 %v21_v5, %v20_v3  ;;  %v17_v9 = vpack.c.bf16 %v16_v8, %v15_v7  ;;  %v83_v10 = vld [vmem:[%s149_s2] ss:$0 sm:$0xff] }
   0x4   :  { %89 = vmatpush3.bf16.msra.mxu0 %v22_v4 }
   0x5   :  { %90 = vmatprep.subr.bf16.mxu0 %v98_v0 }
   0x8   :  { %91 = vmatpush3.bf16.msra.mxu0 %v23_v6 }
   0xb   :  { %93 = vmatmul.mubr.msk.bf16.vlgmr.msra.gmra.mrb[0].mxu0 %vm31_vm1, %v17_v9 }
  0xde   :  { %v69_v11 = vpop.f32.mrb[0].mxu0 }
  0xdf   :  { %v70_v12 = vadd.f32 %v83_v10, %v69_v11  ;;  %v94_v13 = vpop.f32.mrb[1].mxu0 }
  0xe0   :  { %v72_v14 = vpop.f32.mrb[2].mxu0 }
  0xe1   :  { %77 = vst.msk [vmem:[%s150_s3] sm:$0xff] %vm76_vm2, %v70_v12  ;;  %v73_v15 = vadd.f32 %v83_v10, %v72_v14  ;;  %v95_v16 = vpop.f32.mrb[3].mxu0 }
  0xe3   :  { %78 = vst.msk [vmem:[%s150_s3 + $0x8] sm:$0xff] %vm76_vm2, %v73_v15 }

// kernel: onset_transformer_forward.16
= control target key start
LH: loop header
LB: loop body
LE: loop exit
PB: predicated region body
PF: predicated region fallthrough
CT: control target
= control target key end

     0   :  { %vm1364_vm0 = vcmask 261120   ;;  %s3231_s1 = inlined_call_operand.vmem [shape: f32[3584,32], index: 1, kind: input, shape index: {}]   ;;  %s3232_s0 = inlined_call_operand.vmem [shape: f32[16,3584], index: 0, kind: input, shape index: {}]   ;;  %s3233_s2 = inlined_call_operand.vmem [shape: f32[1,32], index: 2, kind: input, shape index: {}]   ;;  %s3234_s3 = inlined_call_operand.vmem [shape: f32[16,32], index: 3, kind: output, shape index: {}]  }
   0x1   :  { %v115_v0 = vld [vmem:[%s3231_s1 + $0x80] sm:$0xff]  ;;  %v116_v1 = vld [vmem:[%s3231_s1 + $0x88] sm:$0xff]  ;;  %v117_v11 = vld [vmem:[%s3231_s1 + $0x90] sm:$0xff] }
   0x2   :  { %v147_v2 = vld [vmem:[%s3231_s1 + $0x180] sm:$0xff]  ;;  %v555_v3 = vpack.c.bf16 %v116_v1, %v115_v0  ;;  %v148_v4 = vld [vmem:[%s3231_s1 + $0x188] sm:$0xff]  ;;  %v118_v13 = vld [vmem:[%s3231_s1 + $0x98] sm:$0xff] }
   0x3   :  { %v99_v5 = vld [vmem:[%s3231_s1] sm:$0xff]  ;;  %v100_v6 = vld [vmem:[%s3231_s1 + $0x8] sm:$0xff]  ;;  %v571_v7 = vpack.c.bf16 %v148_v4, %v147_v2  ;;  %v149_v14 = vld [vmem:[%s3231_s1 + $0x190] sm:$0xff]  ;;  %v556_v16 = vpack.c.bf16 %v118_v13, %v117_v11 }
   0x4   :  { %v547_v8 = vpack.c.bf16 %v100_v6, %v99_v5  ;;  %v131_v9 = vld [vmem:[%s3231_s1 + $0x100] sm:$0xff]  ;;  %v132_v10 = vld [vmem:[%s3231_s1 + $0x108] sm:$0xff]  ;;  %1374 = vmatprep.subr.bf16.mxu0 %v555_v3  ;;  %v150_v15 = vld [vmem:[%s3231_s1 + $0x198] sm:$0xff] }
   0x5   :  { %v563_v12 = vpack.c.bf16 %v132_v10, %v131_v9  ;;  %1396 = vmatprep.subr.bf16.mxu1 %v571_v7  ;;  %v572_v17 = vpack.c.bf16 %v150_v15, %v149_v14  ;;  %v101_v18 = vld [vmem:[%s3231_s1 + $0x10] sm:$0xff]  ;;  %v102_v19 = vld [vmem:[%s3231_s1 + $0x18] sm:$0xff]  ;;  %v119_v23 = vld [vmem:[%s3231_s1 + $0xa0] sm:$0xff] }
   0x6   :  { %1375 = vmatpush3.bf16.msra.mxu0 %v547_v8  ;;  %v133_v20 = vld [vmem:[%s3231_s1 + $0x110] sm:$0xff]  ;;  %v548_v21 = vpack.c.bf16 %v102_v19, %v101_v18  ;;  %v134_v22 = vld [vmem:[%s3231_s1 + $0x118] sm:$0xff]  ;;  %v120_v24 = vld [vmem:[%s3231_s1 + $0xa8] sm:$0xff] }
   0x7   :  { %1397 = vmatpush3.bf16.msra.mxu1 %v563_v12  ;;  %1376 = vmatprep.subr.bf16.mxu0 %v556_v16  ;;  %v564_v25 = vpack.c.bf16 %v134_v22, %v133_v20  ;;  %v557_v26 = vpack.c.bf16 %v120_v24, %v119_v23  ;;  %v151_v27 = vld [vmem:[%s3231_s1 + $0x1a0] sm:$0xff]  ;;  %v152_v28 = vld [vmem:[%s3231_s1 + $0x1a8] sm:$0xff]  ;;  %v121_v35 = vld [vmem:[%s3231_s1 + $0xb0] sm:$0xff] }
   0x8   :  { %1398 = vmatprep.subr.bf16.mxu1 %v572_v17  ;;  %v103_v29 = vld [vmem:[%s3231_s1 + $0x20] sm:$0xff]  ;;  %v573_v30 = vpack.c.bf16 %v152_v28, %v151_v27  ;;  %v104_v31 = vld [vmem:[%s3231_s1 + $0x28] sm:$0xff]  ;;  %v122_v36 = vld [vmem:[%s3231_s1 + $0xb8] sm:$0xff] }
   0x9   :  { %v135_v32 = vld [vmem:[%s3231_s1 + $0x120] sm:$0xff]  ;;  %v136_v33 = vld [vmem:[%s3231_s1 + $0x128] sm:$0xff]  ;;  %v549_v34 = vpack.c.bf16 %v104_v31, %v103_v29  ;;  %v153_v37 = vld [vmem:[%s3231_s1 + $0x1b0] sm:$0xff]  ;;  %v558_v39 = vpack.c.bf16 %v122_v36, %v121_v35 }
   0xa   :  { %1377 = vmatpush3.bf16.msra.mxu0 %v548_v21  ;;  %v565_v38 = vpack.c.bf16 %v136_v33, %v135_v32  ;;  %v154_v40 = vld [vmem:[%s3231_s1 + $0x1b8] sm:$0xff]  ;;  %v105_v41 = vld [vmem:[%s3231_s1 + $0x30] sm:$0xff]  ;;  %v123_v46 = vld [vmem:[%s3231_s1 + $0xc0] sm:$0xff] }
   0xb   :  { %1399 = vmatpush3.bf16.msra.mxu1 %v564_v25  ;;  %1378 = vmatprep.subr.bf16.mxu0 %v557_v26  ;;  %v106_v42 = vld [vmem:[%s3231_s1 + $0x38] sm:$0xff]  ;;  %v574_v43 = vpack.c.bf16 %v154_v40, %v153_v37  ;;  %v137_v44 = vld [vmem:[%s3231_s1 + $0x130] sm:$0xff]  ;;  %v124_v47 = vld [vmem:[%s3231_s1 + $0xc8] sm:$0xff] }
   0xc   :  { %1400 = vmatprep.subr.bf16.mxu1 %v573_v30  ;;  %v138_v45 = vld [vmem:[%s3231_s1 + $0x138] sm:$0xff]  ;;  %v155_v48 = vld [vmem:[%s3231_s1 + $0x1c0] sm:$0xff]  ;;  %v156_v49 = vld [vmem:[%s3231_s1 + $0x1c8] sm:$0xff]  ;;  %v550_v50 = vpack.c.bf16 %v106_v42, %v105_v41  ;;  %v559_v52 = vpack.c.bf16 %v124_v47, %v123_v46 }
   0xd   :  { %v566_v51 = vpack.c.bf16 %v138_v45, %v137_v44  ;;  %v107_v53 = vld [vmem:[%s3231_s1 + $0x40] sm:$0xff]  ;;  %v108_v54 = vld [vmem:[%s3231_s1 + $0x48] sm:$0xff]  ;;  %v575_v56 = vpack.c.bf16 %v156_v49, %v155_v48  ;;  %v125_v58 = vld [vmem:[%s3231_s1 + $0xd0] sm:$0xff] }
   0xe   :  { %1379 = vmatpush3.bf16.msra.mxu0 %v549_v34  ;;  %v139_v55 = vld [vmem:[%s3231_s1 + $0x140] sm:$0xff]  ;;  %v140_v57 = vld [vmem:[%s3231_s1 + $0x148] sm:$0xff]  ;;  %v126_v59 = vld [vmem:[%s3231_s1 + $0xd8] sm:$0xff]  ;;  %v551_v62 = vpack.c.bf16 %v108_v54, %v107_v53 }
   0xf   :  { %1401 = vmatpush3.bf16.msra.mxu1 %v565_v38  ;;  %1380 = vmatprep.subr.bf16.mxu0 %v558_v39  ;;  %v157_v60 = vld [vmem:[%s3231_s1 + $0x1d0] sm:$0xff]  ;;  %v158_v61 = vld [vmem:[%s3231_s1 + $0x1d8] sm:$0xff]  ;;  %v567_v63 = vpack.c.bf16 %v140_v57, %v139_v55  ;;  %v560_v0 = vpack.c.bf16 %v126_v59, %v125_v58  ;;  %v127_v6 = vld [vmem:[%s3231_s1 + $0xe0] sm:$0xff] }
  0x10   :  { %1402 = vmatprep.subr.bf16.mxu1 %v574_v43  ;;  %v109_v1 = vld [vmem:[%s3231_s1 + $0x50] sm:$0xff]  ;;  %v110_v2 = vld [vmem:[%s3231_s1 + $0x58] sm:$0xff]  ;;  %v576_v4 = vpack.c.bf16 %v158_v61, %v157_v60  ;;  %v128_v7 = vld [vmem:[%s3231_s1 + $0xe8] sm:$0xff] }
  0x11   :  { %v141_v3 = vld [vmem:[%s3231_s1 + $0x150] sm:$0xff]  ;;  %v142_v5 = vld [vmem:[%s3231_s1 + $0x158] sm:$0xff]  ;;  %v159_v8 = vld [vmem:[%s3231_s1 + $0x1e0] sm:$0xff]  ;;  %v552_v11 = vpack.c.bf16 %v110_v2, %v109_v1  ;;  %v561_v16 = vpack.c.bf16 %v128_v7, %v127_v6 }
  0x12   :  { %1381 = vmatpush3.bf16.msra.mxu0 %v550_v50  ;;  %v160_v9 = vld [vmem:[%s3231_s1 + $0x1e8] sm:$0xff]  ;;  %v111_v10 = vld [vmem:[%s3231_s1 + $0x60] sm:$0xff]  ;;  %v568_v15 = vpack.c.bf16 %v142_v5, %v141_v3  ;;  %v129_v17 = vld [vmem:[%s3231_s1 + $0xf0] sm:$0xff] }
  0x13   :  { %1403 = vmatpush3.bf16.msra.mxu1 %v566_v51  ;;  %1382 = vmatprep.subr.bf16.mxu0 %v559_v52  ;;  %v112_v12 = vld [vmem:[%s3231_s1 + $0x68] sm:$0xff]  ;;  %v143_v13 = vld [vmem:[%s3231_s1 + $0x160] sm:$0xff]  ;;  %v577_v20 = vpack.c.bf16 %v160_v9, %v159_v8  ;;  %v130_v21 = vld [vmem:[%s3231_s1 + $0xf8] sm:$0xff] }
  0x14   :  { %1404 = vmatprep.subr.bf16.mxu1 %v575_v56  ;;  %v144_v14 = vld [vmem:[%s3231_s1 + $0x168] sm:$0xff]  ;;  %v18_v23 = vld [vmem:[%s3232_s0 + $0x18] sm:$0xff]  ;;  %v161_v25 = vld [vmem:[%s3231_s1 + $0x1f0] sm:$0xff]  ;;  %v553_v28 = vpack.c.bf16 %v112_v12, %v111_v10  ;;  %v562_v30 = vpack.c.bf16 %v130_v21, %v129_v17 }
  0x15   :  { %v16_v18 = vld [vmem:[%s3232_s0 + $0x8] sm:$0xff]  ;;  %v46_v24 = vld [vmem:[%s3232_s0 + $0xf8] sm:$0xff]  ;;  %v569_v29 = vpack.c.bf16 %v144_v14, %v143_v13  ;;  %v113_v31 = vld [vmem:[%s3231_s1 + $0x70] sm:$0xff] }
  0x16   :  { %1383 = vmatpush3.bf16.msra.mxu0 %v551_v62  ;;  %v44_v19 = vld [vmem:[%s3232_s0 + $0xe8] sm:$0xff]  ;;  %v162_v26 = vld [vmem:[%s3231_s1 + $0x1f8] sm:$0xff]  ;;  %v74_v27 = vpack.c.bf16 %v46_v24, %v18_v23  ;;  %v145_v33 = vld [vmem:[%s3231_s1 + $0x170] sm:$0xff] }
  0x17   :  { %1405 = vmatpush3.bf16.msra.mxu1 %v567_v63  ;;  %1384 = vmatprep.subr.bf16.mxu0 %v560_v0  ;;  %v72_v22 = vpack.c.bf16 %v44_v19, %v16_v18  ;;  %v114_v32 = vld [vmem:[%s3231_s1 + $0x78] sm:$0xff]  ;;  %v578_v34 = vpack.c.bf16 %v162_v26, %v161_v25  ;;  %v179_v36 = vld [vmem:[%s3231_s1 + $0x280] sm:$0xff]  ;;  %v180_v37 = vld [vmem:[%s3231_s1 + $0x288] sm:$0xff] }
  0x18   :  { %1406 = vmatprep.subr.bf16.mxu1 %v576_v4  ;;  %v146_v35 = vld [vmem:[%s3231_s1 + $0x178] sm:$0xff]  ;;  %851 = vmatprep.mubr.bf16.mxu1 %v74_v27  ;;  %v15_v38 = vld [vmem:[%s3232_s0] sm:$0xff]  ;;  %v212_v40 = vld [vmem:[%s3231_s1 + $0x388] sm:$0xff]  ;;  %v554_v41 = vpack.c.bf16 %v114_v32, %v113_v31  ;;  %v587_v46 = vpack.c.bf16 %v180_v37, %v179_v36 }
  0x19   :  { %810 = vmatprep.mubr.bf16.mxu0 %v72_v22  ;;  %v211_v39 = vld [vmem:[%s3231_s1 + $0x380] sm:$0xff]  ;;  %v17_v43 = vld [vmem:[%s3232_s0 + $0x10] sm:$0xff]  ;;  %v570_v45 = vpack.c.bf16 %v146_v35, %v145_v33  ;;  %v164_v48 = vld [vmem:[%s3231_s1 + $0x208] sm:$0xff] }
  0x1a   :  { %1385 = vmatpush3.bf16.msra.mxu0 %v552_v11  ;;  %v43_v42 = vld [vmem:[%s3232_s0 + $0xe0] sm:$0xff]  ;;  %v45_v44 = vld [vmem:[%s3232_s0 + $0xf0] sm:$0xff]  ;;  %v603_v50 = vpack.c.bf16 %v212_v40, %v211_v39  ;;  %v196_v51 = vld [vmem:[%s3231_s1 + $0x308] sm:$0xff] }
  0x1b   :  { %1407 = vmatpush3.bf16.msra.mxu1 %v568_v15  ;;  %1386 = vmatprep.subr.bf16.mxu0 %v561_v16  ;;  %v163_v47 = vld [vmem:[%s3231_s1 + $0x200] sm:$0xff]  ;;  %v181_v52 = vld [vmem:[%s3231_s1 + $0x290] sm:$0xff]  ;;  %v182_v53 = vld [vmem:[%s3231_s1 + $0x298] sm:$0xff]  ;;  %v71_v54 = vpack.c.bf16 %v43_v42, %v15_v38  ;;  %v73_v57 = vpack.c.bf16 %v45_v44, %v17_v43 }
  0x1c   :  { %1408 = vmatprep.subr.bf16.mxu1 %v577_v20  ;;  %v195_v49 = vld [vmem:[%s3231_s1 + $0x300] sm:$0xff]  ;;  %v213_v55 = vld [vmem:[%s3231_s1 + $0x390] sm:$0xff]  ;;  %v214_v56 = vld [vmem:[%s3231_s1 + $0x398] sm:$0xff]  ;;  %v579_v58 = vpack.c.bf16 %v164_v48, %v163_v47  ;;  %v588_v60 = vpack.c.bf16 %v182_v53, %v181_v52 }
  0x1d   :  { %v595_v59 = vpack.c.bf16 %v196_v51, %v195_v49  ;;  %v165_v61 = vld [vmem:[%s3231_s1 + $0x210] sm:$0xff]  ;;  %v166_v62 = vld [vmem:[%s3231_s1 + $0x218] sm:$0xff]  ;;  %v604_v0 = vpack.c.bf16 %v214_v56, %v213_v55  ;;  %v183_v2 = vld [vmem:[%s3231_s1 + $0x2a0] sm:$0xff] }
  0x1e   :  { %1387 = vmatpush3.bf16.msra.mxu0 %v553_v28  ;;  %v197_v63 = vld [vmem:[%s3231_s1 + $0x310] sm:$0xff]  ;;  %v198_v1 = vld [vmem:[%s3231_s1 + $0x318] sm:$0xff]  ;;  %v184_v3 = vld [vmem:[%s3231_s1 + $0x2a8] sm:$0xff]  ;;  %v580_v6 = vpack.c.bf16 %v166_v62, %v165_v61 }
  0x1f   :  { %1409 = vmatpush3.bf16.msra.mxu1 %v569_v29  ;;  %1388 = vmatprep.subr.bf16.mxu0 %v562_v30  ;;  %v215_v4 = vld [vmem:[%s3231_s1 + $0x3a0] sm:$0xff]  ;;  %v216_v5 = vld [vmem:[%s3231_s1 + $0x3a8] sm:$0xff]  ;;  %v596_v7 = vpack.c.bf16 %v198_v1, %v197_v63  ;;  %v589_v8 = vpack.c.bf16 %v184_v3, %v183_v2  ;;  %v185_v14 = vld [vmem:[%s3231_s1 + $0x2b0] sm:$0xff] }
  0x20   :  { %1410 = vmatprep.subr.bf16.mxu1 %v578_v34  ;;  %v167_v9 = vld [vmem:[%s3231_s1 + $0x220] sm:$0xff]  ;;  %v168_v10 = vld [vmem:[%s3231_s1 + $0x228] sm:$0xff]  ;;  %v605_v12 = vpack.c.bf16 %v216_v5, %v215_v4  ;;  %v186_v15 = vld [vmem:[%s3231_s1 + $0x2b8] sm:$0xff] }
  0x21   :  { %v199_v11 = vld [vmem:[%s3231_s1 + $0x320] sm:$0xff]  ;;  %v200_v13 = vld [vmem:[%s3231_s1 + $0x328] sm:$0xff]  ;;  %v217_v16 = vld [vmem:[%s3231_s1 + $0x3b0] sm:$0xff]  ;;  %v581_v18 = vpack.c.bf16 %v168_v10, %v167_v9  ;;  %v590_v20 = vpack.c.bf16 %v186_v15, %v185_v14 }
  0x22   :  { %1389 = vmatpush3.bf16.msra.mxu0 %v554_v41  ;;  %v218_v17 = vld [vmem:[%s3231_s1 + $0x3b8] sm:$0xff]  ;;  %v597_v19 = vpack.c.bf16 %v200_v13, %v199_v11  ;;  %v169_v21 = vld [vmem:[%s3231_s1 + $0x230] sm:$0xff]  ;;  %v187_v26 = vld [vmem:[%s3231_s1 + $0x2c0] sm:$0xff] }
  0x23   :  { %1411 = vmatpush3.bf16.msra.mxu1 %v570_v45  ;;  %1418 = vmatprep.subr.bf16.mxu0 %v587_v46  ;;  %v170_v22 = vld [vmem:[%s3231_s1 + $0x238] sm:$0xff]  ;;  %v201_v23 = vld [vmem:[%s3231_s1 + $0x330] sm:$0xff]  ;;  %v606_v24 = vpack.c.bf16 %v218_v17, %v217_v16  ;;  %v188_v27 = vld [vmem:[%s3231_s1 + $0x2c8] sm:$0xff] }
  0x24   :  { %1440 = vmatprep.subr.bf16.mxu1 %v603_v50  ;;  %v202_v25 = vld [vmem:[%s3231_s1 + $0x338] sm:$0xff]  ;;  %v219_v28 = vld [vmem:[%s3231_s1 + $0x3c0] sm:$0xff]  ;;  %v220_v29 = vld [vmem:[%s3231_s1 + $0x3c8] sm:$0xff]  ;;  %v582_v31 = vpack.c.bf16 %v170_v22, %v169_v21  ;;  %v591_v36 = vpack.c.bf16 %v188_v27, %v187_v26 }
  0x25   :  { %811 = vmatmul.mubr.bf16.vlgmr.msra.gmra.mrb[0].mxu0 %v71_v54  ;;  %v171_v30 = vld [vmem:[%s3231_s1 + $0x240] sm:$0xff]  ;;  %v172_v32 = vld [vmem:[%s3231_s1 + $0x248] sm:$0xff]  ;;  %v598_v35 = vpack.c.bf16 %v202_v25, %v201_v23  ;;  %v189_v37 = vld [vmem:[%s3231_s1 + $0x2d0] sm:$0xff]  ;;  %v607_v40 = vpack.c.bf16 %v220_v29, %v219_v28 }
  0x26   :  { %852 = vmatmul.mubr.bf16.vlgmr.msra.gmra.mrb[0].mxu1 %v73_v57  ;;  %1419 = vmatpush3.bf16.msra.mxu0 %v579_v58  ;;  %v203_v33 = vld [vmem:[%s3231_s1 + $0x340] sm:$0xff]  ;;  %v204_v34 = vld [vmem:[%s3231_s1 + $0x348] sm:$0xff]  ;;  %v190_v41 = vld [vmem:[%s3231_s1 + $0x2d8] sm:$0xff]  ;;  %v583_v48 = vpack.c.bf16 %v172_v32, %v171_v30 }
  0x27   :  { %1441 = vmatpush3.bf16.msra.mxu1 %v595_v59  ;;  %1420 = vmatprep.subr.bf16.mxu0 %v588_v60  ;;  %v20_v38 = vld [vmem:[%s3232_s0 + $0x28] sm:$0xff]  ;;  %v22_v43 = vld [vmem:[%s3232_s0 + $0x38] sm:$0xff]  ;;  %v221_v45 = vld [vmem:[%s3231_s1 + $0x3d0] sm:$0xff]  ;;  %v599_v49 = vpack.c.bf16 %v204_v34, %v203_v33  ;;  %v592_v50 = vpack.c.bf16 %v190_v41, %v189_v37 }
  0x28   :  { %1442 = vmatprep.subr.bf16.mxu1 %v604_v0  ;;  %v48_v39 = vld [vmem:[%s3232_s0 + $0x108] sm:$0xff]  ;;  %v50_v44 = vld [vmem:[%s3232_s0 + $0x118] sm:$0xff]  ;;  %v173_v51 = vld [vmem:[%s3231_s1 + $0x250] sm:$0xff] }
  0x29   :  { %v76_v42 = vpack.c.bf16 %v48_v39, %v20_v38  ;;  %v222_v46 = vld [vmem:[%s3231_s1 + $0x3d8] sm:$0xff]  ;;  %v78_v47 = vpack.c.bf16 %v50_v44, %v22_v43  ;;  %v205_v53 = vld [vmem:[%s3231_s1 + $0x350] sm:$0xff]  ;;  %v191_v56 = vld [vmem:[%s3231_s1 + $0x2e0] sm:$0xff] }
  0x2a   :  { %1421 = vmatpush3.bf16.msra.mxu0 %v580_v6  ;;  %v174_v52 = vld [vmem:[%s3231_s1 + $0x258] sm:$0xff]  ;;  %v608_v54 = vpack.c.bf16 %v222_v46, %v221_v45  ;;  %v192_v57 = vld [vmem:[%s3231_s1 + $0x2e8] sm:$0xff]  ;;  %v223_v58 = vld [vmem:[%s3231_s1 + $0x3e0] sm:$0xff] }
  0x2b   :  { %1443 = vmatpush3.bf16.msra.mxu1 %v596_v7  ;;  %1422 = vmatprep.subr.bf16.mxu0 %v589_v8  ;;  %v206_v55 = vld [vmem:[%s3231_s1 + $0x358] sm:$0xff]  ;;  %v224_v59 = vld [vmem:[%s3231_s1 + $0x3e8] sm:$0xff]  ;;  %v584_v60 = vpack.c.bf16 %v174_v52, %v173_v51  ;;  %v593_v62 = vpack.c.bf16 %v192_v57, %v191_v56  ;;  %v175_v63 = vld [vmem:[%s3231_s1 + $0x260] sm:$0xff] }
  0x2c   :  { %1444 = vmatprep.subr.bf16.mxu1 %v605_v12  ;;  %892 = vmatprep.mubr.bf16.mxu0 %v76_v42  ;;  %v600_v61 = vpack.c.bf16 %v206_v55, %v205_v53  ;;  %v176_v0 = vld [vmem:[%s3231_s1 + $0x268] sm:$0xff]  ;;  %v207_v1 = vld [vmem:[%s3231_s1 + $0x360] sm:$0xff]  ;;  %v609_v2 = vpack.c.bf16 %v224_v59, %v223_v58  ;;  %v193_v4 = vld [vmem:[%s3231_s1 + $0x2f0] sm:$0xff] }
  0x2d   :  { %933 = vmatprep.mubr.bf16.mxu1 %v78_v47  ;;  %v208_v3 = vld [vmem:[%s3231_s1 + $0x368] sm:$0xff]  ;;  %v194_v5 = vld [vmem:[%s3231_s1 + $0x2f8] sm:$0xff]  ;;  %v225_v6 = vld [vmem:[%s3231_s1 + $0x3f0] sm:$0xff]  ;;  %v585_v8 = vpack.c.bf16 %v176_v0, %v175_v63 }
  0x2e   :  { %1423 = vmatpush3.bf16.msra.mxu0 %v581_v18  ;;  %v226_v7 = vld [vmem:[%s3231_s1 + $0x3f8] sm:$0xff]  ;;  %v601_v9 = vpack.c.bf16 %v208_v3, %v207_v1  ;;  %v594_v10 = vpack.c.bf16 %v194_v5, %v193_v4  ;;  %v177_v11 = vld [vmem:[%s3231_s1 + $0x270] sm:$0xff]  ;;  %v243_v16 = vld [vmem:[%s3231_s1 + $0x480] sm:$0xff] }
  0x2f   :  { %1445 = vmatpush3.bf16.msra.mxu1 %v597_v19  ;;  %1424 = vmatprep.subr.bf16.mxu0 %v590_v20  ;;  %v178_v12 = vld [vmem:[%s3231_s1 + $0x278] sm:$0xff]  ;;  %v209_v13 = vld [vmem:[%s3231_s1 + $0x370] sm:$0xff]  ;;  %v610_v14 = vpack.c.bf16 %v226_v7, %v225_v6  ;;  %v244_v17 = vld [vmem:[%s3231_s1 + $0x488] sm:$0xff] }
  0x30   :  { %1446 = vmatprep.subr.bf16.mxu1 %v606_v24  ;;  %v210_v15 = vld [vmem:[%s3231_s1 + $0x378] sm:$0xff]  ;;  %v19_v18 = vld [vmem:[%s3232_s0 + $0x20] sm:$0xff]  ;;  %v276_v20 = vld [vmem:[%s3231_s1 + $0x588] sm:$0xff]  ;;  %v586_v21 = vpack.c.bf16 %v178_v12, %v177_v11  ;;  %v619_v26 = vpack.c.bf16 %v244_v17, %v243_v16 }
  0x31   :  { %v275_v19 = vld [vmem:[%s3231_s1 + $0x580] sm:$0xff]  ;;  %v21_v23 = vld [vmem:[%s3232_s0 + $0x30] sm:$0xff]  ;;  %v602_v25 = vpack.c.bf16 %v210_v15, %v209_v13  ;;  %v228_v28 = vld [vmem:[%s3231_s1 + $0x408] sm:$0xff] }
  0x32   :  { %1425 = vmatpush3.bf16.msra.mxu0 %v582_v31  ;;  %v47_v22 = vld [vmem:[%s3232_s0 + $0x100] sm:$0xff]  ;;  %v49_v24 = vld [vmem:[%s3232_s0 + $0x110] sm:$0xff]  ;;  %v635_v30 = vpack.c.bf16 %v276_v20, %v275_v19  ;;  %v260_v31 = vld [vmem:[%s3231_s1 + $0x508] sm:$0xff] }
  0x33   :  { %1447 = vmatpush3.bf16.msra.mxu1 %v598_v35  ;;  %1426 = vmatprep.subr.bf16.mxu0 %v591_v36  ;;  %v227_v27 = vld [vmem:[%s3231_s1 + $0x400] sm:$0xff]  ;;  %v245_v32 = vld [vmem:[%s3231_s1 + $0x490] sm:$0xff]  ;;  %v246_v33 = vld [vmem:[%s3231_s1 + $0x498] sm:$0xff]  ;;  %v75_v34 = vpack.c.bf16 %v47_v22, %v19_v18  ;;  %v77_v37 = vpack.c.bf16 %v49_v24, %v21_v23 }
  0x34   :  { %1448 = vmatprep.subr.bf16.mxu1 %v607_v40  ;;  %v259_v29 = vld [vmem:[%s3231_s1 + $0x500] sm:$0xff]  ;;  %v277_v35 = vld [vmem:[%s3231_s1 + $0x590] sm:$0xff]  ;;  %v278_v36 = vld [vmem:[%s3231_s1 + $0x598] sm:$0xff]  ;;  %v611_v38 = vpack.c.bf16 %v228_v28, %v227_v27  ;;  %v620_v40 = vpack.c.bf16 %v246_v33, %v245_v32 }
  0x35   :  { %v627_v39 = vpack.c.bf16 %v260_v31, %v259_v29  ;;  %v229_v41 = vld [vmem:[%s3231_s1 + $0x410] sm:$0xff]  ;;  %v230_v42 = vld [vmem:[%s3231_s1 + $0x418] sm:$0xff]  ;;  %v636_v44 = vpack.c.bf16 %v278_v36, %v277_v35  ;;  %v247_v46 = vld [vmem:[%s3231_s1 + $0x4a0] sm:$0xff] }
  0x36   :  { %1427 = vmatpush3.bf16.msra.mxu0 %v583_v48  ;;  %v261_v43 = vld [vmem:[%s3231_s1 + $0x510] sm:$0xff]  ;;  %v262_v45 = vld [vmem:[%s3231_s1 + $0x518] sm:$0xff]  ;;  %v248_v47 = vld [vmem:[%s3231_s1 + $0x4a8] sm:$0xff]  ;;  %v612_v51 = vpack.c.bf16 %v230_v42, %v229_v41 }
  0x37   :  { %1449 = vmatpush3.bf16.msra.mxu1 %v599_v49  ;;  %1428 = vmatprep.subr.bf16.mxu0 %v592_v50  ;;  %v279_v48 = vld [vmem:[%s3231_s1 + $0x5a0] sm:$0xff]  ;;  %v280_v49 = vld [vmem:[%s3231_s1 + $0x5a8] sm:$0xff]  ;;  %v628_v55 = vpack.c.bf16 %v262_v45, %v261_v43  ;;  %v621_v56 = vpack.c.bf16 %v248_v47, %v247_v46  ;;  %v249_v57 = vld [vmem:[%s3231_s1 + $0x4b0] sm:$0xff] }
  0x38   :  { %1450 = vmatprep.subr.bf16.mxu1 %v608_v54  ;;  %v231_v50 = vld [vmem:[%s3231_s1 + $0x420] sm:$0xff]  ;;  %v232_v52 = vld [vmem:[%s3231_s1 + $0x428] sm:$0xff]  ;;  %v26_v63 = vld [vmem:[%s3232_s0 + $0x58] sm:$0xff] }
  0x39   :  { %v263_v53 = vld [vmem:[%s3231_s1 + $0x520] sm:$0xff]  ;;  %v264_v54 = vld [vmem:[%s3231_s1 + $0x528] sm:$0xff]  ;;  %v54_v0 = vld [vmem:[%s3232_s0 + $0x138] sm:$0xff]  ;;  %v613_v4 = vpack.c.bf16 %v232_v52, %v231_v50 }
  0x3a   :  { %1429 = vmatpush3.bf16.msra.mxu0 %v584_v60  ;;  %v24_v58 = vld [vmem:[%s3232_s0 + $0x48] sm:$0xff]  ;;  %v637_v60 = vpack.c.bf16 %v280_v49, %v279_v48  ;;  %v281_v1 = vld [vmem:[%s3231_s1 + $0x5b0] sm:$0xff]  ;;  %v82_v3 = vpack.c.bf16 %v54_v0, %v26_v63  ;;  %v629_v5 = vpack.c.bf16 %v264_v54, %v263_v53  ;;  %v266_v11 = vld [vmem:[%s3231_s1 + $0x538] sm:$0xff] }
  0x3b   :  { %1451 = vmatpush3.bf16.msra.mxu1 %v600_v61  ;;  %1430 = vmatprep.subr.bf16.mxu0 %v593_v62  ;;  %v52_v59 = vld [vmem:[%s3232_s0 + $0x128] sm:$0xff]  ;;  %v250_v61 = vld [vmem:[%s3231_s1 + $0x4b8] sm:$0xff]  ;;  %v233_v7 = vld [vmem:[%s3231_s1 + $0x430] sm:$0xff] }
  0x3c   :  { %1452 = vmatprep.subr.bf16.mxu1 %v609_v2  ;;  %v80_v62 = vpack.c.bf16 %v52_v59, %v24_v58  ;;  %v282_v2 = vld [vmem:[%s3231_s1 + $0x5b8] sm:$0xff]  ;;  %v622_v6 = vpack.c.bf16 %v250_v61, %v249_v57  ;;  %v251_v12 = vld [vmem:[%s3231_s1 + $0x4c0] sm:$0xff]  ;;  %v252_v13 = vld [vmem:[%s3231_s1 + $0x4c8] sm:$0xff] }
  0x3d   :  { %v284_v15 = vld [vmem:[%s3231_s1 + $0x5c8] sm:$0xff]  ;;  %v623_v18 = vpack.c.bf16 %v252_v13, %v251_v12  ;;  %v235_v19 = vld [vmem:[%s3231_s1 + $0x440] sm:$0xff]  ;;  %v253_v24 = vld [vmem:[%s3231_s1 + $0x4d0] sm:$0xff] }
  0x3e   :  { %1431 = vmatpush3.bf16.msra.mxu0 %v585_v8  ;;  %v234_v8 = vld [vmem:[%s3231_s1 + $0x438] sm:$0xff]  ;;  %v236_v20 = vld [vmem:[%s3231_s1 + $0x448] sm:$0xff]  ;;  %v237_v31 = vld [vmem:[%s3231_s1 + $0x450] sm:$0xff] }
  0x3f   :  { %1453 = vmatpush3.bf16.msra.mxu1 %v601_v9  ;;  %1432 = vmatprep.subr.bf16.mxu0 %v594_v10  ;;  %v265_v9 = vld [vmem:[%s3231_s1 + $0x530] sm:$0xff]  ;;  %v638_v10 = vpack.c.bf16 %v282_v2, %v281_v1  ;;  %v614_v16 = vpack.c.bf16 %v234_v8, %v233_v7  ;;  %v268_v23 = vld [vmem:[%s3231_s1 + $0x548] sm:$0xff]  ;;  %v286_v27 = vld [vmem:[%s3231_s1 + $0x5d8] sm:$0xff]  ;;  %v615_v28 = vpack.c.bf16 %v236_v20, %v235_v19 }
  0x40   :  { %1454 = vmatprep.subr.bf16.mxu1 %v610_v14  ;;  %v283_v14 = vld [vmem:[%s3231_s1 + $0x5c0] sm:$0xff]  ;;  %v630_v17 = vpack.c.bf16 %v266_v11, %v265_v9  ;;  %v238_v32 = vld [vmem:[%s3231_s1 + $0x458] sm:$0xff]  ;;  %v269_v33 = vld [vmem:[%s3231_s1 + $0x550] sm:$0xff] }
  0x41   :  { %v639_v22 = vpack.c.bf16 %v284_v15, %v283_v14  ;;  %v270_v35 = vld [vmem:[%s3231_s1 + $0x558] sm:$0xff]  ;;  %v255_v36 = vld [vmem:[%s3231_s1 + $0x4e0] sm:$0xff]  ;;  %v272_v47 = vld [vmem:[%s3231_s1 + $0x568] sm:$0xff] }
  0x42   :  { %1433 = vmatpush3.bf16.msra.mxu0 %v586_v21  ;;  %v267_v21 = vld [vmem:[%s3231_s1 + $0x540] sm:$0xff]  ;;  %v632_v41 = vpack.c.bf16 %v270_v35, %v269_v33  ;;  %v257_v48 = vld [vmem:[%s3231_s1 + $0x4f0] sm:$0xff]  ;;  %v258_v49 = vld [vmem:[%s3231_s1 + $0x4f8] sm:$0xff] }
  0x43   :  { %1455 = vmatpush3.bf16.msra.mxu1 %v602_v25  ;;  %1462 = vmatprep.subr.bf16.mxu0 %v619_v26  ;;  %v254_v25 = vld [vmem:[%s3231_s1 + $0x4d8] sm:$0xff]  ;;  %v285_v26 = vld [vmem:[%s3231_s1 + $0x5d0] sm:$0xff]  ;;  %v631_v29 = vpack.c.bf16 %v268_v23, %v267_v21  ;;  %v239_v43 = vld [vmem:[%s3231_s1 + $0x460] sm:$0xff] }
  0x44   :  { %1484 = vmatprep.subr.bf16.mxu1 %v635_v30  ;;  %v624_v30 = vpack.c.bf16 %v254_v25, %v253_v24  ;;  %v271_v45 = vld [vmem:[%s3231_s1 + $0x560] sm:$0xff]  ;;  %v289_v50 = vld [vmem:[%s3231_s1 + $0x5f0] sm:$0xff]  ;;  %v274_v58 = vld [vmem:[%s3231_s1 + $0x578] sm:$0xff] }
  0x45   :  { %893 = vmatmul.mubr.bf16.vlgmr.msra.gmra.mrb[4].mxu0 %v75_v34  ;;  %v640_v34 = vpack.c.bf16 %v286_v27, %v285_v26  ;;  %v241_v53 = vld [vmem:[%s3231_s1 + $0x470] sm:$0xff]  ;;  %v633_v54 = vpack.c.bf16 %v272_v47, %v271_v45  ;;  %v307_v61 = vld [vmem:[%s3231_s1 + $0x680] sm:$0xff]  ;;  %v340_v1 = vld [vmem:[%s3231_s1 + $0x788] sm:$0xff] }
  0x46   :  { %934 = vmatmul.mubr.bf16.vlgmr.msra.gmra.mrb[4].mxu1 %v77_v37  ;;  %1463 = vmatpush3.bf16.msra.mxu0 %v611_v38  ;;  %v256_v37 = vld [vmem:[%s3231_s1 + $0x4e8] sm:$0xff]  ;;  %v287_v38 = vld [vmem:[%s3231_s1 + $0x5e0] sm:$0xff]  ;;  %v273_v57 = vld [vmem:[%s3231_s1 + $0x570] sm:$0xff] }
  0x47   :  { %1485 = vmatpush3.bf16.msra.mxu1 %v627_v39  ;;  %1464 = vmatprep.subr.bf16.mxu0 %v620_v40  ;;  %v288_v39 = vld [vmem:[%s3231_s1 + $0x5e8] sm:$0xff]  ;;  %v616_v40 = vpack.c.bf16 %v238_v32, %v237_v31  ;;  %v625_v42 = vpack.c.bf16 %v256_v37, %v255_v36  ;;  %v51_v63 = vld [vmem:[%s3232_s0 + $0x120] sm:$0xff]  ;;  %v309_v12 = vld [vmem:[%s3231_s1 + $0x690] sm:$0xff] }
  0x48   :  { %1486 = vmatprep.subr.bf16.mxu1 %v636_v44  ;;  %974 = vmatprep.mubr.bf16.mxu0 %v80_v62  ;;  %v240_v44 = vld [vmem:[%s3231_s1 + $0x468] sm:$0xff]  ;;  %v641_v46 = vpack.c.bf16 %v288_v39, %v287_v38  ;;  %v339_v0 = vld [vmem:[%s3231_s1 + $0x780] sm:$0xff]  ;;  %v310_v13 = vld [vmem:[%s3231_s1 + $0x698] sm:$0xff] }
  0x49   :  { %1015 = vmatprep.mubr.bf16.mxu1 %v82_v3  ;;  %v617_v52 = vpack.c.bf16 %v240_v44, %v239_v43  ;;  %v308_v62 = vld [vmem:[%s3231_s1 + $0x688] sm:$0xff]  ;;  %v25_v3 = vld [vmem:[%s3232_s0 + $0x50] sm:$0xff]  ;;  %v323_v9 = vld [vmem:[%s3231_s1 + $0x700] sm:$0xff]  ;;  %v667_v11 = vpack.c.bf16 %v340_v1, %v339_v0  ;;  %v652_v24 = vpack.c.bf16 %v310_v13, %v309_v12 }
  0x4a   :  { %1465 = vmatpush3.bf16.msra.mxu0 %v612_v51  ;;  %v290_v51 = vld [vmem:[%s3231_s1 + $0x5f8] sm:$0xff]  ;;  %v651_v7 = vpack.c.bf16 %v308_v62, %v307_v61  ;;  %v292_v8 = vld [vmem:[%s3231_s1 + $0x608] sm:$0xff]  ;;  %v341_v14 = vld [vmem:[%s3231_s1 + $0x790] sm:$0xff] }
  0x4b   :  { %1487 = vmatpush3.bf16.msra.mxu1 %v628_v55  ;;  %1466 = vmatprep.subr.bf16.mxu0 %v621_v56  ;;  %v626_v55 = vpack.c.bf16 %v258_v49, %v257_v48  ;;  %v242_v56 = vld [vmem:[%s3231_s1 + $0x478] sm:$0xff]  ;;  %v642_v59 = vpack.c.bf16 %v290_v51, %v289_v50  ;;  %v293_v25 = vld [vmem:[%s3231_s1 + $0x610] sm:$0xff]  ;;  %v312_v31 = vld [vmem:[%s3231_s1 + $0x6a8] sm:$0xff] }
  0x4c   :  { %1488 = vmatprep.subr.bf16.mxu1 %v637_v60  ;;  %v23_v60 = vld [vmem:[%s3232_s0 + $0x40] sm:$0xff]  ;;  %v618_v2 = vpack.c.bf16 %v242_v56, %v241_v53  ;;  %v30_v21 = vld [vmem:[%s3232_s0 + $0x78] sm:$0xff]  ;;  %v325_v27 = vld [vmem:[%s3231_s1 + $0x710] sm:$0xff] }
  0x4d   :  { %v79_v15 = vpack.c.bf16 %v51_v63, %v23_v60  ;;  %v294_v26 = vld [vmem:[%s3231_s1 + $0x618] sm:$0xff]  ;;  %v343_v33 = vld [vmem:[%s3231_s1 + $0x7a0] sm:$0xff]  ;;  %v328_v43 = vld [vmem:[%s3231_s1 + $0x728] sm:$0xff] }
  0x4e   :  { %1467 = vmatpush3.bf16.msra.mxu0 %v613_v4  ;;  %v53_v4 = vld [vmem:[%s3232_s0 + $0x130] sm:$0xff]  ;;  %v644_v36 = vpack.c.bf16 %v294_v26, %v293_v25  ;;  %v295_v39 = vld [vmem:[%s3231_s1 + $0x620] sm:$0xff]  ;;  %v314_v45 = vld [vmem:[%s3231_s1 + $0x6b8] sm:$0xff] }
  0x4f   :  { %1489 = vmatpush3.bf16.msra.mxu1 %v629_v5  ;;  %1468 = vmatprep.subr.bf16.mxu0 %v622_v6  ;;  %v291_v5 = vld [vmem:[%s3231_s1 + $0x600] sm:$0xff]  ;;  %v634_v6 = vpack.c.bf16 %v274_v58, %v273_v57  ;;  %v81_v19 = vpack.c.bf16 %v53_v4, %v25_v3  ;;  %v313_v44 = vld [vmem:[%s3231_s1 + $0x6b0] sm:$0xff]  ;;  %v346_v47 = vld [vmem:[%s3231_s1 + $0x7b8] sm:$0xff] }
  0x50   :  { %1490 = vmatprep.subr.bf16.mxu1 %v638_v10  ;;  %v324_v10 = vld [vmem:[%s3231_s1 + $0x708] sm:$0xff]  ;;  %v643_v20 = vpack.c.bf16 %v292_v8, %v291_v5  ;;  %v654_v50 = vpack.c.bf16 %v314_v45, %v313_v44  ;;  %v297_v51 = vld [vmem:[%s3231_s1 + $0x630] sm:$0xff]  ;;  %v315_v56 = vld [vmem:[%s3231_s1 + $0x6c0] sm:$0xff] }
  0x51   :  { %v659_v23 = vpack.c.bf16 %v324_v10, %v323_v9  ;;  %v329_v53 = vld [vmem:[%s3231_s1 + $0x730] sm:$0xff]  ;;  %v316_v57 = vld [vmem:[%s3231_s1 + $0x6c8] sm:$0xff]  ;;  %v347_v58 = vld [vmem:[%s3231_s1 + $0x7c0] sm:$0xff] }
  0x52   :  { %1469 = vmatpush3.bf16.msra.mxu0 %v614_v16  ;;  %v342_v16 = vld [vmem:[%s3231_s1 + $0x798] sm:$0xff]  ;;  %v655_v62 = vpack.c.bf16 %v316_v57, %v315_v56  ;;  %v299_v63 = vld [vmem:[%s3231_s1 + $0x640] sm:$0xff]  ;;  %v300_v0 = vld [vmem:[%s3231_s1 + $0x648] sm:$0xff] }
  0x53   :  { %1491 = vmatpush3.bf16.msra.mxu1 %v630_v17  ;;  %1470 = vmatprep.subr.bf16.mxu0 %v623_v18  ;;  %v28_v17 = vld [vmem:[%s3232_s0 + $0x68] sm:$0xff]  ;;  %v331_v1 = vld [vmem:[%s3231_s1 + $0x740] sm:$0xff]  ;;  %v317_v4 = vld [vmem:[%s3231_s1 + $0x6d0] sm:$0xff]  ;;  %v647_v8 = vpack.c.bf16 %v300_v0, %v299_v63 }
  0x54   :  { %1492 = vmatprep.subr.bf16.mxu1 %v639_v22  ;;  %v56_v18 = vld [vmem:[%s3232_s0 + $0x148] sm:$0xff]  ;;  %v58_v22 = vld [vmem:[%s3232_s0 + $0x158] sm:$0xff]  ;;  %v333_v13 = vld [vmem:[%s3231_s1 + $0x750] sm:$0xff] }
  0x55   :  { %v84_v32 = vpack.c.bf16 %v56_v18, %v28_v17  ;;  %v86_v35 = vpack.c.bf16 %v58_v22, %v30_v21  ;;  %v332_v3 = vld [vmem:[%s3231_s1 + $0x748] sm:$0xff]  ;;  %v318_v5 = vld [vmem:[%s3231_s1 + $0x6d8] sm:$0xff]  ;;  %v351_v18 = vld [vmem:[%s3231_s1 + $0x7e0] sm:$0xff] }
  0x56   :  { %1471 = vmatpush3.bf16.msra.mxu0 %v615_v28  ;;  %v668_v28 = vpack.c.bf16 %v342_v16, %v341_v14  ;;  %v663_v9 = vpack.c.bf16 %v332_v3, %v331_v1  ;;  %v656_v10 = vpack.c.bf16 %v318_v5, %v317_v4  ;;  %v302_v12 = vld [vmem:[%s3231_s1 + $0x658] sm:$0xff]  ;;  %v319_v16 = vld [vmem:[%s3231_s1 + $0x6e0] sm:$0xff]  ;;  %v320_v17 = vld [vmem:[%s3231_s1 + $0x6e8] sm:$0xff] }
  0x57   :  { %1493 = vmatpush3.bf16.msra.mxu1 %v631_v29  ;;  %1472 = vmatprep.subr.bf16.mxu0 %v624_v30  ;;  %v326_v29 = vld [vmem:[%s3231_s1 + $0x718] sm:$0xff]  ;;  %v311_v30 = vld [vmem:[%s3231_s1 + $0x6a0] sm:$0xff]  ;;  %v657_v22 = vpack.c.bf16 %v320_v17, %v319_v16  ;;  %v404_v45 = vld [vmem:[%s3231_s1 + $0x988] sm:$0xff] }
  0x58   :  { %1494 = vmatprep.subr.bf16.mxu1 %v640_v34  ;;  %v344_v34 = vld [vmem:[%s3231_s1 + $0x7a8] sm:$0xff]  ;;  %v660_v37 = vpack.c.bf16 %v326_v29, %v325_v27  ;;  %v653_v38 = vpack.c.bf16 %v312_v31, %v311_v30  ;;  %v335_v25 = vld [vmem:[%s3231_s1 + $0x760] sm:$0xff]  ;;  %v322_v29 = vld [vmem:[%s3231_s1 + $0x6f8] sm:$0xff] }
  0x59   :  { %v336_v27 = vld [vmem:[%s3231_s1 + $0x768] sm:$0xff]  ;;  %v353_v30 = vld [vmem:[%s3231_s1 + $0x7f0] sm:$0xff]  ;;  %v354_v31 = vld [vmem:[%s3231_s1 + $0x7f8] sm:$0xff] }
  0x5a   :  { %1473 = vmatpush3.bf16.msra.mxu0 %v616_v40  ;;  %v296_v40 = vld [vmem:[%s3231_s1 + $0x628] sm:$0xff]  ;;  %v403_v44 = vld [vmem:[%s3231_s1 + $0x980] sm:$0xff]  ;;  %v373_v56 = vld [vmem:[%s3231_s1 + $0x890] sm:$0xff] }
  0x5b   :  { %1495 = vmatpush3.bf16.msra.mxu1 %v632_v41  ;;  %1474 = vmatprep.subr.bf16.mxu0 %v625_v42  ;;  %v327_v41 = vld [vmem:[%s3231_s1 + $0x720] sm:$0xff]  ;;  %v669_v42 = vpack.c.bf16 %v344_v34, %v343_v33  ;;  %v645_v48 = vpack.c.bf16 %v296_v40, %v295_v39  ;;  %v305_v33 = vld [vmem:[%s3231_s1 + $0x670] sm:$0xff]  ;;  %v665_v34 = vpack.c.bf16 %v336_v27, %v335_v25  ;;  %v374_v57 = vld [vmem:[%s3231_s1 + $0x898] sm:$0xff] }
  0x5c   :  { %1496 = vmatprep.subr.bf16.mxu1 %v641_v46  ;;  %v345_v46 = vld [vmem:[%s3231_s1 + $0x7b0] sm:$0xff]  ;;  %v661_v49 = vpack.c.bf16 %v328_v43, %v327_v41  ;;  %v674_v39 = vpack.c.bf16 %v354_v31, %v353_v30  ;;  %v27_v40 = vld [vmem:[%s3232_s0 + $0x60] sm:$0xff]  ;;  %v34_v1 = vld [vmem:[%s3232_s0 + $0x98] sm:$0xff]  ;;  %v684_v4 = vpack.c.bf16 %v374_v57, %v373_v56 }
  0x5d   :  { %v371_v41 = vld [vmem:[%s3231_s1 + $0x880] sm:$0xff]  ;;  %v357_v5 = vld [vmem:[%s3231_s1 + $0x810] sm:$0xff]  ;;  %v378_v25 = vld [vmem:[%s3231_s1 + $0x8b8] sm:$0xff] }
  0x5e   :  { %1475 = vmatpush3.bf16.msra.mxu0 %v617_v52  ;;  %v298_v52 = vld [vmem:[%s3231_s1 + $0x638] sm:$0xff]  ;;  %v55_v43 = vld [vmem:[%s3232_s0 + $0x140] sm:$0xff]  ;;  %v361_v31 = vld [vmem:[%s3231_s1 + $0x830] sm:$0xff] }
  0x5f   :  { %1497 = vmatpush3.bf16.msra.mxu1 %v633_v54  ;;  %1476 = vmatprep.subr.bf16.mxu0 %v626_v55  ;;  %v670_v54 = vpack.c.bf16 %v346_v47, %v345_v46  ;;  %v330_v55 = vld [vmem:[%s3231_s1 + $0x738] sm:$0xff]  ;;  %v646_v60 = vpack.c.bf16 %v298_v52, %v297_v51  ;;  %v29_v47 = vld [vmem:[%s3232_s0 + $0x70] sm:$0xff]  ;;  %v356_v52 = vld [vmem:[%s3231_s1 + $0x808] sm:$0xff] }
  0x60   :  { %1498 = vmatprep.subr.bf16.mxu1 %v642_v59  ;;  %v348_v59 = vld [vmem:[%s3231_s1 + $0x7c8] sm:$0xff]  ;;  %v662_v61 = vpack.c.bf16 %v330_v55, %v329_v53  ;;  %v387_v53 = vld [vmem:[%s3231_s1 + $0x900] sm:$0xff]  ;;  %v699_v55 = vpack.c.bf16 %v404_v45, %v403_v44  ;;  %v410_v27 = vld [vmem:[%s3231_s1 + $0x9b8] sm:$0xff] }
  0x61   :  { %v364_v44 = vld [vmem:[%s3231_s1 + $0x848] sm:$0xff]  ;;  %v395_v45 = vld [vmem:[%s3231_s1 + $0x940] sm:$0xff]  ;;  %v366_v56 = vld [vmem:[%s3231_s1 + $0x858] sm:$0xff] }
  0x62   :  { %1477 = vmatpush3.bf16.msra.mxu0 %v618_v2  ;;  %v671_v2 = vpack.c.bf16 %v348_v59, %v347_v58  ;;  %v405_v58 = vld [vmem:[%s3231_s1 + $0x990] sm:$0xff]  ;;  %v83_v59 = vpack.c.bf16 %v55_v43, %v27_v40  ;;  %v363_v43 = vld [vmem:[%s3231_s1 + $0x840] sm:$0xff] }
  0x63   :  { %1499 = vmatpush3.bf16.msra.mxu1 %v634_v6  ;;  %1506 = vmatprep.subr.bf16.mxu0 %v651_v7  ;;  %v349_v6 = vld [vmem:[%s3231_s1 + $0x7d0] sm:$0xff]  ;;  %v350_v7 = vld [vmem:[%s3231_s1 + $0x7d8] sm:$0xff] }
  0x64   :  { %1528 = vmatprep.subr.bf16.mxu1 %v667_v11  ;;  %v301_v11 = vld [vmem:[%s3231_s1 + $0x650] sm:$0xff]  ;;  %v672_v14 = vpack.c.bf16 %v350_v7, %v349_v6  ;;  %v358_v6 = vld [vmem:[%s3231_s1 + $0x818] sm:$0xff] }
  0x65   :  { %975 = vmatmul.mubr.bf16.vlgmr.msra.gmra.mrb[8].mxu0 %v79_v15  ;;  %v334_v15 = vld [vmem:[%s3231_s1 + $0x758] sm:$0xff]  ;;  %v389_v7 = vld [vmem:[%s3231_s1 + $0x910] sm:$0xff]  ;;  %v676_v16 = vpack.c.bf16 %v358_v6, %v357_v5  ;;  %v399_v5 = vld [vmem:[%s3231_s1 + $0x960] sm:$0xff] }
  0x66   :  { %1016 = vmatmul.mubr.bf16.vlgmr.msra.gmra.mrb[8].mxu1 %v81_v19  ;;  %1507 = vmatpush3.bf16.msra.mxu0 %v643_v20  ;;  %v352_v19 = vld [vmem:[%s3231_s1 + $0x7e8] sm:$0xff]  ;;  %v648_v20 = vpack.c.bf16 %v302_v12, %v301_v11  ;;  %v664_v21 = vpack.c.bf16 %v334_v15, %v333_v13  ;;  %v407_v13 = vld [vmem:[%s3231_s1 + $0x9a0] sm:$0xff]  ;;  %v397_v57 = vld [vmem:[%s3231_s1 + $0x950] sm:$0xff] }
  0x67   :  { %1529 = vmatpush3.bf16.msra.mxu1 %v659_v23  ;;  %1508 = vmatprep.subr.bf16.mxu0 %v652_v24  ;;  %v303_v23 = vld [vmem:[%s3231_s1 + $0x660] sm:$0xff]  ;;  %v304_v24 = vld [vmem:[%s3231_s1 + $0x668] sm:$0xff]  ;;  %v673_v26 = vpack.c.bf16 %v352_v19, %v351_v18 }
  0x68   :  { %1530 = vmatprep.subr.bf16.mxu1 %v668_v28  ;;  %1056 = vmatprep.mubr.bf16.mxu0 %v84_v32  ;;  %v321_v28 = vld [vmem:[%s3231_s1 + $0x6f0] sm:$0xff]  ;;  %v649_v32 = vpack.c.bf16 %v304_v24, %v303_v23  ;;  %v376_v11 = vld [vmem:[%s3231_s1 + $0x8a8] sm:$0xff]  ;;  %v359_v19 = vld [vmem:[%s3231_s1 + $0x820] sm:$0xff] }
  0x69   :  { %1097 = vmatprep.mubr.bf16.mxu1 %v86_v35  ;;  %v658_v35 = vpack.c.bf16 %v322_v29, %v321_v28  ;;  %v392_v23 = vld [vmem:[%s3231_s1 + $0x928] sm:$0xff]  ;;  %v377_v24 = vld [vmem:[%s3231_s1 + $0x8b0] sm:$0xff] }
  0x6a   :  { %1509 = vmatpush3.bf16.msra.mxu0 %v644_v36  ;;  %v306_v36 = vld [vmem:[%s3231_s1 + $0x678] sm:$0xff]  ;;  %v686_v30 = vpack.c.bf16 %v378_v25, %v377_v24  ;;  %v467_v24 = vld [vmem:[%s3231_s1 + $0xb80] sm:$0xff]  ;;  %v468_v25 = vld [vmem:[%s3231_s1 + $0xb88] sm:$0xff] }
  0x6b   :  { %1531 = vmatpush3.bf16.msra.mxu1 %v660_v37  ;;  %1510 = vmatprep.subr.bf16.mxu0 %v653_v38  ;;  %v337_v37 = vld [vmem:[%s3231_s1 + $0x770] sm:$0xff]  ;;  %v338_v38 = vld [vmem:[%s3231_s1 + $0x778] sm:$0xff]  ;;  %v650_v46 = vpack.c.bf16 %v306_v36, %v305_v33  ;;  %v379_v36 = vld [vmem:[%s3231_s1 + $0x8c0] sm:$0xff] }
  0x6c   :  { %1532 = vmatprep.subr.bf16.mxu1 %v669_v42  ;;  %v372_v42 = vld [vmem:[%s3231_s1 + $0x888] sm:$0xff]  ;;  %v393_v33 = vld [vmem:[%s3231_s1 + $0x930] sm:$0xff] }
  0x6d   :  { %v683_v51 = vpack.c.bf16 %v372_v42, %v371_v41 }
  0x6e   :  { %1511 = vmatpush3.bf16.msra.mxu0 %v645_v48  ;;  %v57_v48 = vld [vmem:[%s3232_s0 + $0x150] sm:$0xff] }
  0x6f   :  { %1533 = vmatpush3.bf16.msra.mxu1 %v661_v49  ;;  %1512 = vmatprep.subr.bf16.mxu0 %v654_v50  ;;  %v355_v49 = vld [vmem:[%s3231_s1 + $0x800] sm:$0xff]  ;;  %v666_v50 = vpack.c.bf16 %v338_v38, %v337_v37  ;;  %v85_v63 = vpack.c.bf16 %v57_v48, %v29_v47  ;;  %v380_v37 = vld [vmem:[%s3231_s1 + $0x8c8] sm:$0xff]  ;;  %v381_v48 = vld [vmem:[%s3231_s1 + $0x8d0] sm:$0xff] }
  0x70   :  { %1534 = vmatprep.subr.bf16.mxu1 %v670_v54  ;;  %v388_v54 = vld [vmem:[%s3231_s1 + $0x908] sm:$0xff]  ;;  %v675_v0 = vpack.c.bf16 %v356_v52, %v355_v49  ;;  %v411_v38 = vld [vmem:[%s3231_s1 + $0x9c0] sm:$0xff]  ;;  %v687_v42 = vpack.c.bf16 %v380_v37, %v379_v36  ;;  %v382_v49 = vld [vmem:[%s3231_s1 + $0x8d8] sm:$0xff]  ;;  %v679_v52 = vpack.c.bf16 %v364_v44, %v363_v43 }
  0x71   :  { %v691_v3 = vpack.c.bf16 %v388_v54, %v387_v53  ;;  %v396_v47 = vld [vmem:[%s3231_s1 + $0x948] sm:$0xff]  ;;  %v688_v54 = vpack.c.bf16 %v382_v49, %v381_v48  ;;  %v437_v36 = vld [vmem:[%s3231_s1 + $0xa90] sm:$0xff]  ;;  %v438_v37 = vld [vmem:[%s3231_s1 + $0xa98] sm:$0xff] }
  0x72   :  { %1513 = vmatpush3.bf16.msra.mxu0 %v646_v60  ;;  %v406_v60 = vld [vmem:[%s3231_s1 + $0x998] sm:$0xff]  ;;  %v695_v53 = vpack.c.bf16 %v396_v47, %v395_v45  ;;  %v716_v48 = vpack.c.bf16 %v438_v37, %v437_v36  ;;  %v421_v49 = vld [vmem:[%s3231_s1 + $0xa10] sm:$0xff] }
  0x73   :  { %1535 = vmatpush3.bf16.msra.mxu1 %v662_v61  ;;  %1514 = vmatprep.subr.bf16.mxu0 %v655_v62  ;;  %v32_v61 = vld [vmem:[%s3232_s0 + $0x88] sm:$0xff]  ;;  %v38_v45 = vld [vmem:[%s3232_s0 + $0xb8] sm:$0xff]  ;;  %v461_v37 = vld [vmem:[%s3231_s1 + $0xb50] sm:$0xff] }
  0x74   :  { %1536 = vmatprep.subr.bf16.mxu1 %v671_v2  ;;  %v60_v62 = vld [vmem:[%s3232_s0 + $0x168] sm:$0xff]  ;;  %v62_v2 = vld [vmem:[%s3232_s0 + $0x178] sm:$0xff] }
  0x75   :  { %v88_v12 = vpack.c.bf16 %v60_v62, %v32_v61  ;;  %v90_v15 = vpack.c.bf16 %v62_v2, %v34_v1  ;;  %v384_v61 = vld [vmem:[%s3231_s1 + $0x8e8] sm:$0xff]  ;;  %v415_v62 = vld [vmem:[%s3231_s1 + $0x9e0] sm:$0xff]  ;;  %v430_v36 = vld [vmem:[%s3231_s1 + $0xa58] sm:$0xff] }
  0x76   :  { %1515 = vmatpush3.bf16.msra.mxu0 %v647_v8  ;;  %v700_v8 = vpack.c.bf16 %v406_v60, %v405_v58  ;;  %v383_v60 = vld [vmem:[%s3231_s1 + $0x8e0] sm:$0xff] }
  0x77   :  { %1537 = vmatpush3.bf16.msra.mxu1 %v663_v9  ;;  %1516 = vmatprep.subr.bf16.mxu0 %v656_v10  ;;  %v390_v9 = vld [vmem:[%s3231_s1 + $0x918] sm:$0xff]  ;;  %v375_v10 = vld [vmem:[%s3231_s1 + $0x8a0] sm:$0xff]  ;;  %v689_v2 = vpack.c.bf16 %v384_v61, %v383_v60 }
  0x78   :  { %1538 = vmatprep.subr.bf16.mxu1 %v672_v14  ;;  %v408_v14 = vld [vmem:[%s3231_s1 + $0x9a8] sm:$0xff]  ;;  %v692_v17 = vpack.c.bf16 %v390_v9, %v389_v7  ;;  %v685_v18 = vpack.c.bf16 %v376_v11, %v375_v10  ;;  %v386_v9 = vld [vmem:[%s3231_s1 + $0x8f8] sm:$0xff]  ;;  %v417_v10 = vld [vmem:[%s3231_s1 + $0x9f0] sm:$0xff] }
  0x79   :  { %v400_v7 = vld [vmem:[%s3231_s1 + $0x968] sm:$0xff]  ;;  %v418_v11 = vld [vmem:[%s3231_s1 + $0x9f8] sm:$0xff] }
  0x7a   :  { %1517 = vmatpush3.bf16.msra.mxu0 %v648_v20  ;;  %v360_v20 = vld [vmem:[%s3231_s1 + $0x828] sm:$0xff] }
  0x7b   :  { %1539 = vmatpush3.bf16.msra.mxu1 %v664_v21  ;;  %1518 = vmatprep.subr.bf16.mxu0 %v657_v22  ;;  %v391_v21 = vld [vmem:[%s3231_s1 + $0x920] sm:$0xff]  ;;  %v701_v22 = vpack.c.bf16 %v408_v14, %v407_v13  ;;  %v677_v28 = vpack.c.bf16 %v360_v20, %v359_v19  ;;  %v369_v13 = vld [vmem:[%s3231_s1 + $0x870] sm:$0xff]  ;;  %v697_v14 = vpack.c.bf16 %v400_v7, %v399_v5  ;;  %v442_v5 = vld [vmem:[%s3231_s1 + $0xab8] sm:$0xff] }
  0x7c   :  { %1540 = vmatprep.subr.bf16.mxu1 %v673_v26  ;;  %v409_v26 = vld [vmem:[%s3231_s1 + $0x9b0] sm:$0xff]  ;;  %v693_v29 = vpack.c.bf16 %v392_v23, %v391_v21  ;;  %v706_v19 = vpack.c.bf16 %v418_v11, %v417_v10  ;;  %v31_v20 = vld [vmem:[%s3232_s0 + $0x80] sm:$0xff]  ;;  %v474_v7 = vld [vmem:[%s3231_s1 + $0xbb8] sm:$0xff] }
  0x7d   :  { %v435_v21 = vld [vmem:[%s3231_s1 + $0xa80] sm:$0xff]  ;;  %v425_v11 = vld [vmem:[%s3231_s1 + $0xa30] sm:$0xff] }
  0x7e   :  { %1519 = vmatpush3.bf16.msra.mxu0 %v649_v32  ;;  %v362_v32 = vld [vmem:[%s3231_s1 + $0x838] sm:$0xff]  ;;  %v59_v23 = vld [vmem:[%s3232_s0 + $0x160] sm:$0xff] }
  0x7f   :  { %1541 = vmatpush3.bf16.msra.mxu1 %v665_v34  ;;  %1520 = vmatprep.subr.bf16.mxu0 %v658_v35  ;;  %v702_v34 = vpack.c.bf16 %v410_v27, %v409_v26  ;;  %v394_v35 = vld [vmem:[%s3231_s1 + $0x938] sm:$0xff]  ;;  %v678_v40 = vpack.c.bf16 %v362_v32, %v361_v31  ;;  %v33_v27 = vld [vmem:[%s3232_s0 + $0x90] sm:$0xff]  ;;  %v420_v32 = vld [vmem:[%s3231_s1 + $0xa08] sm:$0xff] }
  0x80   :  { %1542 = vmatprep.subr.bf16.mxu1 %v674_v39  ;;  %v412_v39 = vld [vmem:[%s3231_s1 + $0x9c8] sm:$0xff]  ;;  %v694_v41 = vpack.c.bf16 %v394_v35, %v393_v33  ;;  %v451_v33 = vld [vmem:[%s3231_s1 + $0xb00] sm:$0xff]  ;;  %v731_v35 = vpack.c.bf16 %v468_v25, %v467_v24 }
  0x81   :  { %v428_v24 = vld [vmem:[%s3231_s1 + $0xa48] sm:$0xff]  ;;  %v459_v25 = vld [vmem:[%s3231_s1 + $0xb40] sm:$0xff] }
  0x82   :  { %1521 = vmatpush3.bf16.msra.mxu0 %v650_v46  ;;  %v703_v46 = vpack.c.bf16 %v412_v39, %v411_v38  ;;  %v469_v38 = vld [vmem:[%s3231_s1 + $0xb90] sm:$0xff]  ;;  %v87_v39 = vpack.c.bf16 %v59_v23, %v31_v20  ;;  %v427_v23 = vld [vmem:[%s3231_s1 + $0xa40] sm:$0xff] }
  0x83   :  { %1543 = vmatpush3.bf16.msra.mxu1 %v666_v50  ;;  %1550 = vmatprep.subr.bf16.mxu0 %v683_v51  ;;  %v413_v50 = vld [vmem:[%s3231_s1 + $0x9d0] sm:$0xff]  ;;  %v414_v51 = vld [vmem:[%s3231_s1 + $0x9d8] sm:$0xff] }
  0x84   :  { %1572 = vmatprep.subr.bf16.mxu1 %v699_v55  ;;  %v365_v55 = vld [vmem:[%s3231_s1 + $0x850] sm:$0xff]  ;;  %v704_v58 = vpack.c.bf16 %v414_v51, %v413_v50  ;;  %v422_v50 = vld [vmem:[%s3231_s1 + $0xa18] sm:$0xff] }
  0x85   :  { %1057 = vmatmul.mubr.bf16.vlgmr.msra.gmra.mrb[12].mxu0 %v83_v59  ;;  %v398_v59 = vld [vmem:[%s3231_s1 + $0x958] sm:$0xff]  ;;  %v453_v51 = vld [vmem:[%s3231_s1 + $0xb10] sm:$0xff]  ;;  %v708_v60 = vpack.c.bf16 %v422_v50, %v421_v49  ;;  %v463_v49 = vld [vmem:[%s3231_s1 + $0xb60] sm:$0xff] }
  0x86   :  { %1098 = vmatmul.mubr.bf16.vlgmr.msra.gmra.mrb[12].mxu1 %v85_v63  ;;  %1551 = vmatpush3.bf16.msra.mxu0 %v675_v0  ;;  %v416_v63 = vld [vmem:[%s3231_s1 + $0x9e8] sm:$0xff]  ;;  %v680_v0 = vpack.c.bf16 %v366_v56, %v365_v55  ;;  %v696_v1 = vpack.c.bf16 %v398_v59, %v397_v57  ;;  %v471_v57 = vld [vmem:[%s3231_s1 + $0xba0] sm:$0xff] }
  0x87   :  { %1573 = vmatpush3.bf16.msra.mxu1 %v691_v3  ;;  %1552 = vmatprep.subr.bf16.mxu0 %v684_v4  ;;  %v367_v3 = vld [vmem:[%s3231_s1 + $0x860] sm:$0xff]  ;;  %v368_v4 = vld [vmem:[%s3231_s1 + $0x868] sm:$0xff]  ;;  %v705_v6 = vpack.c.bf16 %v416_v63, %v415_v62 }
  0x88   :  { %1574 = vmatprep.subr.bf16.mxu1 %v700_v8  ;;  %1138 = vmatprep.mubr.bf16.mxu0 %v88_v12  ;;  %v385_v8 = vld [vmem:[%s3231_s1 + $0x8f0] sm:$0xff]  ;;  %v681_v12 = vpack.c.bf16 %v368_v4, %v367_v3  ;;  %v440_v55 = vld [vmem:[%s3231_s1 + $0xaa8] sm:$0xff]  ;;  %v423_v63 = vld [vmem:[%s3231_s1 + $0xa20] sm:$0xff] }
  0x89   :  { %1179 = vmatprep.mubr.bf16.mxu1 %v90_v15  ;;  %v690_v15 = vpack.c.bf16 %v386_v9, %v385_v8  ;;  %v456_v3 = vld [vmem:[%s3231_s1 + $0xb28] sm:$0xff]  ;;  %v441_v4 = vld [vmem:[%s3231_s1 + $0xab0] sm:$0xff] }
  0x8a   :  { %1553 = vmatpush3.bf16.msra.mxu0 %v676_v16  ;;  %v370_v16 = vld [vmem:[%s3231_s1 + $0x878] sm:$0xff]  ;;  %v718_v10 = vpack.c.bf16 %v442_v5, %v441_v4  ;;  %v531_v4 = vld [vmem:[%s3231_s1 + $0xd80] sm:$0xff]  ;;  %v532_v5 = vld [vmem:[%s3231_s1 + $0xd88] sm:$0xff] }
  0x8b   :  { %1575 = vmatpush3.bf16.msra.mxu1 %v692_v17  ;;  %1554 = vmatprep.subr.bf16.mxu0 %v685_v18  ;;  %v401_v17 = vld [vmem:[%s3231_s1 + $0x970] sm:$0xff]  ;;  %v402_v18 = vld [vmem:[%s3231_s1 + $0x978] sm:$0xff]  ;;  %v682_v26 = vpack.c.bf16 %v370_v16, %v369_v13  ;;  %v443_v16 = vld [vmem:[%s3231_s1 + $0xac0] sm:$0xff] }
  0x8c   :  { %1576 = vmatprep.subr.bf16.mxu1 %v701_v22  ;;  %v436_v22 = vld [vmem:[%s3231_s1 + $0xa88] sm:$0xff]  ;;  %v457_v13 = vld [vmem:[%s3231_s1 + $0xb30] sm:$0xff] }
  0x8d   :  { %v715_v31 = vpack.c.bf16 %v436_v22, %v435_v21 }
  0x8e   :  { %1555 = vmatpush3.bf16.msra.mxu0 %v677_v28  ;;  %v61_v28 = vld [vmem:[%s3232_s0 + $0x170] sm:$0xff] }
  0x8f   :  { %1577 = vmatpush3.bf16.msra.mxu1 %v693_v29  ;;  %1556 = vmatprep.subr.bf16.mxu0 %v686_v30  ;;  %v419_v29 = vld [vmem:[%s3231_s1 + $0xa00] sm:$0xff]  ;;  %v698_v30 = vpack.c.bf16 %v402_v18, %v401_v17  ;;  %v89_v43 = vpack.c.bf16 %v61_v28, %v33_v27  ;;  %v444_v17 = vld [vmem:[%s3231_s1 + $0xac8] sm:$0xff]  ;;  %v445_v28 = vld [vmem:[%s3231_s1 + $0xad0] sm:$0xff] }
  0x90   :  { %1578 = vmatprep.subr.bf16.mxu1 %v702_v34  ;;  %v452_v34 = vld [vmem:[%s3231_s1 + $0xb08] sm:$0xff]  ;;  %v707_v44 = vpack.c.bf16 %v420_v32, %v419_v29  ;;  %v475_v18 = vld [vmem:[%s3231_s1 + $0xbc0] sm:$0xff]  ;;  %v719_v22 = vpack.c.bf16 %v444_v17, %v443_v16  ;;  %v446_v29 = vld [vmem:[%s3231_s1 + $0xad8] sm:$0xff]  ;;  %v711_v32 = vpack.c.bf16 %v428_v24, %v427_v23 }
  0x91   :  { %v723_v47 = vpack.c.bf16 %v452_v34, %v451_v33  ;;  %v460_v27 = vld [vmem:[%s3231_s1 + $0xb48] sm:$0xff]  ;;  %v720_v34 = vpack.c.bf16 %v446_v29, %v445_v28  ;;  %v501_v16 = vld [vmem:[%s3231_s1 + $0xc90] sm:$0xff]  ;;  %v502_v17 = vld [vmem:[%s3231_s1 + $0xc98] sm:$0xff] }
  0x92   :  { %1557 = vmatpush3.bf16.msra.mxu0 %v678_v40  ;;  %v470_v40 = vld [vmem:[%s3231_s1 + $0xb98] sm:$0xff]  ;;  %v727_v33 = vpack.c.bf16 %v460_v27, %v459_v25  ;;  %v748_v28 = vpack.c.bf16 %v502_v17, %v501_v16  ;;  %v485_v29 = vld [vmem:[%s3231_s1 + $0xc10] sm:$0xff] }
  0x93   :  { %1579 = vmatpush3.bf16.msra.mxu1 %v694_v41  ;;  %1558 = vmatprep.subr.bf16.mxu0 %v687_v42  ;;  %v36_v41 = vld [vmem:[%s3232_s0 + $0xa8] sm:$0xff]  ;;  %v42_v25 = vld [vmem:[%s3232_s0 + $0xd8] sm:$0xff]  ;;  %v525_v17 = vld [vmem:[%s3231_s1 + $0xd50] sm:$0xff] }
  0x94   :  { %1580 = vmatprep.subr.bf16.mxu1 %v703_v46  ;;  %v64_v42 = vld [vmem:[%s3232_s0 + $0x188] sm:$0xff]  ;;  %v66_v46 = vld [vmem:[%s3232_s0 + $0x198] sm:$0xff] }
  0x95   :  { %v92_v56 = vpack.c.bf16 %v64_v42, %v36_v41  ;;  %v94_v59 = vpack.c.bf16 %v66_v46, %v38_v45  ;;  %v448_v41 = vld [vmem:[%s3231_s1 + $0xae8] sm:$0xff]  ;;  %v479_v42 = vld [vmem:[%s3231_s1 + $0xbe0] sm:$0xff]  ;;  %v494_v16 = vld [vmem:[%s3231_s1 + $0xc58] sm:$0xff] }
  0x96   :  { %1559 = vmatpush3.bf16.msra.mxu0 %v679_v52  ;;  %v732_v52 = vpack.c.bf16 %v470_v40, %v469_v38  ;;  %v447_v40 = vld [vmem:[%s3231_s1 + $0xae0] sm:$0xff] }
  0x97   :  { %1581 = vmatpush3.bf16.msra.mxu1 %v695_v53  ;;  %1560 = vmatprep.subr.bf16.mxu0 %v688_v54  ;;  %v454_v53 = vld [vmem:[%s3231_s1 + $0xb18] sm:$0xff]  ;;  %v439_v54 = vld [vmem:[%s3231_s1 + $0xaa0] sm:$0xff]  ;;  %v721_v46 = vpack.c.bf16 %v448_v41, %v447_v40 }
  0x98   :  { %1582 = vmatprep.subr.bf16.mxu1 %v704_v58  ;;  %v472_v58 = vld [vmem:[%s3231_s1 + $0xba8] sm:$0xff]  ;;  %v724_v61 = vpack.c.bf16 %v454_v53, %v453_v51  ;;  %v717_v62 = vpack.c.bf16 %v440_v55, %v439_v54  ;;  %v450_v53 = vld [vmem:[%s3231_s1 + $0xaf8] sm:$0xff]  ;;  %v481_v54 = vld [vmem:[%s3231_s1 + $0xbf0] sm:$0xff] }
  0x99   :  { %v464_v51 = vld [vmem:[%s3231_s1 + $0xb68] sm:$0xff]  ;;  %v482_v55 = vld [vmem:[%s3231_s1 + $0xbf8] sm:$0xff] }
  0x9a   :  { %1561 = vmatpush3.bf16.msra.mxu0 %v680_v0  ;;  %v424_v0 = vld [vmem:[%s3231_s1 + $0xa28] sm:$0xff] }
  0x9b   :  { %1583 = vmatpush3.bf16.msra.mxu1 %v696_v1  ;;  %1562 = vmatprep.subr.bf16.mxu0 %v689_v2  ;;  %v455_v1 = vld [vmem:[%s3231_s1 + $0xb20] sm:$0xff]  ;;  %v733_v2 = vpack.c.bf16 %v472_v58, %v471_v57  ;;  %v709_v8 = vpack.c.bf16 %v424_v0, %v423_v63  ;;  %v433_v57 = vld [vmem:[%s3231_s1 + $0xa70] sm:$0xff]  ;;  %v729_v58 = vpack.c.bf16 %v464_v51, %v463_v49  ;;  %v506_v49 = vld [vmem:[%s3231_s1 + $0xcb8] sm:$0xff] }
  0x9c   :  { %1584 = vmatprep.subr.bf16.mxu1 %v705_v6  ;;  %v473_v6 = vld [vmem:[%s3231_s1 + $0xbb0] sm:$0xff]  ;;  %v725_v9 = vpack.c.bf16 %v456_v3, %v455_v1  ;;  %v738_v63 = vpack.c.bf16 %v482_v55, %v481_v54  ;;  %v35_v0 = vld [vmem:[%s3232_s0 + $0xa0] sm:$0xff]  ;;  %v538_v51 = vld [vmem:[%s3231_s1 + $0xdb8] sm:$0xff] }
  0x9d   :  { %v499_v1 = vld [vmem:[%s3231_s1 + $0xc80] sm:$0xff]  ;;  %v489_v55 = vld [vmem:[%s3231_s1 + $0xc30] sm:$0xff] }
  0x9e   :  { %1563 = vmatpush3.bf16.msra.mxu0 %v681_v12  ;;  %v426_v12 = vld [vmem:[%s3231_s1 + $0xa38] sm:$0xff]  ;;  %v63_v3 = vld [vmem:[%s3232_s0 + $0x180] sm:$0xff] }
  0x9f   :  { %1585 = vmatpush3.bf16.msra.mxu1 %v697_v14  ;;  %1564 = vmatprep.subr.bf16.mxu0 %v690_v15  ;;  %v734_v14 = vpack.c.bf16 %v474_v7, %v473_v6  ;;  %v458_v15 = vld [vmem:[%s3231_s1 + $0xb38] sm:$0xff]  ;;  %v710_v20 = vpack.c.bf16 %v426_v12, %v425_v11  ;;  %v37_v7 = vld [vmem:[%s3232_s0 + $0xb0] sm:$0xff]  ;;  %v484_v12 = vld [vmem:[%s3231_s1 + $0xc08] sm:$0xff] }
  0xa0   :  { %1586 = vmatprep.subr.bf16.mxu1 %v706_v19  ;;  %v476_v19 = vld [vmem:[%s3231_s1 + $0xbc8] sm:$0xff]  ;;  %v726_v21 = vpack.c.bf16 %v458_v15, %v457_v13  ;;  %v515_v13 = vld [vmem:[%s3231_s1 + $0xd00] sm:$0xff]  ;;  %v763_v15 = vpack.c.bf16 %v532_v5, %v531_v4 }
  0xa1   :  { %v492_v4 = vld [vmem:[%s3231_s1 + $0xc48] sm:$0xff]  ;;  %v523_v5 = vld [vmem:[%s3231_s1 + $0xd40] sm:$0xff] }
  0xa2   :  { %1565 = vmatpush3.bf16.msra.mxu0 %v682_v26  ;;  %v735_v26 = vpack.c.bf16 %v476_v19, %v475_v18  ;;  %v533_v18 = vld [vmem:[%s3231_s1 + $0xd90] sm:$0xff]  ;;  %v91_v19 = vpack.c.bf16 %v63_v3, %v35_v0  ;;  %v491_v3 = vld [vmem:[%s3231_s1 + $0xc40] sm:$0xff] }
  0xa3   :  { %1587 = vmatpush3.bf16.msra.mxu1 %v698_v30  ;;  %1594 = vmatprep.subr.bf16.mxu0 %v715_v31  ;;  %v477_v30 = vld [vmem:[%s3231_s1 + $0xbd0] sm:$0xff]  ;;  %v478_v31 = vld [vmem:[%s3231_s1 + $0xbd8] sm:$0xff] }
  0xa4   :  { %1616 = vmatprep.subr.bf16.mxu1 %v731_v35  ;;  %v429_v35 = vld [vmem:[%s3231_s1 + $0xa50] sm:$0xff]  ;;  %v736_v38 = vpack.c.bf16 %v478_v31, %v477_v30  ;;  %v486_v30 = vld [vmem:[%s3231_s1 + $0xc18] sm:$0xff] }
  0xa5   :  { %1139 = vmatmul.mubr.bf16.vlgmr.msra.gmra.mrb[16].mxu0 %v87_v39  ;;  %v462_v39 = vld [vmem:[%s3231_s1 + $0xb58] sm:$0xff]  ;;  %v517_v31 = vld [vmem:[%s3231_s1 + $0xd10] sm:$0xff]  ;;  %v740_v40 = vpack.c.bf16 %v486_v30, %v485_v29  ;;  %v527_v29 = vld [vmem:[%s3231_s1 + $0xd60] sm:$0xff] }
  0xa6   :  { %1180 = vmatmul.mubr.bf16.vlgmr.msra.gmra.mrb[16].mxu1 %v89_v43  ;;  %1595 = vmatpush3.bf16.msra.mxu0 %v707_v44  ;;  %v480_v43 = vld [vmem:[%s3231_s1 + $0xbe8] sm:$0xff]  ;;  %v712_v44 = vpack.c.bf16 %v430_v36, %v429_v35  ;;  %v728_v45 = vpack.c.bf16 %v462_v39, %v461_v37  ;;  %v535_v37 = vld [vmem:[%s3231_s1 + $0xda0] sm:$0xff] }
  0xa7   :  { %1617 = vmatpush3.bf16.msra.mxu1 %v723_v47  ;;  %1596 = vmatprep.subr.bf16.mxu0 %v716_v48  ;;  %v431_v47 = vld [vmem:[%s3231_s1 + $0xa60] sm:$0xff]  ;;  %v432_v48 = vld [vmem:[%s3231_s1 + $0xa68] sm:$0xff]  ;;  %v737_v50 = vpack.c.bf16 %v480_v43, %v479_v42 }
  0xa8   :  { %1618 = vmatprep.subr.bf16.mxu1 %v732_v52  ;;  %1220 = vmatprep.mubr.bf16.mxu0 %v92_v56  ;;  %v449_v52 = vld [vmem:[%s3231_s1 + $0xaf0] sm:$0xff]  ;;  %v713_v56 = vpack.c.bf16 %v432_v48, %v431_v47  ;;  %v504_v35 = vld [vmem:[%s3231_s1 + $0xca8] sm:$0xff]  ;;  %v487_v43 = vld [vmem:[%s3231_s1 + $0xc20] sm:$0xff] }
  0xa9   :  { %1261 = vmatprep.mubr.bf16.mxu1 %v94_v59  ;;  %v722_v59 = vpack.c.bf16 %v450_v53, %v449_v52  ;;  %v520_v47 = vld [vmem:[%s3231_s1 + $0xd28] sm:$0xff]  ;;  %v505_v48 = vld [vmem:[%s3231_s1 + $0xcb0] sm:$0xff] }
  0xaa   :  { %1597 = vmatpush3.bf16.msra.mxu0 %v708_v60  ;;  %v434_v60 = vld [vmem:[%s3231_s1 + $0xa78] sm:$0xff]  ;;  %v750_v54 = vpack.c.bf16 %v506_v49, %v505_v48  ;;  %v41_v48 = vld [vmem:[%s3232_s0 + $0xd0] sm:$0xff] }
  0xab   :  { %1619 = vmatpush3.bf16.msra.mxu1 %v724_v61  ;;  %1598 = vmatprep.subr.bf16.mxu0 %v717_v62  ;;  %v465_v61 = vld [vmem:[%s3231_s1 + $0xb70] sm:$0xff]  ;;  %v466_v62 = vld [vmem:[%s3231_s1 + $0xb78] sm:$0xff]  ;;  %v714_v6 = vpack.c.bf16 %v434_v60, %v433_v57  ;;  %v507_v60 = vld [vmem:[%s3231_s1 + $0xcc0] sm:$0xff] }
  0xac   :  { %1620 = vmatprep.subr.bf16.mxu1 %v733_v2  ;;  %v500_v2 = vld [vmem:[%s3231_s1 + $0xc88] sm:$0xff]  ;;  %v521_v57 = vld [vmem:[%s3231_s1 + $0xd30] sm:$0xff] }
  0xad   :  { %v747_v11 = vpack.c.bf16 %v500_v2, %v499_v1  ;;  %v69_v49 = vld [vmem:[%s3232_s0 + $0x1b0] sm:$0xff] }
  0xae   :  { %1599 = vmatpush3.bf16.msra.mxu0 %v709_v8  ;;  %v65_v8 = vld [vmem:[%s3232_s0 + $0x190] sm:$0xff] }
  0xaf   :  { %1621 = vmatpush3.bf16.msra.mxu1 %v725_v9  ;;  %1600 = vmatprep.subr.bf16.mxu0 %v718_v10  ;;  %v483_v9 = vld [vmem:[%s3231_s1 + $0xc00] sm:$0xff]  ;;  %v730_v10 = vpack.c.bf16 %v466_v62, %v465_v61  ;;  %v93_v23 = vpack.c.bf16 %v65_v8, %v37_v7  ;;  %v508_v61 = vld [vmem:[%s3231_s1 + $0xcc8] sm:$0xff]  ;;  %v509_v8 = vld [vmem:[%s3231_s1 + $0xcd0] sm:$0xff] }
  0xb0   :  { %1622 = vmatprep.subr.bf16.mxu1 %v734_v14  ;;  %v516_v14 = vld [vmem:[%s3231_s1 + $0xd08] sm:$0xff]  ;;  %v739_v24 = vpack.c.bf16 %v484_v12, %v483_v9  ;;  %v539_v62 = vld [vmem:[%s3231_s1 + $0xdc0] sm:$0xff]  ;;  %v751_v2 = vpack.c.bf16 %v508_v61, %v507_v60  ;;  %v510_v9 = vld [vmem:[%s3231_s1 + $0xcd8] sm:$0xff]  ;;  %v743_v12 = vpack.c.bf16 %v492_v4, %v491_v3 }
  0xb1   :  { %v755_v27 = vpack.c.bf16 %v516_v14, %v515_v13  ;;  %v524_v7 = vld [vmem:[%s3231_s1 + $0xd48] sm:$0xff]  ;;  %v752_v14 = vpack.c.bf16 %v510_v9, %v509_v8 }
  0xb2   :  { %1601 = vmatpush3.bf16.msra.mxu0 %v710_v20  ;;  %v534_v20 = vld [vmem:[%s3231_s1 + $0xd98] sm:$0xff]  ;;  %v759_v13 = vpack.c.bf16 %v524_v7, %v523_v5 }
  0xb3   :  { %1623 = vmatpush3.bf16.msra.mxu1 %v726_v21  ;;  %1602 = vmatprep.subr.bf16.mxu0 %v719_v22  ;;  %v40_v21 = vld [vmem:[%s3232_s0 + $0xc8] sm:$0xff] }
  0xb4   :  { %1624 = vmatprep.subr.bf16.mxu1 %v735_v26  ;;  %v68_v22 = vld [vmem:[%s3232_s0 + $0x1a8] sm:$0xff]  ;;  %v70_v26 = vld [vmem:[%s3232_s0 + $0x1b8] sm:$0xff] }
  0xb5   :  { %v96_v36 = vpack.c.bf16 %v68_v22, %v40_v21  ;;  %v98_v39 = vpack.c.bf16 %v70_v26, %v42_v25  ;;  %v512_v21 = vld [vmem:[%s3231_s1 + $0xce8] sm:$0xff]  ;;  %v543_v22 = vld [vmem:[%s3231_s1 + $0xde0] sm:$0xff] }
  0xb6   :  { %1603 = vmatpush3.bf16.msra.mxu0 %v711_v32  ;;  %v764_v32 = vpack.c.bf16 %v534_v20, %v533_v18  ;;  %v511_v20 = vld [vmem:[%s3231_s1 + $0xce0] sm:$0xff] }
  0xb7   :  { %1625 = vmatpush3.bf16.msra.mxu1 %v727_v33  ;;  %1604 = vmatprep.subr.bf16.mxu0 %v720_v34  ;;  %v518_v33 = vld [vmem:[%s3231_s1 + $0xd18] sm:$0xff]  ;;  %v503_v34 = vld [vmem:[%s3231_s1 + $0xca0] sm:$0xff]  ;;  %v753_v26 = vpack.c.bf16 %v512_v21, %v511_v20 }
  0xb8   :  { %1626 = vmatprep.subr.bf16.mxu1 %v736_v38  ;;  %v536_v38 = vld [vmem:[%s3231_s1 + $0xda8] sm:$0xff]  ;;  %v756_v41 = vpack.c.bf16 %v518_v33, %v517_v31  ;;  %v749_v42 = vpack.c.bf16 %v504_v35, %v503_v34  ;;  %v514_v33 = vld [vmem:[%s3231_s1 + $0xcf8] sm:$0xff]  ;;  %v545_v34 = vld [vmem:[%s3231_s1 + $0xdf0] sm:$0xff] }
  0xb9   :  { %v528_v31 = vld [vmem:[%s3231_s1 + $0xd68] sm:$0xff]  ;;  %v546_v35 = vld [vmem:[%s3231_s1 + $0xdf8] sm:$0xff] }
  0xba   :  { %1605 = vmatpush3.bf16.msra.mxu0 %v712_v44  ;;  %v488_v44 = vld [vmem:[%s3231_s1 + $0xc28] sm:$0xff] }
  0xbb   :  { %1627 = vmatpush3.bf16.msra.mxu1 %v728_v45  ;;  %1606 = vmatprep.subr.bf16.mxu0 %v721_v46  ;;  %v519_v45 = vld [vmem:[%s3231_s1 + $0xd20] sm:$0xff]  ;;  %v765_v46 = vpack.c.bf16 %v536_v38, %v535_v37  ;;  %v741_v52 = vpack.c.bf16 %v488_v44, %v487_v43  ;;  %v761_v37 = vpack.c.bf16 %v528_v31, %v527_v29  ;;  %v530_v43 = vld [vmem:[%s3231_s1 + $0xd78] sm:$0xff] }
  0xbc   :  { %1628 = vmatprep.subr.bf16.mxu1 %v737_v50  ;;  %v537_v50 = vld [vmem:[%s3231_s1 + $0xdb0] sm:$0xff]  ;;  %v757_v53 = vpack.c.bf16 %v520_v47, %v519_v45  ;;  %v39_v45 = vld [vmem:[%s3232_s0 + $0xc0] sm:$0xff] }
  0xbe   :  { %1607 = vmatpush3.bf16.msra.mxu0 %v713_v56  ;;  %v490_v56 = vld [vmem:[%s3231_s1 + $0xc38] sm:$0xff] }
  0xbf   :  { %1629 = vmatpush3.bf16.msra.mxu1 %v729_v58  ;;  %1608 = vmatprep.subr.bf16.mxu0 %v722_v59  ;;  %v766_v58 = vpack.c.bf16 %v538_v51, %v537_v50  ;;  %v522_v59 = vld [vmem:[%s3231_s1 + $0xd38] sm:$0xff]  ;;  %v742_v0 = vpack.c.bf16 %v490_v56, %v489_v55  ;;  %v97_v51 = vpack.c.bf16 %v69_v49, %v41_v48 }
  0xc0   :  { %1630 = vmatprep.subr.bf16.mxu1 %v738_v63  ;;  %v540_v63 = vld [vmem:[%s3231_s1 + $0xdc8] sm:$0xff]  ;;  %v758_v1 = vpack.c.bf16 %v522_v59, %v521_v57 }
  0xc2   :  { %1609 = vmatpush3.bf16.msra.mxu0 %v714_v6  ;;  %v767_v6 = vpack.c.bf16 %v540_v63, %v539_v62 }
  0xc3   :  { %1631 = vmatpush3.bf16.msra.mxu1 %v730_v10  ;;  %1638 = vmatprep.subr.bf16.mxu0 %v747_v11  ;;  %v541_v10 = vld [vmem:[%s3231_s1 + $0xdd0] sm:$0xff]  ;;  %v542_v11 = vld [vmem:[%s3231_s1 + $0xdd8] sm:$0xff] }
  0xc4   :  { %1660 = vmatprep.subr.bf16.mxu1 %v763_v15  ;;  %v493_v15 = vld [vmem:[%s3231_s1 + $0xc50] sm:$0xff]  ;;  %v768_v18 = vpack.c.bf16 %v542_v11, %v541_v10 }
  0xc5   :  { %1221 = vmatmul.mubr.bf16.vlgmr.msra.gmra.mrb[20].mxu0 %v91_v19  ;;  %v526_v19 = vld [vmem:[%s3231_s1 + $0xd58] sm:$0xff] }
  0xc6   :  { %1262 = vmatmul.mubr.bf16.vlgmr.msra.gmra.mrb[20].mxu1 %v93_v23  ;;  %1639 = vmatpush3.bf16.msra.mxu0 %v739_v24  ;;  %v544_v23 = vld [vmem:[%s3231_s1 + $0xde8] sm:$0xff]  ;;  %v744_v24 = vpack.c.bf16 %v494_v16, %v493_v15  ;;  %v760_v25 = vpack.c.bf16 %v526_v19, %v525_v17 }
  0xc7   :  { %1661 = vmatpush3.bf16.msra.mxu1 %v755_v27  ;;  %1640 = vmatprep.subr.bf16.mxu0 %v748_v28  ;;  %v495_v27 = vld [vmem:[%s3231_s1 + $0xc60] sm:$0xff]  ;;  %v496_v28 = vld [vmem:[%s3231_s1 + $0xc68] sm:$0xff]  ;;  %v769_v30 = vpack.c.bf16 %v544_v23, %v543_v22 }
  0xc8   :  { %1662 = vmatprep.subr.bf16.mxu1 %v764_v32  ;;  %1302 = vmatprep.mubr.bf16.mxu0 %v96_v36  ;;  %v513_v32 = vld [vmem:[%s3231_s1 + $0xcf0] sm:$0xff]  ;;  %v745_v36 = vpack.c.bf16 %v496_v28, %v495_v27 }
  0xc9   :  { %1343 = vmatprep.mubr.bf16.mxu1 %v98_v39  ;;  %v754_v38 = vpack.c.bf16 %v514_v33, %v513_v32  ;;  %v497_v39 = vld [vmem:[%s3231_s1 + $0xc70] sm:$0xff] }
  0xca   :  { %1641 = vmatpush3.bf16.msra.mxu0 %v740_v40  ;;  %v498_v40 = vld [vmem:[%s3231_s1 + $0xc78] sm:$0xff] }
  0xcb   :  { %1663 = vmatpush3.bf16.msra.mxu1 %v756_v41  ;;  %1642 = vmatprep.subr.bf16.mxu0 %v749_v42  ;;  %v770_v41 = vpack.c.bf16 %v546_v35, %v545_v34  ;;  %v529_v42 = vld [vmem:[%s3231_s1 + $0xd70] sm:$0xff]  ;;  %v746_v44 = vpack.c.bf16 %v498_v40, %v497_v39 }
  0xcc   :  { %1664 = vmatprep.subr.bf16.mxu1 %v765_v46  ;;  %v67_v46 = vld [vmem:[%s3232_s0 + $0x1a0] sm:$0xff]  ;;  %v762_v47 = vpack.c.bf16 %v530_v43, %v529_v42 }
  0xcd   :  { %v95_v50 = vpack.c.bf16 %v67_v46, %v39_v45 }
  0xce   :  { %1643 = vmatpush3.bf16.msra.mxu0 %v741_v52 }
  0xcf   :  { %1665 = vmatpush3.bf16.msra.mxu1 %v757_v53  ;;  %1644 = vmatprep.subr.bf16.mxu0 %v750_v54  ;;  %v1371_v54 = vld [vmem:[%s3233_s2] ss:$0 sm:$0xff] }
  0xd0   :  { %1666 = vmatprep.subr.bf16.mxu1 %v766_v58 }
  0xd2   :  { %1645 = vmatpush3.bf16.msra.mxu0 %v742_v0 }
  0xd3   :  { %1667 = vmatpush3.bf16.msra.mxu1 %v758_v1  ;;  %1646 = vmatprep.subr.bf16.mxu0 %v751_v2 }
  0xd4   :  { %1668 = vmatprep.subr.bf16.mxu1 %v767_v6 }
  0xd6   :  { %1647 = vmatpush3.bf16.msra.mxu0 %v743_v12 }
  0xd7   :  { %1669 = vmatpush3.bf16.msra.mxu1 %v759_v13  ;;  %1648 = vmatprep.subr.bf16.mxu0 %v752_v14 }
  0xd8   :  { %1670 = vmatprep.subr.bf16.mxu1 %v768_v18 }
  0xda   :  { %1649 = vmatpush3.bf16.msra.mxu0 %v744_v24 }
  0xdb   :  { %1671 = vmatpush3.bf16.msra.mxu1 %v760_v25  ;;  %1650 = vmatprep.subr.bf16.mxu0 %v753_v26 }
  0xdc   :  { %1672 = vmatprep.subr.bf16.mxu1 %v769_v30 }
  0xde   :  { %1651 = vmatpush3.bf16.msra.mxu0 %v745_v36 }
  0xdf   :  { %1673 = vmatpush3.bf16.msra.mxu1 %v761_v37  ;;  %1652 = vmatprep.subr.bf16.mxu0 %v754_v38 }
  0xe0   :  { %1674 = vmatprep.subr.bf16.mxu1 %v770_v41 }
  0xe2   :  { %1653 = vmatpush3.bf16.msra.mxu0 %v746_v44 }
  0xe3   :  { %1675 = vmatpush3.bf16.msra.mxu1 %v762_v47 }
  0xe5   :  { %1303 = vmatmul.mubr.bf16.vlgmr.msra.gmra.mrb[24].mxu0 %v95_v50 }
  0xe6   :  { %1344 = vmatmul.mubr.bf16.vlgmr.msra.gmra.mrb[24].mxu1 %v97_v51 }
  0xf8   :  { %v1390_v52 = vpop.f32.mrb[0].mxu0 }
  0xf9   :  { %v1412_v53 = vpop.f32.mrb[0].mxu1  ;;  %v1391_v55 = vpop.f32.mrb[1].mxu0 }
  0xfa   :  { %v1392_v56 = vadd.f32 %v1391_v55, %v1390_v52  ;;  %v1413_v57 = vpop.f32.mrb[1].mxu1  ;;  %v1393_v58 = vpop.f32.mrb[2].mxu0 }
  0xfb   :  { %v1414_v59 = vadd.f32 %v1413_v57, %v1412_v53  ;;  %v1415_v60 = vpop.f32.mrb[2].mxu1  ;;  %v1394_v61 = vpop.f32.mrb[3].mxu0 }
  0xfc   :  { %v813_v62 = vadd.f32 %v1392_v56, %v1371_v54  ;;  %v1395_v63 = vadd.f32 %v1394_v61, %v1393_v58  ;;  %v1416_v0 = vpop.f32.mrb[3].mxu1 }
  0xfd   :  { %v1417_v1 = vadd.f32 %v1416_v0, %v1415_v60 }
  0xfe   :  { %v854_v2 = vadd.f32 %v1414_v59, %v813_v62  ;;  %v816_v3 = vadd.f32 %v1395_v63, %v1371_v54 }
 0x100   :  { %v857_v4 = vadd.f32 %v1417_v1, %v816_v3 }
 0x118   :  { %v1434_v5 = vpop.f32.mrb[4].mxu0 }
 0x119   :  { %v1456_v6 = vpop.f32.mrb[4].mxu1  ;;  %v1435_v7 = vpop.f32.mrb[5].mxu0 }
 0x11a   :  { %v1436_v8 = vadd.f32 %v1435_v7, %v1434_v5  ;;  %v1457_v9 = vpop.f32.mrb[5].mxu1  ;;  %v1437_v10 = vpop.f32.mrb[6].mxu0 }
 0x11b   :  { %v1458_v11 = vadd.f32 %v1457_v9, %v1456_v6  ;;  %v1459_v12 = vpop.f32.mrb[6].mxu1  ;;  %v1438_v13 = vpop.f32.mrb[7].mxu0 }
 0x11c   :  { %v895_v14 = vadd.f32 %v1436_v8, %v854_v2  ;;  %v1439_v15 = vadd.f32 %v1438_v13, %v1437_v10  ;;  %v1460_v16 = vpop.f32.mrb[7].mxu1 }
 0x11d   :  { %v1461_v17 = vadd.f32 %v1460_v16, %v1459_v12 }
 0x11e   :  { %v936_v18 = vadd.f32 %v1458_v11, %v895_v14  ;;  %v898_v19 = vadd.f32 %v1439_v15, %v857_v4 }
 0x120   :  { %v939_v20 = vadd.f32 %v1461_v17, %v898_v19 }
 0x138   :  { %v1478_v21 = vpop.f32.mrb[8].mxu0 }
 0x139   :  { %v1500_v22 = vpop.f32.mrb[8].mxu1  ;;  %v1479_v23 = vpop.f32.mrb[9].mxu0 }
 0x13a   :  { %v1480_v24 = vadd.f32 %v1479_v23, %v1478_v21  ;;  %v1501_v25 = vpop.f32.mrb[9].mxu1  ;;  %v1481_v26 = vpop.f32.mrb[10].mxu0 }
 0x13b   :  { %v1502_v27 = vadd.f32 %v1501_v25, %v1500_v22  ;;  %v1503_v28 = vpop.f32.mrb[10].mxu1  ;;  %v1482_v29 = vpop.f32.mrb[11].mxu0 }
 0x13c   :  { %v977_v30 = vadd.f32 %v1480_v24, %v936_v18  ;;  %v1483_v31 = vadd.f32 %v1482_v29, %v1481_v26  ;;  %v1504_v32 = vpop.f32.mrb[11].mxu1 }
 0x13d   :  { %v1505_v33 = vadd.f32 %v1504_v32, %v1503_v28 }
 0x13e   :  { %v1018_v34 = vadd.f32 %v1502_v27, %v977_v30  ;;  %v980_v35 = vadd.f32 %v1483_v31, %v939_v20 }
 0x140   :  { %v1021_v36 = vadd.f32 %v1505_v33, %v980_v35 }
 0x158   :  { %v1522_v37 = vpop.f32.mrb[12].mxu0 }
 0x159   :  { %v1544_v38 = vpop.f32.mrb[12].mxu1  ;;  %v1523_v39 = vpop.f32.mrb[13].mxu0 }
 0x15a   :  { %v1524_v40 = vadd.f32 %v1523_v39, %v1522_v37  ;;  %v1545_v41 = vpop.f32.mrb[13].mxu1  ;;  %v1525_v42 = vpop.f32.mrb[14].mxu0 }
 0x15b   :  { %v1546_v43 = vadd.f32 %v1545_v41, %v1544_v38  ;;  %v1547_v44 = vpop.f32.mrb[14].mxu1  ;;  %v1526_v45 = vpop.f32.mrb[15].mxu0 }
 0x15c   :  { %v1059_v46 = vadd.f32 %v1524_v40, %v1018_v34  ;;  %v1527_v47 = vadd.f32 %v1526_v45, %v1525_v42  ;;  %v1548_v48 = vpop.f32.mrb[15].mxu1 }
 0x15d   :  { %v1549_v49 = vadd.f32 %v1548_v48, %v1547_v44 }
 0x15e   :  { %v1100_v50 = vadd.f32 %v1546_v43, %v1059_v46  ;;  %v1062_v51 = vadd.f32 %v1527_v47, %v1021_v36 }
 0x160   :  { %v1103_v52 = vadd.f32 %v1549_v49, %v1062_v51 }
 0x178   :  { %v1566_v53 = vpop.f32.mrb[16].mxu0 }
 0x179   :  { %v1588_v54 = vpop.f32.mrb[16].mxu1  ;;  %v1567_v55 = vpop.f32.mrb[17].mxu0 }
 0x17a   :  { %v1568_v56 = vadd.f32 %v1567_v55, %v1566_v53  ;;  %v1589_v57 = vpop.f32.mrb[17].mxu1  ;;  %v1569_v58 = vpop.f32.mrb[18].mxu0 }
 0x17b   :  { %v1590_v59 = vadd.f32 %v1589_v57, %v1588_v54  ;;  %v1591_v60 = vpop.f32.mrb[18].mxu1  ;;  %v1570_v61 = vpop.f32.mrb[19].mxu0 }
 0x17c   :  { %v1141_v62 = vadd.f32 %v1568_v56, %v1100_v50  ;;  %v1571_v63 = vadd.f32 %v1570_v61, %v1569_v58  ;;  %v1592_v0 = vpop.f32.mrb[19].mxu1 }
 0x17d   :  { %v1593_v1 = vadd.f32 %v1592_v0, %v1591_v60 }
 0x17e   :  { %v1182_v2 = vadd.f32 %v1590_v59, %v1141_v62  ;;  %v1144_v3 = vadd.f32 %v1571_v63, %v1103_v52 }
 0x180   :  { %v1185_v4 = vadd.f32 %v1593_v1, %v1144_v3 }
 0x198   :  { %v1610_v5 = vpop.f32.mrb[20].mxu0 }
 0x199   :  { %v1632_v6 = vpop.f32.mrb[20].mxu1  ;;  %v1611_v7 = vpop.f32.mrb[21].mxu0 }
 0x19a   :  { %v1612_v8 = vadd.f32 %v1611_v7, %v1610_v5  ;;  %v1633_v9 = vpop.f32.mrb[21].mxu1  ;;  %v1613_v10 = vpop.f32.mrb[22].mxu0 }
 0x19b   :  { %v1634_v11 = vadd.f32 %v1633_v9, %v1632_v6  ;;  %v1635_v12 = vpop.f32.mrb[22].mxu1  ;;  %v1614_v13 = vpop.f32.mrb[23].mxu0 }
 0x19c   :  { %v1223_v14 = vadd.f32 %v1612_v8, %v1182_v2  ;;  %v1615_v15 = vadd.f32 %v1614_v13, %v1613_v10  ;;  %v1636_v16 = vpop.f32.mrb[23].mxu1 }
 0x19d   :  { %v1637_v17 = vadd.f32 %v1636_v16, %v1635_v12 }
 0x19e   :  { %v1264_v18 = vadd.f32 %v1634_v11, %v1223_v14  ;;  %v1226_v19 = vadd.f32 %v1615_v15, %v1185_v4 }
 0x1a0   :  { %v1267_v20 = vadd.f32 %v1637_v17, %v1226_v19 }
 0x1b8   :  { %v1654_v21 = vpop.f32.mrb[24].mxu0 }
 0x1b9   :  { %v1676_v22 = vpop.f32.mrb[24].mxu1  ;;  %v1655_v23 = vpop.f32.mrb[25].mxu0 }
 0x1ba   :  { %v1656_v24 = vadd.f32 %v1655_v23, %v1654_v21  ;;  %v1677_v25 = vpop.f32.mrb[25].mxu1  ;;  %v1657_v26 = vpop.f32.mrb[26].mxu0 }
 0x1bb   :  { %v1678_v27 = vadd.f32 %v1677_v25, %v1676_v22  ;;  %v1679_v28 = vpop.f32.mrb[26].mxu1  ;;  %v1658_v29 = vpop.f32.mrb[27].mxu0 }
 0x1bc   :  { %v1305_v30 = vadd.f32 %v1656_v24, %v1264_v18  ;;  %v1659_v31 = vadd.f32 %v1658_v29, %v1657_v26  ;;  %v1680_v32 = vpop.f32.mrb[27].mxu1 }
 0x1bd   :  { %v1681_v33 = vadd.f32 %v1680_v32, %v1679_v28 }
 0x1be   :  { %v1346_v34 = vadd.f32 %v1678_v27, %v1305_v30  ;;  %v1308_v35 = vadd.f32 %v1659_v31, %v1267_v20 }
 0x1c0   :  { %v1372_v36 = vmul.f32 -1.442695, %v1346_v34  ;;  %v1349_v37 = vadd.f32 %v1681_v33, %v1308_v35 }
 0x1c2   :  { %1682 = vpow2.f32 %v1372_v36  ;;  %v1373_v38 = vmul.f32 -1.442695, %v1349_v37 }
 0x1c4   :  { %1684 = vpow2.f32 %v1373_v38 }
 0x1cc   :  { %v1683_v39 = vpop.eup %1682 }
 0x1cd   :  { %v1358_v40 = vadd.f32 1.0, %v1683_v39 }
 0x1ce   :  { %v1685_v41 = vpop.eup %1684 }
 0x1cf   :  { %1686 = vrcp.f32 %v1358_v40  ;;  %v1359_v42 = vadd.f32 1.0, %v1685_v41 }
 0x1d1   :  { %1688 = vrcp.f32 %v1359_v42 }
 0x1d9   :  { %v1687_v43 = vpop.eup %1686 }
 0x1da   :  { %1365 = vst.msk [vmem:[%s3234_s3] sm:$0xff] %vm1364_vm0, %v1687_v43 }
 0x1db   :  { %v1689_v44 = vpop.eup %1688 }
 0x1dc   :  { %1366 = vst.msk [vmem:[%s3234_s3 + $0x8] sm:$0xff] %vm1364_vm0, %v1689_v44 }

// kernel: onset_transformer_forward.19
= control target key start
LH: loop header
LB: loop body
LE: loop exit
PB: predicated region body
PF: predicated region fallthrough
CT: control target
= control target key end

     0   :  { %v161_v0 = vmov 0.0   ;;  %vm162_vm0 = vmmov 0   ;;  %vm40_vm1 = vcmask 261120   ;;  %s244_s1 = inlined_call_operand.vmem [shape: f32[32,32], index: 1, kind: input, shape index: {}]   ;;  %s245_s0 = inlined_call_operand.vmem [shape: f32[16,32], index: 0, kind: input, shape index: {}]   ;;  %s246_s2 = inlined_call_operand.vmem [shape: f32[1,32], index: 2, kind: input, shape index: {}]   ;;  %s247_s3 = inlined_call_operand.vmem [shape: f32[16,32], index: 3, kind: input, shape index: {}]   ;;  %s248_s4 = inlined_call_operand.vmem [shape: f32[1,32], index: 4, kind: input, shape index: {}]   ;;  %s249_s5 = inlined_call_operand.vmem [shape: f32[1,32], index: 5, kind: input, shape index: {}]   ;;  %s250_s6 = inlined_call_operand.vmem [shape: f32[16,32], index: 6, kind: output, shape index: {}]  }
   0x1   :  { %147 = vmatprep.subr.bf16.mxu0 %v161_v0  ;;  %v27_v1 = vld [vmem:[%s244_s1] sm:$0xff]  ;;  %v28_v2 = vld [vmem:[%s244_s1 + $0x8] sm:$0xff]  ;;  %v29_v3 = vld [vmem:[%s244_s1 + $0x10] sm:$0xff]  ;;  %151 = vmatprep.mubr.msk.bf16.mxu0 %vm162_vm0, %v161_v0 }
   0x2   :  { %v31_v4 = vpack.c.bf16 %v28_v2, %v27_v1  ;;  %v30_v5 = vld [vmem:[%s244_s1 + $0x18] sm:$0xff]  ;;  %v24_v7 = vld [vmem:[%s245_s0] sm:$0xff]  ;;  %v25_v8 = vld [vmem:[%s245_s0 + $0x8] sm:$0xff] }
   0x3   :  { %v32_v6 = vpack.c.bf16 %v30_v5, %v29_v3  ;;  %v26_v9 = vpack.c.bf16 %v25_v8, %v24_v7  ;;  %v140_v10 = vld [vmem:[%s246_s2] ss:$0 sm:$0xff]  ;;  %v86_v16 = vld [vmem:[%s247_s3 + $0x8] sm:$0xff] }
   0x4   :  { %148 = vmatpush3.bf16.msra.mxu0 %v31_v4  ;;  %v85_v12 = vld [vmem:[%s247_s3] sm:$0xff] }
   0x5   :  { %149 = vmatprep.subr.bf16.mxu0 %v161_v0  ;;  %v142_v40 = vld [vmem:[%s248_s4] ss:$0 sm:$0xff] }
   0x6   :  { %v143_v42 = vld [vmem:[%s249_s5] ss:$0 sm:$0xff] }
   0x8   :  { %150 = vmatpush3.bf16.msra.mxu0 %v32_v6 }
   0xb   :  { %152 = vmatmul.mubr.msk.bf16.vlgmr.msra.gmra.mrb[0].mxu0 %vm40_vm1, %v26_v9 }
  0xde   :  { %v78_v11 = vpop.f32.mrb[0].mxu0 }
  0xdf   :  { %v79_v13 = vadd.f32 %v140_v10, %v78_v11  ;;  %v153_v14 = vpop.f32.mrb[1].mxu0 }
  0xe0   :  { %v81_v15 = vpop.f32.mrb[2].mxu0 }
  0xe1   :  { %v82_v17 = vadd.f32 %v140_v10, %v81_v15  ;;  %v154_v18 = vpop.f32.mrb[3].mxu0  ;;  %v87_v19 = vadd.f32 %v85_v12, %v79_v13 }
  0xe3   :  { %v89_v20 = vsel %vm40_vm1, %v87_v19, 0.0  ;;  %v88_v21 = vadd.f32 %v86_v16, %v82_v17 }
  0xe4   :  { %90 = vadd.xlane.f32.xlu0 %v89_v20 }
  0xe5   :  { %v92_v22 = vsel %vm40_vm1, %v88_v21, 0.0 }
  0xe8   :  { %93 = vadd.xlane.f32.xlu0 %v92_v22 }
 0x171   :  { %v91_v23 = vpop.xlane.xlu0 %90 }
 0x172   :  { %v96_v24 = vmul.f32 0.03125, %v91_v23 }
 0x174   :  { %v98_v25 = vsub.f32 %v87_v19, %v96_v24 }
 0x175   :  { %v94_v26 = vpop.xlane.xlu0 %93 }
 0x176   :  { %v97_v27 = vmul.f32 0.03125, %v94_v26  ;;  %v100_v28 = vmul.f32 %v98_v25, %v98_v25 }
 0x178   :  { %v99_v29 = vsub.f32 %v88_v21, %v97_v27  ;;  %v102_v30 = vsel %vm40_vm1, %v100_v28, 0.0 }
 0x179   :  { %103 = vadd.xlane.f32.xlu1 %v102_v30 }
 0x17a   :  { %v101_v31 = vmul.f32 %v99_v29, %v99_v29 }
 0x17c   :  { %v105_v32 = vsel %vm40_vm1, %v101_v31, 0.0 }
 0x17d   :  { %106 = vadd.xlane.f32.xlu1 %v105_v32 }
 0x206   :  { %v104_v33 = vpop.xlane.xlu1 %103 }
 0x207   :  { %v108_v34 = vmul.f32 0.03125, %v104_v33 }
 0x209   :  { %v110_v35 = vadd.f32 1e-05, %v108_v34 }
 0x20a   :  { %v107_v36 = vpop.xlane.xlu1 %106 }
 0x20b   :  { %157 = vrsqrt.f32 %v110_v35  ;;  %v109_v37 = vmul.f32 0.03125, %v107_v36 }
 0x20d   :  { %v111_v38 = vadd.f32 1e-05, %v109_v37 }
 0x20f   :  { %159 = vrsqrt.f32 %v111_v38 }
 0x215   :  { %v158_v39 = vpop.eup %157 }
 0x216   :  { %v114_v41 = vmul.f32 %v158_v39, %v98_v25 }
 0x218   :  { %v123_v43 = vmul.f32 %v142_v40, %v114_v41 }
 0x219   :  { %v160_v44 = vpop.eup %159 }
 0x21a   :  { %v132_v45 = vadd.f32 %v143_v42, %v123_v43  ;;  %v115_v46 = vmul.f32 %v160_v44, %v99_v29 }
 0x21c   :  { %134 = vst.msk [vmem:[%s250_s6] sm:$0xff] %vm40_vm1, %v132_v45  ;;  %v124_v47 = vmul.f32 %v142_v40, %v115_v46 }
 0x21e   :  { %v133_v48 = vadd.f32 %v143_v42, %v124_v47 }
 0x220   :  { %135 = vst.msk [vmem:[%s250_s6 + $0x8] sm:$0xff] %vm40_vm1, %v133_v48 }

// kernel: onset_transformer_forward.20
= control target key start
LH: loop header
LB: loop body
LE: loop exit
PB: predicated region body
PF: predicated region fallthrough
CT: control target
= control target key end

     0   :  { %v248_v0 = vmov 0.0   ;;  %vm249_vm0 = vmmov 0   ;;  %vm43_vm1 = vcmask 261120   ;;  %vm110_vm2 = vcmask 523264   ;;  %s357_s1 = inlined_call_operand.vmem [shape: f32[32,64], index: 1, kind: input, shape index: {}]   ;;  %s358_s3 = inlined_call_operand.vmem [shape: f32[64,32], index: 3, kind: input, shape index: {}]   ;;  %s359_s0 = inlined_call_operand.vmem [shape: f32[16,32], index: 0, kind: input, shape index: {}]   ;;  %s360_s2 = inlined_call_operand.vmem [shape: f32[1,64], index: 2, kind: input, shape index: {}]   ;;  %s361_s4 = inlined_call_operand.vmem [shape: f32[1,32], index: 4, kind: input, shape index: {}]   ;;  %s362_s5 = inlined_call_operand.vmem [shape: f32[1,32], index: 5, kind: input, shape index: {}]   ;;  %s363_s6 = inlined_call_operand.vmem [shape: f32[1,32], index: 6, kind: input, shape index: {}]   ;;  %s364_s7 = inlined_call_operand.vmem [shape: f32[16,32], index: 7, kind: output, shape index: {}]  }
   0x1   :  { %222 = vmatprep.subr.bf16.mxu0 %v248_v0  ;;  %v30_v1 = vld [vmem:[%s357_s1] sm:$0xff]  ;;  %v31_v2 = vld [vmem:[%s357_s1 + $0x8] sm:$0xff]  ;;  %v32_v3 = vld [vmem:[%s357_s1 + $0x10] sm:$0xff]  ;;  %226 = vmatprep.mubr.msk.bf16.mxu0 %vm249_vm0, %v248_v0 }
   0x2   :  { %v34_v4 = vpack.c.bf16 %v31_v2, %v30_v1  ;;  %v33_v5 = vld [vmem:[%s357_s1 + $0x18] sm:$0xff]  ;;  %230 = vmatprep.subr.bf16.mxu1 %v248_v0  ;;  %238 = vmatprep.mubr.msk.bf16.mxu1 %vm249_vm0, %v248_v0  ;;  %v91_v6 = vld [vmem:[%s358_s3] sm:$0xff]  ;;  %v92_v7 = vld [vmem:[%s358_s3 + $0x8] sm:$0xff] }
   0x3   :  { %v93_v8 = vld [vmem:[%s358_s3 + $0x10] sm:$0xff]  ;;  %v35_v9 = vpack.c.bf16 %v33_v5, %v32_v3  ;;  %v27_v10 = vld [vmem:[%s359_s0] sm:$0xff]  ;;  %v28_v11 = vld [vmem:[%s359_s0 + $0x8] sm:$0xff]  ;;  %v99_v12 = vpack.c.bf16 %v92_v7, %v91_v6 }
   0x4   :  { %223 = vmatpush3.bf16.msra.mxu0 %v34_v4  ;;  %v94_v13 = vld [vmem:[%s358_s3 + $0x18] sm:$0xff]  ;;  %v29_v15 = vpack.c.bf16 %v28_v11, %v27_v10  ;;  %v95_v16 = vld [vmem:[%s358_s3 + $0x20] sm:$0xff]  ;;  %v96_v17 = vld [vmem:[%s358_s3 + $0x28] sm:$0xff] }
   0x5   :  { %224 = vmatprep.subr.bf16.mxu0 %v248_v0  ;;  %231 = vmatpush3.bf16.msra.mxu1 %v99_v12  ;;  %v100_v14 = vpack.c.bf16 %v94_v13, %v93_v8  ;;  %v101_v18 = vpack.c.bf16 %v96_v17, %v95_v16  ;;  %v97_v19 = vld [vmem:[%s358_s3 + $0x30] sm:$0xff]  ;;  %v98_v20 = vld [vmem:[%s358_s3 + $0x38] sm:$0xff]  ;;  %v208_v22 = vld [vmem:[%s360_s2] ss:$0 sm:$0xff] }
   0x6   :  { %232 = vmatprep.subr.bf16.mxu1 %v248_v0  ;;  %v102_v21 = vpack.c.bf16 %v98_v20, %v97_v19  ;;  %v210_v32 = vld [vmem:[%s361_s4] ss:$0 sm:$0xff] }
   0x7   :  { %v212_v60 = vld [vmem:[%s362_s5] ss:$0 sm:$0xff] }
   0x8   :  { %225 = vmatpush3.bf16.msra.mxu0 %v35_v9  ;;  %v213_v62 = vld [vmem:[%s363_s6] ss:$0 sm:$0xff] }
   0x9   :  { %233 = vmatpush3.bf16.msra.mxu1 %v100_v14 }
   0xa   :  { %234 = vmatprep.subr.bf16.mxu1 %v248_v0 }
   0xb   :  { %227 = vmatmul.mubr.msk.bf16.vlgmr.msra.gmra.mrb[0].mxu0 %vm43_vm1, %v29_v15 }
   0xd   :  { %235 = vmatpush3.bf16.msra.mxu1 %v101_v18 }
   0xe   :  { %236 = vmatprep.subr.bf16.mxu1 %v248_v0 }
  0x11   :  { %237 = vmatpush3.bf16.msra.mxu1 %v102_v21 }
  0xde   :  { %v81_v23 = vpop.f32.mrb[0].mxu0 }
  0xdf   :  { %v82_v24 = vadd.f32 %v208_v22, %v81_v23  ;;  %v228_v25 = vpop.f32.mrb[1].mxu0 }
  0xe0   :  { %v84_v26 = vpop.f32.mrb[2].mxu0 }
  0xe1   :  { %v85_v27 = vadd.f32 %v208_v22, %v84_v26  ;;  %v229_v28 = vpop.f32.mrb[3].mxu0  ;;  %v88_v29 = vmax.f32 %v82_v24, 0.0 }
  0xe3   :  { %v89_v30 = vmax.f32 %v85_v27, 0.0 }
  0xe5   :  { %v90_v31 = vpack.c.bf16 %v89_v30, %v88_v29 }
  0xe7   :  { %239 = vmatmul.mubr.msk.bf16.vlgmr.msra.gmra.mrb[0].mxu1 %vm110_vm2, %v90_v31 }
 0x1ba   :  { %v148_v33 = vpop.f32.mrb[0].mxu1 }
 0x1bb   :  { %v149_v34 = vadd.f32 %v210_v32, %v148_v33  ;;  %v240_v35 = vpop.f32.mrb[1].mxu1 }
 0x1bc   :  { %v151_v36 = vpop.f32.mrb[2].mxu1 }
 0x1bd   :  { %v152_v37 = vadd.f32 %v210_v32, %v151_v36  ;;  %v241_v38 = vpop.f32.mrb[3].mxu1  ;;  %v155_v39 = vadd.f32 %v149_v34, %v27_v10 }
 0x1bf   :  { %v157_v40 = vsel %vm43_vm1, %v155_v39, 0.0  ;;  %v156_v41 = vadd.f32 %v152_v37, %v28_v11 }
 0x1c0   :  { %158 = vadd.xlane.f32.xlu0 %v157_v40 }
 0x1c1   :  { %v160_v42 = vsel %vm43_vm1, %v156_v41, 0.0 }
 0x1c4   :  { %161 = vadd.xlane.f32.xlu0 %v160_v42 }
 0x24d   :  { %v159_v43 = vpop.xlane.xlu0 %158 }
 0x24e   :  { %v164_v44 = vmul.f32 0.03125, %v159_v43 }
 0x250   :  { %v166_v45 = vsub.f32 %v155_v39, %v164_v44 }
 0x251   :  { %v162_v46 = vpop.xlane.xlu0 %161 }
 0x252   :  { %v165_v47 = vmul.f32 0.03125, %v162_v46  ;;  %v168_v48 = vmul.f32 %v166_v45, %v166_v45 }
 0x254   :  { %v167_v49 = vsub.f32 %v156_v41, %v165_v47  ;;  %v170_v50 = vsel %vm43_vm1, %v168_v48, 0.0 }
 0x255   :  { %171 = vadd.xlane.f32.xlu1 %v170_v50 }
 0x256   :  { %v169_v51 = vmul.f32 %v167_v49, %v167_v49 }
 0x258   :  { %v173_v52 = vsel %vm43_vm1, %v169_v51, 0.0 }
 0x259   :  { %174 = vadd.xlane.f32.xlu1 %v173_v52 }
 0x2e2   :  { %v172_v53 = vpop.xlane.xlu1 %171 }
 0x2e3   :  { %v176_v54 = vmul.f32 0.03125, %v172_v53 }
 0x2e5   :  { %v178_v55 = vadd.f32 1e-05, %v176_v54 }
 0x2e6   :  { %v175_v56 = vpop.xlane.xlu1 %174 }
 0x2e7   :  { %244 = vrsqrt.f32 %v178_v55  ;;  %v177_v57 = vmul.f32 0.03125, %v175_v56 }
 0x2e9   :  { %v179_v58 = vadd.f32 1e-05, %v177_v57 }
 0x2eb   :  { %246 = vrsqrt.f32 %v179_v58 }
 0x2f1   :  { %v245_v59 = vpop.eup %244 }
 0x2f2   :  { %v182_v61 = vmul.f32 %v245_v59, %v166_v45 }
 0x2f4   :  { %v191_v63 = vmul.f32 %v212_v60, %v182_v61 }
 0x2f5   :  { %v247_v0 = vpop.eup %246 }
 0x2f6   :  { %v200_v1 = vadd.f32 %v213_v62, %v191_v63  ;;  %v183_v2 = vmul.f32 %v247_v0, %v167_v49 }
 0x2f8   :  { %202 = vst.msk [vmem:[%s364_s7] sm:$0xff] %vm43_vm1, %v200_v1  ;;  %v192_v3 = vmul.f32 %v212_v60, %v183_v2 }
 0x2fa   :  { %v201_v4 = vadd.f32 %v213_v62, %v192_v3 }
 0x2fc   :  { %203 = vst.msk [vmem:[%s364_s7 + $0x8] sm:$0xff] %vm43_vm1, %v201_v4 }

// kernel: onset_transformer_forward.18
= control target key start
LH: loop header
LB: loop body
LE: loop exit
PB: predicated region body
PF: predicated region fallthrough
CT: control target
= control target key end

     0   :  { %s677_s15 = smov 0   ;;  %s729_s0 = inlined_call_operand.vmem [shape: f32[2,8,32], index: 0, kind: input, shape index: {}]   ;;  %s730_s1 = inlined_call_operand.vmem [shape: f32[2,8,32], index: 1, kind: input, shape index: {}]   ;;  %s731_s2 = inlined_call_operand.vmem [shape: f32[2,8,32], index: 2, kind: input, shape index: {}]   ;;  %s732_s3 = inlined_call_operand.vmem [shape: f32[2,1,8], index: 3, kind: input, shape index: {}]   ;;  %s733_s4 = inlined_call_operand.vmem [shape: f32[2,8,32], index: 4, kind: output, shape index: {}]  }
   0x1 LB: > { %s572_s16 = sadd.s32 4294967295, %s646_s15   ;;  %p576_p0 = scmp.ge.s32.totalorder %s646_s15, 1  ;;  %s646_s15 = sphi %s677_s15, %s14_s15  }
   0x2   : > { %p187_p1 = scmp.lt.s32.totalorder %s646_s15, 3 }
   0x4   : > { %p188_p2 = pnand %p576_p0, %p187_p1 }
   0x5   : > { %p222_p3 = scmp.lt.s32.totalorder (!%p188_p2), %s572_s16, 1  ;;  %v648_v0 = vmov (!%p188_p2), 0.0   ;;  %vm649_vm0 = vmmov (!%p188_p2), 0   ;;  %vm249_vm1 = vcmask (!%p188_p2), 130048   ;;  %vm304_vm2 = vcmask (!%p188_p2), 64512   ;;  %s650_s27 = smov (!%p188_p2), 112  }
   0x6   : > { %191 = sbr.rel (%p188_p2) target bundleno = 1428 (0x594), region = 36  ;;  %596 = vmatprep.subr.bf16.mxu0 (!%p188_p2), %v648_v0  ;;  %598 = vmatprep.mubr.msk.bf16.mxu0 (!%p188_p2), %vm649_vm0, %v648_v0  ;;  %vm320_vm3 = vcmask (!%p188_p2), 1043456   ;;  %s651_s5 = smov (!%p188_p2), 16   ;;  %vm484_vm4 = vcmask (!%p188_p2), 261120  }
   0x7   : > { %602 = vmatprep.subr.bf16.mxu1 (!%p188_p2), %v648_v0  ;;  %604 = vmatprep.mubr.msk.bf16.mxu1 (!%p188_p2), %vm649_vm0, %v648_v0 }
   0xd   : > { %s735_s16 = smov (!%p222_p3, %s572_s16), 1 }
   0xe   : > { %s687_s17 = sshll.u32 %s735_s16, 3  ;;  %s236_s26 = scalar_lea.vmem %s732_s3, %s735_s16 }
   0xf   : > { %s229_s20 = scalar_lea.vmem %s730_s1, %s687_s17  ;;  %s225_s23 = scalar_lea.vmem %s729_s0, %s687_s17  ;;  %v582_v7 = vld [vmem:[%s236_s26] ss:$0 sm:$0xff] }
  0x10   : > { %v243_v1 = vld [vmem:[%s229_s20] sm:$0xff]  ;;  %s233_s30 = scalar_lea.vmem %s731_s2, %s687_s17  ;;  %s240_s8 = scalar_lea.vmem %s733_s4, %s687_s17 }
  0x11   : > { %v247_v2 = vpack.c.bf16 %v243_v1, %v243_v1  ;;  %v242_v4 = vld [vmem:[%s225_s23] sm:$0xff] }
  0x12   : > { %v246_v5 = vpack.c.bf16 %v242_v4, %v242_v4  ;;  %v244_v19 = vld [vmem:[%s233_s30] sm:$0xff] }
  0x13   : > { %v254_v3 = vsel %vm249_vm1, %v247_v2, 0  ;;  %368 = vrot.lane.b32.xlu1 %v247_v2, %s650_s27  ;;  %v248_v20 = vpack.c.bf16 %v244_v19, %v244_v19 }
  0x14   : > { %597 = vmatpush3.bf16.xpose.msra.mxu0 %v254_v3 }
  0x15   : > { %614 = vmatprep.subr.bf16.mxu0 %v648_v0  ;;  %v322_v21 = vsel %vm320_vm3, %v248_v20, 0 }
  0x16   : > { %603 = vmatpush3.bf16.msra.mxu1 %v322_v21 }
  0x17   : > { %365 = vrot.lane.b32.xlu1 %v246_v5, %s650_s27  ;;  %608 = vmatprep.subr.bf16.mxu1 %v648_v0 }
  0x1b   : > { %599 = vmatmul.mubr.msk.bf16.vlgmr.msra.gmra.mrb[0].mxu0 %vm249_vm1, %v246_v5 }
  0x1c   : > { %616 = vmatprep.mubr.msk.bf16.mxu0 %vm649_vm0, %v648_v0 }
  0x85   : > { %v369_v24 = vpop.permute.xlu1 %368 }
  0x86   : > { %v374_v26 = vsel %vm249_vm1, %v369_v24, 0 }
  0x89   : > { %v366_v28 = vpop.permute.xlu1 %365 }
  0xee   : > { %v290_v6 = vpop.f32.mrb[0].mxu0 }
  0xef   : > { %v296_v8 = vmul.f32 0.25, %v290_v6  ;;  %v600_v9 = vpop.f32.mrb[1].mxu0 }
  0xf0   : > { %v293_v10 = vpop.f32.mrb[2].mxu0 }
  0xf1   : > { %v601_v11 = vpop.f32.mrb[3].mxu0  ;;  %v303_v12 = vadd.f32 %v582_v7, %v296_v8 }
  0xf3   : > { %v305_v13 = vsel %vm304_vm2, %v303_v12, -inf }
  0xf4   : > { %306 = vmax.xlane.f32.xlu0 %v305_v13 }
 0x181   : > { %v307_v14 = vpop.xlane.xlu0 %306 }
 0x182   : > { %v308_v15 = vsub.f32 %v303_v12, %v307_v14 }
 0x184   : > { %v309_v16 = vmul.f32 1.442695, %v308_v15 }
 0x186   : > { %632 = vpow2.f32 %v309_v16 }
 0x190   : > { %v633_v17 = vpop.eup %632 }
 0x191   : > { %v311_v18 = vsel %vm304_vm2, %v633_v17, 0.0 }
 0x192   : > { %312 = vadd.xlane.f32.xlu0 %v311_v18 }
 0x21f   : > { %v313_v22 = vpop.xlane.xlu0 %312 }
 0x220   : > { %634 = vrcp.f32 %v313_v22 }
 0x22a   : > { %v635_v23 = vpop.eup %634 }
 0x22b   : > { %v315_v25 = vmul.f32 %v635_v23, %v633_v17 }
 0x22d   : > { %v316_v27 = vpack.c.bf16 %v315_v25, %v315_v25 }
 0x22f   : > { %605 = vmatmul.mubr.msk.bf16.vlgmr.msra.gmra.mrb[0].mxu1 %vm304_vm2, %v316_v27 }
 0x230   : > { %609 = vmatpush3.bf16.xpose.msra.mxu1 %v374_v26  ;;  %610 = vmatprep.mubr.msk.bf16.mxu1 %vm649_vm0, %v648_v0 }
 0x237   : > { %611 = vmatmul.mubr.msk.bf16.vlgmr.msra.gmra.mrb[4].mxu1 %vm249_vm1, %v366_v28 }
 0x302   : > { %v358_v29 = vpop.f32.mrb[0].mxu1 }
 0x303   : > { %v606_v30 = vpop.f32.mrb[1].mxu1 }
 0x304   : > { %v361_v31 = vpop.f32.mrb[2].mxu1 }
 0x305   : > { %v607_v32 = vpop.f32.mrb[3].mxu1 }
 0x30a   : > { %v410_v33 = vpop.f32.mrb[4].mxu1 }
 0x30b   : > { %v416_v34 = vmul.f32 0.25, %v410_v33  ;;  %v612_v35 = vpop.f32.mrb[5].mxu1 }
 0x30c   : > { %v413_v36 = vpop.f32.mrb[6].mxu1 }
 0x30d   : > { %v613_v37 = vpop.f32.mrb[7].mxu1  ;;  %v417_v38 = vadd.f32 %v582_v7, %v416_v34 }
 0x30f   : > { %v418_v39 = vsel %vm304_vm2, %v417_v38, -inf }
 0x310   : > { %419 = vmax.xlane.f32.xlu0 %v418_v39 }
 0x326   : > { %431 = vrot.lane.b32.xlu0 %v248_v20, %s650_s27 }
 0x39d   : > { %v420_v40 = vpop.xlane.xlu0 %419 }
 0x39e   : > { %v421_v41 = vsub.f32 %v417_v38, %v420_v40 }
 0x3a0   : > { %v422_v42 = vmul.f32 1.442695, %v421_v41 }
 0x3a1   : > { %v432_v45 = vpop.permute.xlu0 %431 }
 0x3a2   : > { %636 = vpow2.f32 %v422_v42  ;;  %v437_v46 = vsel %vm320_vm3, %v432_v45, 0 }
 0x3a3   : > { %615 = vmatpush3.bf16.msra.mxu0 %v437_v46 }
 0x3ac   : > { %v637_v43 = vpop.eup %636 }
 0x3ad   : > { %v424_v44 = vsel %vm304_vm2, %v637_v43, 0.0 }
 0x3ae   : > { %425 = vadd.xlane.f32.xlu1 %v424_v44 }
 0x43b   : > { %v426_v47 = vpop.xlane.xlu1 %425 }
 0x43c   : > { %638 = vrcp.f32 %v426_v47 }
 0x446   : > { %v639_v48 = vpop.eup %638 }
 0x447   : > { %v428_v49 = vmul.f32 %v639_v48, %v637_v43 }
 0x449   : > { %v429_v50 = vpack.c.bf16 %v428_v49, %v428_v49 }
 0x44b   : > { %617 = vmatmul.mubr.msk.bf16.vlgmr.msra.gmra.mrb[4].mxu0 %vm304_vm2, %v429_v50 }
 0x51e   : > { %v473_v51 = vpop.f32.mrb[4].mxu0 }
 0x51f   : > { %480 = vrot.lane.b32.xlu0 %v473_v51, %s651_s5  ;;  %v618_v52 = vpop.f32.mrb[5].mxu0 }
 0x520   : > { %v476_v53 = vpop.f32.mrb[6].mxu0 }
 0x521   : > { %v619_v54 = vpop.f32.mrb[7].mxu0 }
 0x591   : > { %v481_v55 = vpop.permute.xlu0 %480 }
 0x592   : > { %v483_v56 = vsel %vm249_vm1, %v358_v29, %v481_v55 }
 0x593   : > { %485 = vst.msk [vmem:[%s240_s8] sm:$0xff] %vm484_vm4, %v483_v56 }
 0x594 PF: > { %s14_s15 = sadd.s32 1, %s646_s15  }
 0x595   : > { %p11_p4 = scmp.ge.s32.totalorder %s14_s15, 4  }
 0x597   :  { %13 = sbr.rel (!%p11_p4) target bundleno = 1 (0x1), region = 75 }

// kernel: onset_transformer_forward.21
= control target key start
LH: loop header
LB: loop body
LE: loop exit
PB: predicated region body
PF: predicated region fallthrough
CT: control target
= control target key end

     0   :  { %vm16_vm0 = vcmask 261120   ;;  %s118_s0 = inlined_call_operand.vmem [shape: f32[16,32], index: 0, kind: input, shape index: {}]   ;;  %s119_s1 = inlined_call_operand.vmem [shape: f32[1,32], index: 1, kind: input, shape index: {}]   ;;  %s120_s2 = inlined_call_operand.vmem [shape: f32[1,32], index: 2, kind: input, shape index: {}]   ;;  %s121_s3 = inlined_call_operand.vmem [shape: f32[16,32], index: 3, kind: output, shape index: {}]  }
   0x1   :  { %v14_v0 = vld [vmem:[%s118_s0] sm:$0xff]  ;;  %v15_v1 = vld [vmem:[%s118_s0 + $0x8] sm:$0xff] }
   0x2   :  { %v17_v2 = vsel %vm16_vm0, %v14_v0, 0.0  ;;  %v20_v3 = vsel %vm16_vm0, %v15_v1, 0.0  ;;  %v68_v21 = vld [vmem:[%s119_s1] ss:$0 sm:$0xff] }
   0x3   :  { %18 = vadd.xlane.f32.xlu0 %v17_v2  ;;  %v69_v23 = vld [vmem:[%s120_s2] ss:$0 sm:$0xff] }
   0x7   :  { %21 = vadd.xlane.f32.xlu0 %v20_v3 }
  0x90   :  { %v19_v4 = vpop.xlane.xlu0 %18 }
  0x91   :  { %v24_v5 = vmul.f32 0.03125, %v19_v4 }
  0x93   :  { %v26_v6 = vsub.f32 %v14_v0, %v24_v5 }
  0x94   :  { %v22_v7 = vpop.xlane.xlu0 %21 }
  0x95   :  { %v25_v8 = vmul.f32 0.03125, %v22_v7  ;;  %v28_v9 = vmul.f32 %v26_v6, %v26_v6 }
  0x97   :  { %v27_v10 = vsub.f32 %v15_v1, %v25_v8  ;;  %v30_v11 = vsel %vm16_vm0, %v28_v9, 0.0 }
  0x98   :  { %31 = vadd.xlane.f32.xlu1 %v30_v11 }
  0x99   :  { %v29_v12 = vmul.f32 %v27_v10, %v27_v10 }
  0x9b   :  { %v33_v13 = vsel %vm16_vm0, %v29_v12, 0.0 }
  0x9c   :  { %34 = vadd.xlane.f32.xlu1 %v33_v13 }
 0x125   :  { %v32_v14 = vpop.xlane.xlu1 %31 }
 0x126   :  { %v36_v15 = vmul.f32 0.03125, %v32_v14 }
 0x128   :  { %v38_v16 = vadd.f32 1e-05, %v36_v15 }
 0x129   :  { %v35_v17 = vpop.xlane.xlu1 %34 }
 0x12a   :  { %70 = vrsqrt.f32 %v38_v16  ;;  %v37_v18 = vmul.f32 0.03125, %v35_v17 }
 0x12c   :  { %v39_v19 = vadd.f32 1e-05, %v37_v18 }
 0x12e   :  { %72 = vrsqrt.f32 %v39_v19 }
 0x134   :  { %v71_v20 = vpop.eup %70 }
 0x135   :  { %v42_v22 = vmul.f32 %v71_v20, %v26_v6 }
 0x137   :  { %v51_v24 = vmul.f32 %v68_v21, %v42_v22 }
 0x138   :  { %v73_v25 = vpop.eup %72 }
 0x139   :  { %v60_v26 = vadd.f32 %v69_v23, %v51_v24  ;;  %v43_v27 = vmul.f32 %v73_v25, %v27_v10 }
 0x13b   :  { %62 = vst.msk [vmem:[%s121_s3] sm:$0xff] %vm16_vm0, %v60_v26  ;;  %v52_v28 = vmul.f32 %v68_v21, %v43_v27 }
 0x13d   :  { %v61_v29 = vadd.f32 %v69_v23, %v52_v28 }
 0x13f   :  { %63 = vst.msk [vmem:[%s121_s3 + $0x8] sm:$0xff] %vm16_vm0, %v61_v29 }

// kernel: onset_transformer_forward.26
= control target key start
LH: loop header
LB: loop body
LE: loop exit
PB: predicated region body
PF: predicated region fallthrough
CT: control target
= control target key end

     0   :  { %v98_v0 = vmov 0.0   ;;  %vm99_vm0 = vmmov 0   ;;  %vm31_vm1 = vcmask 261120   ;;  %vm76_vm2 = vcmask 523264   ;;  %s147_s1 = inlined_call_operand.vmem [shape: f32[32,64], index: 1, kind: input, shape index: {}]   ;;  %s148_s0 = inlined_call_operand.vmem [shape: f32[16,32], index: 0, kind: input, shape index: {}]   ;;  %s149_s2 = inlined_call_operand.vmem [shape: f32[1,64], index: 2, kind: input, shape index: {}]   ;;  %s150_s3 = inlined_call_operand.vmem [shape: f32[16,64], index: 3, kind: output, shape index: {}]  }
   0x1   :  { %88 = vmatprep.subr.bf16.mxu0 %v98_v0  ;;  %v18_v1 = vld [vmem:[%s147_s1] sm:$0xff]  ;;  %v19_v2 = vld [vmem:[%s147_s1 + $0x8] sm:$0xff]  ;;  %v20_v3 = vld [vmem:[%s147_s1 + $0x10] sm:$0xff]  ;;  %92 = vmatprep.mubr.msk.bf16.mxu0 %vm99_vm0, %v98_v0 }
   0x2   :  { %v22_v4 = vpack.c.bf16 %v19_v2, %v18_v1  ;;  %v21_v5 = vld [vmem:[%s147_s1 + $0x18] sm:$0xff]  ;;  %v15_v7 = vld [vmem:[%s148_s0] sm:$0xff]  ;;  %v16_v8 = vld [vmem:[%s148_s0 + $0x8] sm:$0xff] }
   0x3   :  { %v23_v6 = vpack.c.bf16 %v21_v5, %v20_v3  ;;  %v17_v9 = vpack.c.bf16 %v16_v8, %v15_v7  ;;  %v83_v10 = vld [vmem:[%s149_s2] ss:$0 sm:$0xff] }
   0x4   :  { %89 = vmatpush3.bf16.msra.mxu0 %v22_v4 }
   0x5   :  { %90 = vmatprep.subr.bf16.mxu0 %v98_v0 }
   0x8   :  { %91 = vmatpush3.bf16.msra.mxu0 %v23_v6 }
   0xb   :  { %93 = vmatmul.mubr.msk.bf16.vlgmr.msra.gmra.mrb[0].mxu0 %vm31_vm1, %v17_v9 }
  0xde   :  { %v69_v11 = vpop.f32.mrb[0].mxu0 }
  0xdf   :  { %v70_v12 = vadd.f32 %v83_v10, %v69_v11  ;;  %v94_v13 = vpop.f32.mrb[1].mxu0 }
  0xe0   :  { %v72_v14 = vpop.f32.mrb[2].mxu0 }
  0xe1   :  { %77 = vst.msk [vmem:[%s150_s3] sm:$0xff] %vm76_vm2, %v70_v12  ;;  %v73_v15 = vadd.f32 %v83_v10, %v72_v14  ;;  %v95_v16 = vpop.f32.mrb[3].mxu0 }
  0xe3   :  { %78 = vst.msk [vmem:[%s150_s3 + $0x8] sm:$0xff] %vm76_vm2, %v73_v15 }

// kernel: onset_transformer_forward.27
= control target key start
LH: loop header
LB: loop body
LE: loop exit
PB: predicated region body
PF: predicated region fallthrough
CT: control target
= control target key end

     0   :  { %s613_s12 = smov 0   ;;  %s662_s0 = inlined_call_operand.vmem [shape: f32[2,6,32], index: 0, kind: input, shape index: {}]   ;;  %s663_s1 = inlined_call_operand.vmem [shape: f32[2,8,32], index: 1, kind: input, shape index: {}]   ;;  %s664_s2 = inlined_call_operand.vmem [shape: f32[2,8,32], index: 2, kind: input, shape index: {}]   ;;  %s665_s3 = inlined_call_operand.vmem [shape: f32[2,6,32], index: 3, kind: output, shape index: {}]  }
   0x1 LB: > { %s514_s13 = sadd.s32 4294967295, %s587_s12   ;;  %p518_p0 = scmp.ge.s32.totalorder %s587_s12, 1  ;;  %s587_s12 = sphi %s613_s12, %s13_s12  }
   0x2   : > { %p154_p1 = scmp.lt.s32.totalorder %s587_s12, 3 }
   0x4   : > { %p155_p2 = pnand %p518_p0, %p154_p1 }
   0x5   : > { %p184_p3 = scmp.lt.s32.totalorder (!%p155_p2), %s514_s13, 1  ;;  %v589_v0 = vmov (!%p155_p2), 0.0   ;;  %vm590_vm0 = vmmov (!%p155_p2), 0   ;;  %vm207_vm1 = vcmask (!%p155_p2), 130048   ;;  %vm255_vm2 = vcmask (!%p155_p2), 62464   ;;  %s591_s21 = smov (!%p155_p2), 112  }
   0x6   : > { %158 = sbr.rel (%p155_p2) target bundleno = 1424 (0x590), region = 32  ;;  %537 = vmatprep.subr.bf16.mxu0 (!%p155_p2), %v589_v0  ;;  %539 = vmatprep.mubr.msk.bf16.mxu0 (!%p155_p2), %vm590_vm0, %v589_v0  ;;  %vm272_vm3 = vcmask (!%p155_p2), 1043456   ;;  %vm268_vm4 = vcmask (!%p155_p2), 64512   ;;  %s592_s25 = smov (!%p155_p2), 16   ;;  %vm435_vm5 = vcmask (!%p155_p2), 259072  }
   0x7   : > { %543 = vmatprep.subr.bf16.mxu1 (!%p155_p2), %v589_v0  ;;  %545 = vmatprep.mubr.msk.bf16.mxu1 (!%p155_p2), %vm590_vm0, %v589_v0 }
   0xd   : > { %s667_s13 = smov (!%p184_p3, %s514_s13), 1 }
   0xe   : > { %s623_s14 = sshll.u32 %s667_s13, 3 }
   0xf   : > { %s191_s17 = scalar_lea.vmem %s663_s1, %s623_s14  ;;  %s187_s20 = scalar_lea.vmem %s662_s0, %s623_s14 }
  0x10   : > { %v202_v1 = vld [vmem:[%s191_s17] sm:$0xff]  ;;  %s195_s24 = scalar_lea.vmem %s664_s2, %s623_s14  ;;  %s199_s28 = scalar_lea.vmem %s665_s3, %s623_s14 }
  0x11   : > { %v205_v2 = vpack.c.bf16 %v202_v1, %v202_v1  ;;  %v201_v4 = vld [vmem:[%s187_s20] sm:$0x3f] }
  0x12   : > { %v204_v5 = vpack.c.bf16 %v201_v4, %v201_v4  ;;  %v203_v17 = vld [vmem:[%s195_s24] sm:$0xff] }
  0x13   : > { %v212_v3 = vsel %vm207_vm1, %v205_v2, 0  ;;  %320 = vrot.lane.b32.xlu1 %v205_v2, %s591_s21  ;;  %v206_v18 = vpack.c.bf16 %v203_v17, %v203_v17 }
  0x14   : > { %538 = vmatpush3.bf16.xpose.msra.mxu0 %v212_v3 }
  0x15   : > { %555 = vmatprep.subr.bf16.mxu0 %v589_v0  ;;  %v274_v19 = vsel %vm272_vm3, %v206_v18, 0 }
  0x16   : > { %544 = vmatpush3.bf16.msra.mxu1 %v274_v19 }
  0x17   : > { %317 = vrot.lane.b32.xlu1 %v204_v5, %s591_s21  ;;  %549 = vmatprep.subr.bf16.mxu1 %v589_v0 }
  0x1b   : > { %540 = vmatmul.mubr.msk.bf16.vlgmr.msra.gmra.mrb[0].mxu0 %vm207_vm1, %v204_v5 }
  0x1c   : > { %557 = vmatprep.mubr.msk.bf16.mxu0 %vm590_vm0, %v589_v0 }
  0x85   : > { %v321_v22 = vpop.permute.xlu1 %320 }
  0x86   : > { %v326_v24 = vsel %vm207_vm1, %v321_v22, 0 }
  0x89   : > { %v318_v26 = vpop.permute.xlu1 %317 }
  0xee   : > { %v248_v6 = vpop.f32.mrb[0].mxu0 }
  0xef   : > { %v254_v7 = vmul.f32 0.25, %v248_v6  ;;  %v541_v8 = vpop.f32.mrb[1].mxu0 }
  0xf0   : > { %v251_v9 = vpop.f32.mrb[2].mxu0 }
  0xf1   : > { %v542_v10 = vpop.f32.mrb[3].mxu0  ;;  %v256_v11 = vsel %vm255_vm2, %v254_v7, -inf }
  0xf2   : > { %257 = vmax.xlane.f32.xlu0 %v256_v11 }
 0x17f   : > { %v258_v12 = vpop.xlane.xlu0 %257 }
 0x180   : > { %v259_v13 = vsub.f32 %v254_v7, %v258_v12 }
 0x182   : > { %v260_v14 = vmul.f32 1.442695, %v259_v13 }
 0x184   : > { %573 = vpow2.f32 %v260_v14 }
 0x18e   : > { %v574_v15 = vpop.eup %573 }
 0x18f   : > { %v262_v16 = vsel %vm255_vm2, %v574_v15, 0.0 }
 0x190   : > { %263 = vadd.xlane.f32.xlu0 %v262_v16 }
 0x21d   : > { %v264_v20 = vpop.xlane.xlu0 %263 }
 0x21e   : > { %575 = vrcp.f32 %v264_v20 }
 0x228   : > { %v576_v21 = vpop.eup %575 }
 0x229   : > { %v266_v23 = vmul.f32 %v576_v21, %v574_v15 }
 0x22b   : > { %v267_v25 = vpack.c.bf16 %v266_v23, %v266_v23 }
 0x22d   : > { %546 = vmatmul.mubr.msk.bf16.vlgmr.msra.gmra.mrb[0].mxu1 %vm268_vm4, %v267_v25 }
 0x22e   : > { %550 = vmatpush3.bf16.xpose.msra.mxu1 %v326_v24  ;;  %551 = vmatprep.mubr.msk.bf16.mxu1 %vm590_vm0, %v589_v0 }
 0x235   : > { %552 = vmatmul.mubr.msk.bf16.vlgmr.msra.gmra.mrb[4].mxu1 %vm207_vm1, %v318_v26 }
 0x300   : > { %v310_v27 = vpop.f32.mrb[0].mxu1 }
 0x301   : > { %v547_v28 = vpop.f32.mrb[1].mxu1 }
 0x302   : > { %v313_v29 = vpop.f32.mrb[2].mxu1 }
 0x303   : > { %v548_v30 = vpop.f32.mrb[3].mxu1 }
 0x308   : > { %v362_v31 = vpop.f32.mrb[4].mxu1 }
 0x309   : > { %v368_v32 = vmul.f32 0.25, %v362_v31  ;;  %v553_v33 = vpop.f32.mrb[5].mxu1 }
 0x30a   : > { %v365_v34 = vpop.f32.mrb[6].mxu1 }
 0x30b   : > { %v554_v35 = vpop.f32.mrb[7].mxu1  ;;  %v369_v36 = vsel %vm255_vm2, %v368_v32, -inf }
 0x30c   : > { %370 = vmax.xlane.f32.xlu0 %v369_v36 }
 0x322   : > { %382 = vrot.lane.b32.xlu0 %v206_v18, %s591_s21 }
 0x399   : > { %v371_v37 = vpop.xlane.xlu0 %370 }
 0x39a   : > { %v372_v38 = vsub.f32 %v368_v32, %v371_v37 }
 0x39c   : > { %v373_v39 = vmul.f32 1.442695, %v372_v38 }
 0x39d   : > { %v383_v42 = vpop.permute.xlu0 %382 }
 0x39e   : > { %577 = vpow2.f32 %v373_v39  ;;  %v388_v43 = vsel %vm272_vm3, %v383_v42, 0 }
 0x39f   : > { %556 = vmatpush3.bf16.msra.mxu0 %v388_v43 }
 0x3a8   : > { %v578_v40 = vpop.eup %577 }
 0x3a9   : > { %v375_v41 = vsel %vm255_vm2, %v578_v40, 0.0 }
 0x3aa   : > { %376 = vadd.xlane.f32.xlu1 %v375_v41 }
 0x437   : > { %v377_v44 = vpop.xlane.xlu1 %376 }
 0x438   : > { %579 = vrcp.f32 %v377_v44 }
 0x442   : > { %v580_v45 = vpop.eup %579 }
 0x443   : > { %v379_v46 = vmul.f32 %v580_v45, %v578_v40 }
 0x445   : > { %v380_v47 = vpack.c.bf16 %v379_v46, %v379_v46 }
 0x447   : > { %558 = vmatmul.mubr.msk.bf16.vlgmr.msra.gmra.mrb[4].mxu0 %vm268_vm4, %v380_v47 }
 0x51a   : > { %v424_v48 = vpop.f32.mrb[4].mxu0 }
 0x51b   : > { %431 = vrot.lane.b32.xlu0 %v424_v48, %s592_s25  ;;  %v559_v49 = vpop.f32.mrb[5].mxu0 }
 0x51c   : > { %v427_v50 = vpop.f32.mrb[6].mxu0 }
 0x51d   : > { %v560_v51 = vpop.f32.mrb[7].mxu0 }
 0x58d   : > { %v432_v52 = vpop.permute.xlu0 %431 }
 0x58e   : > { %v434_v53 = vsel %vm207_vm1, %v310_v27, %v432_v52 }
 0x58f   : > { %436 = vst.msk [vmem:[%s199_s28] sm:$0x3f] %vm435_vm5, %v434_v53 }
 0x590 PF: > { %s13_s12 = sadd.s32 1, %s587_s12  }
 0x591   : > { %p10_p4 = scmp.ge.s32.totalorder %s13_s12, 4  }
 0x593   :  { %12 = sbr.rel (!%p10_p4) target bundleno = 1 (0x1), region = 68 }

// kernel: onset_transformer_forward.28
= control target key start
LH: loop header
LB: loop body
LE: loop exit
PB: predicated region body
PF: predicated region fallthrough
CT: control target
= control target key end

     0   :  { %v162_v0 = vmov 0.0   ;;  %vm163_vm0 = vmmov 0   ;;  %vm40_vm1 = vcmask 261120   ;;  %vm92_vm2 = vcmask 257024   ;;  %s245_s1 = inlined_call_operand.vmem [shape: f32[32,32], index: 1, kind: input, shape index: {}]   ;;  %s246_s0 = inlined_call_operand.vmem [shape: f32[12,32], index: 0, kind: input, shape index: {}]   ;;  %s247_s2 = inlined_call_operand.vmem [shape: f32[1,32], index: 2, kind: input, shape index: {}]   ;;  %s248_s3 = inlined_call_operand.vmem [shape: f32[12,32], index: 3, kind: input, shape index: {}]   ;;  %s249_s4 = inlined_call_operand.vmem [shape: f32[1,32], index: 4, kind: input, shape index: {}]   ;;  %s250_s5 = inlined_call_operand.vmem [shape: f32[1,32], index: 5, kind: input, shape index: {}]   ;;  %s251_s6 = inlined_call_operand.vmem [shape: f32[12,32], index: 6, kind: output, shape index: {}]  }
   0x1   :  { %148 = vmatprep.subr.bf16.mxu0 %v162_v0  ;;  %v27_v1 = vld [vmem:[%s245_s1] sm:$0xff]  ;;  %v28_v2 = vld [vmem:[%s245_s1 + $0x8] sm:$0xff]  ;;  %v29_v3 = vld [vmem:[%s245_s1 + $0x10] sm:$0xff]  ;;  %152 = vmatprep.mubr.msk.bf16.mxu0 %vm163_vm0, %v162_v0 }
   0x2   :  { %v31_v4 = vpack.c.bf16 %v28_v2, %v27_v1  ;;  %v30_v5 = vld [vmem:[%s245_s1 + $0x18] sm:$0xff]  ;;  %v24_v7 = vld [vmem:[%s246_s0] sm:$0xff]  ;;  %v25_v8 = vld [vmem:[%s246_s0 + $0x8] sm:$0xf] }
   0x3   :  { %v32_v6 = vpack.c.bf16 %v30_v5, %v29_v3  ;;  %v26_v9 = vpack.c.bf16 %v25_v8, %v24_v7  ;;  %v141_v10 = vld [vmem:[%s247_s2] ss:$0 sm:$0xff]  ;;  %v86_v16 = vld [vmem:[%s248_s3 + $0x8] sm:$0xf] }
   0x4   :  { %149 = vmatpush3.bf16.msra.mxu0 %v31_v4  ;;  %v85_v12 = vld [vmem:[%s248_s3] sm:$0xff] }
   0x5   :  { %150 = vmatprep.subr.bf16.mxu0 %v162_v0  ;;  %v143_v40 = vld [vmem:[%s249_s4] ss:$0 sm:$0xff] }
   0x6   :  { %v144_v42 = vld [vmem:[%s250_s5] ss:$0 sm:$0xff] }
   0x8   :  { %151 = vmatpush3.bf16.msra.mxu0 %v32_v6 }
   0xb   :  { %153 = vmatmul.mubr.msk.bf16.vlgmr.msra.gmra.mrb[0].mxu0 %vm40_vm1, %v26_v9 }
  0xde   :  { %v78_v11 = vpop.f32.mrb[0].mxu0 }
  0xdf   :  { %v79_v13 = vadd.f32 %v141_v10, %v78_v11  ;;  %v154_v14 = vpop.f32.mrb[1].mxu0 }
  0xe0   :  { %v81_v15 = vpop.f32.mrb[2].mxu0 }
  0xe1   :  { %v82_v17 = vadd.f32 %v141_v10, %v81_v15  ;;  %v155_v18 = vpop.f32.mrb[3].mxu0  ;;  %v87_v19 = vadd.f32 %v85_v12, %v79_v13 }
  0xe3   :  { %v89_v20 = vsel %vm40_vm1, %v87_v19, 0.0  ;;  %v88_v21 = vadd.f32 %v86_v16, %v82_v17 }
  0xe4   :  { %90 = vadd.xlane.f32.xlu0 %v89_v20 }
  0xe5   :  { %v93_v22 = vsel %vm92_vm2, %v88_v21, 0.0 }
  0xe8   :  { %94 = vadd.xlane.f32.xlu0 %v93_v22 }
 0x171   :  { %v91_v23 = vpop.xlane.xlu0 %90 }
 0x172   :  { %v97_v24 = vmul.f32 0.03125, %v91_v23 }
 0x174   :  { %v99_v25 = vsub.f32 %v87_v19, %v97_v24 }
 0x175   :  { %v95_v26 = vpop.xlane.xlu0 %94 }
 0x176   :  { %v98_v27 = vmul.f32 0.03125, %v95_v26  ;;  %v101_v28 = vmul.f32 %v99_v25, %v99_v25 }
 0x178   :  { %v100_v29 = vsub.f32 %v88_v21, %v98_v27  ;;  %v103_v30 = vsel %vm40_vm1, %v101_v28, 0.0 }
 0x179   :  { %104 = vadd.xlane.f32.xlu1 %v103_v30 }
 0x17a   :  { %v102_v31 = vmul.f32 %v100_v29, %v100_v29 }
 0x17c   :  { %v106_v32 = vsel %vm92_vm2, %v102_v31, 0.0 }
 0x17d   :  { %107 = vadd.xlane.f32.xlu1 %v106_v32 }
 0x206   :  { %v105_v33 = vpop.xlane.xlu1 %104 }
 0x207   :  { %v109_v34 = vmul.f32 0.03125, %v105_v33 }
 0x209   :  { %v111_v35 = vadd.f32 1e-05, %v109_v34 }
 0x20a   :  { %v108_v36 = vpop.xlane.xlu1 %107 }
 0x20b   :  { %158 = vrsqrt.f32 %v111_v35  ;;  %v110_v37 = vmul.f32 0.03125, %v108_v36 }
 0x20d   :  { %v112_v38 = vadd.f32 1e-05, %v110_v37 }
 0x20f   :  { %160 = vrsqrt.f32 %v112_v38 }
 0x215   :  { %v159_v39 = vpop.eup %158 }
 0x216   :  { %v115_v41 = vmul.f32 %v159_v39, %v99_v25 }
 0x218   :  { %v124_v43 = vmul.f32 %v143_v40, %v115_v41 }
 0x219   :  { %v161_v44 = vpop.eup %160 }
 0x21a   :  { %v133_v45 = vadd.f32 %v144_v42, %v124_v43  ;;  %v116_v46 = vmul.f32 %v161_v44, %v100_v29 }
 0x21c   :  { %135 = vst.msk [vmem:[%s251_s6] sm:$0xff] %vm40_vm1, %v133_v45  ;;  %v125_v47 = vmul.f32 %v143_v40, %v116_v46 }
 0x21e   :  { %v134_v48 = vadd.f32 %v144_v42, %v125_v47 }
 0x220   :  { %136 = vst.msk [vmem:[%s251_s6 + $0x8] sm:$0xf] %vm92_vm2, %v134_v48 }

// kernel: onset_transformer_forward.30
= control target key start
LH: loop header
LB: loop body
LE: loop exit
PB: predicated region body
PF: predicated region fallthrough
CT: control target
= control target key end

     0   :  { %vm16_vm0 = vcmask 261120   ;;  %vm20_vm1 = vcmask 257024   ;;  %s119_s0 = inlined_call_operand.vmem [shape: f32[12,32], index: 0, kind: input, shape index: {}]   ;;  %s120_s1 = inlined_call_operand.vmem [shape: f32[1,32], index: 1, kind: input, shape index: {}]   ;;  %s121_s2 = inlined_call_operand.vmem [shape: f32[1,32], index: 2, kind: input, shape index: {}]   ;;  %s122_s3 = inlined_call_operand.vmem [shape: f32[12,32], index: 3, kind: output, shape index: {}]  }
   0x1   :  { %v14_v0 = vld [vmem:[%s119_s0] sm:$0xff]  ;;  %v15_v1 = vld [vmem:[%s119_s0 + $0x8] sm:$0xf] }
   0x2   :  { %v17_v2 = vsel %vm16_vm0, %v14_v0, 0.0  ;;  %v21_v3 = vsel %vm20_vm1, %v15_v1, 0.0  ;;  %v69_v21 = vld [vmem:[%s120_s1] ss:$0 sm:$0xff] }
   0x3   :  { %18 = vadd.xlane.f32.xlu0 %v17_v2  ;;  %v70_v23 = vld [vmem:[%s121_s2] ss:$0 sm:$0xff] }
   0x7   :  { %22 = vadd.xlane.f32.xlu0 %v21_v3 }
  0x90   :  { %v19_v4 = vpop.xlane.xlu0 %18 }
  0x91   :  { %v25_v5 = vmul.f32 0.03125, %v19_v4 }
  0x93   :  { %v27_v6 = vsub.f32 %v14_v0, %v25_v5 }
  0x94   :  { %v23_v7 = vpop.xlane.xlu0 %22 }
  0x95   :  { %v26_v8 = vmul.f32 0.03125, %v23_v7  ;;  %v29_v9 = vmul.f32 %v27_v6, %v27_v6 }
  0x97   :  { %v28_v10 = vsub.f32 %v15_v1, %v26_v8  ;;  %v31_v11 = vsel %vm16_vm0, %v29_v9, 0.0 }
  0x98   :  { %32 = vadd.xlane.f32.xlu1 %v31_v11 }
  0x99   :  { %v30_v12 = vmul.f32 %v28_v10, %v28_v10 }
  0x9b   :  { %v34_v13 = vsel %vm20_vm1, %v30_v12, 0.0 }
  0x9c   :  { %35 = vadd.xlane.f32.xlu1 %v34_v13 }
 0x125   :  { %v33_v14 = vpop.xlane.xlu1 %32 }
 0x126   :  { %v37_v15 = vmul.f32 0.03125, %v33_v14 }
 0x128   :  { %v39_v16 = vadd.f32 1e-05, %v37_v15 }
 0x129   :  { %v36_v17 = vpop.xlane.xlu1 %35 }
 0x12a   :  { %71 = vrsqrt.f32 %v39_v16  ;;  %v38_v18 = vmul.f32 0.03125, %v36_v17 }
 0x12c   :  { %v40_v19 = vadd.f32 1e-05, %v38_v18 }
 0x12e   :  { %73 = vrsqrt.f32 %v40_v19 }
 0x134   :  { %v72_v20 = vpop.eup %71 }
 0x135   :  { %v43_v22 = vmul.f32 %v72_v20, %v27_v6 }
 0x137   :  { %v52_v24 = vmul.f32 %v69_v21, %v43_v22 }
 0x138   :  { %v74_v25 = vpop.eup %73 }
 0x139   :  { %v61_v26 = vadd.f32 %v70_v23, %v52_v24  ;;  %v44_v27 = vmul.f32 %v74_v25, %v28_v10 }
 0x13b   :  { %63 = vst.msk [vmem:[%s122_s3] sm:$0xff] %vm16_vm0, %v61_v26  ;;  %v53_v28 = vmul.f32 %v69_v21, %v44_v27 }
 0x13d   :  { %v62_v29 = vadd.f32 %v70_v23, %v53_v28 }
 0x13f   :  { %64 = vst.msk [vmem:[%s122_s3 + $0x8] sm:$0xf] %vm20_vm1, %v62_v29 }

// kernel: onset_transformer_forward.29
= control target key start
LH: loop header
LB: loop body
LE: loop exit
PB: predicated region body
PF: predicated region fallthrough
CT: control target
= control target key end

     0   :  { %v249_v0 = vmov 0.0   ;;  %vm250_vm0 = vmmov 0   ;;  %vm43_vm1 = vcmask 261120   ;;  %vm110_vm2 = vcmask 523264   ;;  %s358_s1 = inlined_call_operand.vmem [shape: f32[32,64], index: 1, kind: input, shape index: {}]   ;;  %s359_s3 = inlined_call_operand.vmem [shape: f32[64,32], index: 3, kind: input, shape index: {}]   ;;  %s360_s0 = inlined_call_operand.vmem [shape: f32[12,32], index: 0, kind: input, shape index: {}]   ;;  %s361_s2 = inlined_call_operand.vmem [shape: f32[1,64], index: 2, kind: input, shape index: {}]   ;;  %s362_s4 = inlined_call_operand.vmem [shape: f32[1,32], index: 4, kind: input, shape index: {}]   ;;  %s363_s5 = inlined_call_operand.vmem [shape: f32[1,32], index: 5, kind: input, shape index: {}]   ;;  %s364_s6 = inlined_call_operand.vmem [shape: f32[1,32], index: 6, kind: input, shape index: {}]   ;;  %s365_s7 = inlined_call_operand.vmem [shape: f32[12,32], index: 7, kind: output, shape index: {}]  }
   0x1   :  { %223 = vmatprep.subr.bf16.mxu0 %v249_v0  ;;  %v30_v1 = vld [vmem:[%s358_s1] sm:$0xff]  ;;  %v31_v2 = vld [vmem:[%s358_s1 + $0x8] sm:$0xff]  ;;  %v32_v3 = vld [vmem:[%s358_s1 + $0x10] sm:$0xff]  ;;  %227 = vmatprep.mubr.msk.bf16.mxu0 %vm250_vm0, %v249_v0  ;;  %vm160_vm3 = vcmask 257024  }
   0x2   :  { %v34_v4 = vpack.c.bf16 %v31_v2, %v30_v1  ;;  %v33_v5 = vld [vmem:[%s358_s1 + $0x18] sm:$0xff]  ;;  %231 = vmatprep.subr.bf16.mxu1 %v249_v0  ;;  %239 = vmatprep.mubr.msk.bf16.mxu1 %vm250_vm0, %v249_v0  ;;  %v91_v6 = vld [vmem:[%s359_s3] sm:$0xff]  ;;  %v92_v7 = vld [vmem:[%s359_s3 + $0x8] sm:$0xff] }
   0x3   :  { %v93_v8 = vld [vmem:[%s359_s3 + $0x10] sm:$0xff]  ;;  %v35_v9 = vpack.c.bf16 %v33_v5, %v32_v3  ;;  %v27_v10 = vld [vmem:[%s360_s0] sm:$0xff]  ;;  %v28_v11 = vld [vmem:[%s360_s0 + $0x8] sm:$0xf]  ;;  %v99_v12 = vpack.c.bf16 %v92_v7, %v91_v6 }
   0x4   :  { %224 = vmatpush3.bf16.msra.mxu0 %v34_v4  ;;  %v94_v13 = vld [vmem:[%s359_s3 + $0x18] sm:$0xff]  ;;  %v29_v15 = vpack.c.bf16 %v28_v11, %v27_v10  ;;  %v95_v16 = vld [vmem:[%s359_s3 + $0x20] sm:$0xff]  ;;  %v96_v17 = vld [vmem:[%s359_s3 + $0x28] sm:$0xff] }
   0x5   :  { %225 = vmatprep.subr.bf16.mxu0 %v249_v0  ;;  %232 = vmatpush3.bf16.msra.mxu1 %v99_v12  ;;  %v100_v14 = vpack.c.bf16 %v94_v13, %v93_v8  ;;  %v101_v18 = vpack.c.bf16 %v96_v17, %v95_v16  ;;  %v97_v19 = vld [vmem:[%s359_s3 + $0x30] sm:$0xff]  ;;  %v98_v20 = vld [vmem:[%s359_s3 + $0x38] sm:$0xff]  ;;  %v209_v22 = vld [vmem:[%s361_s2] ss:$0 sm:$0xff] }
   0x6   :  { %233 = vmatprep.subr.bf16.mxu1 %v249_v0  ;;  %v102_v21 = vpack.c.bf16 %v98_v20, %v97_v19  ;;  %v211_v32 = vld [vmem:[%s362_s4] ss:$0 sm:$0xff] }
   0x7   :  { %v213_v60 = vld [vmem:[%s363_s5] ss:$0 sm:$0xff] }
   0x8   :  { %226 = vmatpush3.bf16.msra.mxu0 %v35_v9  ;;  %v214_v62 = vld [vmem:[%s364_s6] ss:$0 sm:$0xff] }
   0x9   :  { %234 = vmatpush3.bf16.msra.mxu1 %v100_v14 }
   0xa   :  { %235 = vmatprep.subr.bf16.mxu1 %v249_v0 }
   0xb   :  { %228 = vmatmul.mubr.msk.bf16.vlgmr.msra.gmra.mrb[0].mxu0 %vm43_vm1, %v29_v15 }
   0xd   :  { %236 = vmatpush3.bf16.msra.mxu1 %v101_v18 }
   0xe   :  { %237 = vmatprep.subr.bf16.mxu1 %v249_v0 }
  0x11   :  { %238 = vmatpush3.bf16.msra.mxu1 %v102_v21 }
  0xde   :  { %v81_v23 = vpop.f32.mrb[0].mxu0 }
  0xdf   :  { %v82_v24 = vadd.f32 %v209_v22, %v81_v23  ;;  %v229_v25 = vpop.f32.mrb[1].mxu0 }
  0xe0   :  { %v84_v26 = vpop.f32.mrb[2].mxu0 }
  0xe1   :  { %v85_v27 = vadd.f32 %v209_v22, %v84_v26  ;;  %v230_v28 = vpop.f32.mrb[3].mxu0  ;;  %v88_v29 = vmax.f32 %v82_v24, 0.0 }
  0xe3   :  { %v89_v30 = vmax.f32 %v85_v27, 0.0 }
  0xe5   :  { %v90_v31 = vpack.c.bf16 %v89_v30, %v88_v29 }
  0xe7   :  { %240 = vmatmul.mubr.msk.bf16.vlgmr.msra.gmra.mrb[0].mxu1 %vm110_vm2, %v90_v31 }
 0x1ba   :  { %v148_v33 = vpop.f32.mrb[0].mxu1 }
 0x1bb   :  { %v149_v34 = vadd.f32 %v211_v32, %v148_v33  ;;  %v241_v35 = vpop.f32.mrb[1].mxu1 }
 0x1bc   :  { %v151_v36 = vpop.f32.mrb[2].mxu1 }
 0x1bd   :  { %v152_v37 = vadd.f32 %v211_v32, %v151_v36  ;;  %v242_v38 = vpop.f32.mrb[3].mxu1  ;;  %v155_v39 = vadd.f32 %v149_v34, %v27_v10 }
 0x1bf   :  { %v157_v40 = vsel %vm43_vm1, %v155_v39, 0.0  ;;  %v156_v41 = vadd.f32 %v152_v37, %v28_v11 }
 0x1c0   :  { %158 = vadd.xlane.f32.xlu0 %v157_v40 }
 0x1c1   :  { %v161_v42 = vsel %vm160_vm3, %v156_v41, 0.0 }
 0x1c4   :  { %162 = vadd.xlane.f32.xlu0 %v161_v42 }
 0x24d   :  { %v159_v43 = vpop.xlane.xlu0 %158 }
 0x24e   :  { %v165_v44 = vmul.f32 0.03125, %v159_v43 }
 0x250   :  { %v167_v45 = vsub.f32 %v155_v39, %v165_v44 }
 0x251   :  { %v163_v46 = vpop.xlane.xlu0 %162 }
 0x252   :  { %v166_v47 = vmul.f32 0.03125, %v163_v46  ;;  %v169_v48 = vmul.f32 %v167_v45, %v167_v45 }
 0x254   :  { %v168_v49 = vsub.f32 %v156_v41, %v166_v47  ;;  %v171_v50 = vsel %vm43_vm1, %v169_v48, 0.0 }
 0x255   :  { %172 = vadd.xlane.f32.xlu1 %v171_v50 }
 0x256   :  { %v170_v51 = vmul.f32 %v168_v49, %v168_v49 }
 0x258   :  { %v174_v52 = vsel %vm160_vm3, %v170_v51, 0.0 }
 0x259   :  { %175 = vadd.xlane.f32.xlu1 %v174_v52 }
 0x2e2   :  { %v173_v53 = vpop.xlane.xlu1 %172 }
 0x2e3   :  { %v177_v54 = vmul.f32 0.03125, %v173_v53 }
 0x2e5   :  { %v179_v55 = vadd.f32 1e-05, %v177_v54 }
 0x2e6   :  { %v176_v56 = vpop.xlane.xlu1 %175 }
 0x2e7   :  { %245 = vrsqrt.f32 %v179_v55  ;;  %v178_v57 = vmul.f32 0.03125, %v176_v56 }
 0x2e9   :  { %v180_v58 = vadd.f32 1e-05, %v178_v57 }
 0x2eb   :  { %247 = vrsqrt.f32 %v180_v58 }
 0x2f1   :  { %v246_v59 = vpop.eup %245 }
 0x2f2   :  { %v183_v61 = vmul.f32 %v246_v59, %v167_v45 }
 0x2f4   :  { %v192_v63 = vmul.f32 %v213_v60, %v183_v61 }
 0x2f5   :  { %v248_v0 = vpop.eup %247 }
 0x2f6   :  { %v201_v1 = vadd.f32 %v214_v62, %v192_v63  ;;  %v184_v2 = vmul.f32 %v248_v0, %v168_v49 }
 0x2f8   :  { %203 = vst.msk [vmem:[%s365_s7] sm:$0xff] %vm43_vm1, %v201_v1  ;;  %v193_v3 = vmul.f32 %v213_v60, %v184_v2 }
 0x2fa   :  { %v202_v4 = vadd.f32 %v214_v62, %v193_v3 }
 0x2fc   :  { %204 = vst.msk [vmem:[%s365_s7 + $0x8] sm:$0xf] %vm160_vm3, %v202_v4 }

// kernel: onset_transformer_forward.31
= control target key start
LH: loop header
LB: loop body
LE: loop exit
PB: predicated region body
PF: predicated region fallthrough
CT: control target
= control target key end

     0   :  { %v99_v0 = vmov 0.0   ;;  %vm100_vm0 = vmmov 0   ;;  %vm31_vm1 = vcmask 261120   ;;  %vm76_vm2 = vcmask 130048   ;;  %s148_s1 = inlined_call_operand.vmem [shape: f32[32,16], index: 1, kind: input, shape index: {}]   ;;  %s149_s0 = inlined_call_operand.vmem [shape: f32[12,32], index: 0, kind: input, shape index: {}]   ;;  %s150_s2 = inlined_call_operand.vmem [shape: f32[1,16], index: 2, kind: input, shape index: {}]   ;;  %s151_s3 = inlined_call_operand.vmem [shape: f32[12,16], index: 3, kind: output, shape index: {}]  }
   0x1   :  { %89 = vmatprep.subr.bf16.mxu0 %v99_v0  ;;  %v18_v1 = vld [vmem:[%s148_s1] sm:$0xff]  ;;  %v19_v2 = vld [vmem:[%s148_s1 + $0x8] sm:$0xff]  ;;  %v20_v3 = vld [vmem:[%s148_s1 + $0x10] sm:$0xff]  ;;  %93 = vmatprep.mubr.msk.bf16.mxu0 %vm100_vm0, %v99_v0  ;;  %vm78_vm3 = vcmask 125952  }
   0x2   :  { %v22_v4 = vpack.c.bf16 %v19_v2, %v18_v1  ;;  %v21_v5 = vld [vmem:[%s148_s1 + $0x18] sm:$0xff]  ;;  %v15_v7 = vld [vmem:[%s149_s0] sm:$0xff]  ;;  %v16_v8 = vld [vmem:[%s149_s0 + $0x8] sm:$0xf] }
   0x3   :  { %v23_v6 = vpack.c.bf16 %v21_v5, %v20_v3  ;;  %v17_v9 = vpack.c.bf16 %v16_v8, %v15_v7  ;;  %v84_v10 = vld [vmem:[%s150_s2] ss:$0 sm:$0xff] }
   0x4   :  { %90 = vmatpush3.bf16.msra.mxu0 %v22_v4 }
   0x5   :  { %91 = vmatprep.subr.bf16.mxu0 %v99_v0 }
   0x8   :  { %92 = vmatpush3.bf16.msra.mxu0 %v23_v6 }
   0xb   :  { %94 = vmatmul.mubr.msk.bf16.vlgmr.msra.gmra.mrb[0].mxu0 %vm31_vm1, %v17_v9 }
  0xde   :  { %v69_v11 = vpop.f32.mrb[0].mxu0 }
  0xdf   :  { %v70_v12 = vadd.f32 %v84_v10, %v69_v11  ;;  %v95_v13 = vpop.f32.mrb[1].mxu0 }
  0xe0   :  { %v72_v14 = vpop.f32.mrb[2].mxu0 }
  0xe1   :  { %77 = vst.msk [vmem:[%s151_s3] sm:$0xff] %vm76_vm2, %v70_v12  ;;  %v73_v15 = vadd.f32 %v84_v10, %v72_v14  ;;  %v96_v16 = vpop.f32.mrb[3].mxu0 }
  0xe3   :  { %79 = vst.msk [vmem:[%s151_s3 + $0x8] sm:$0xf] %vm78_vm3, %v73_v15 }

</bundles_post_ra>
